<compile_context>
chip_gen: v7x
topology: tpu7x:2x2x1
jax: 0.10.0
libtpu: 0.0.40
codegen_flags: <defaults>
</compile_context>

<pallas_src>
import functools

import jax
import jax.numpy as jnp
from jax import lax
from jax.experimental import pallas as pl
from jax.experimental.pallas import tpu as pltpu


# ----------------------------------------------------------------------------
# Fused kernel: one grid step = NB images (G=1 -> whole batch)
# ----------------------------------------------------------------------------
def fused_cnn_kernel(p1_ref, w1_ref, s1_ref, b1_ref,
                     w2_ref, s2_ref, b2_ref,
                     fw1_ref, fb1_ref, fw2_ref, fb2_ref,
                     o_ref,
                     z_scr,
                     *, NB, H, W, C1, C2):
    H2, W2 = H // 2, W // 2

    # ---- conv1 (single im2col matmul, K padded to 32) + BN1 + ReLU ----------
    p1 = p1_ref[...].reshape(NB * H * W, p1_ref.shape[-1])              # bf16
    y1 = jnp.dot(p1, w1_ref[...], preferred_element_type=jnp.float32)   # (NB*H*W, C1)
    y1 = jnp.maximum(y1 * s1_ref[...] + b1_ref[...], 0.0)

    # ---- 2x2 / stride-2 max pool (all in registers, no scratch round trip) --
    # rows of y1 are ordered (n, h, w).
    y1w = y1.reshape(NB * H * W2, 2, C1)
    pw = jnp.maximum(y1w[:, 0, :], y1w[:, 1, :])                        # W-pooled
    pwh = pw.reshape(NB * H2, 2, W2, C1)
    pooled = jnp.maximum(pwh[:, 0], pwh[:, 1])                          # (NB*H2, W2, C1)

    # ---- zero-ringed pool buffer (bf16, stays in VMEM) ----------------------
    # Halo never changes -> zero the buffer once; interior is fully overwritten
    # every step.
    @pl.when(pl.program_id(0) == 0)
    def _():
        z_scr[...] = jnp.zeros_like(z_scr)
    z_scr[:, pl.ds(1, H2), pl.ds(1, W2), :] = (
        pooled.reshape(NB, H2, W2, C1).astype(z_scr.dtype))

    # ---- conv2: unrolled 9-tap accumulate + BN2 + ReLU ----------------------
    acc = jnp.zeros((NB * H2 * W2, C2), jnp.float32)
    for dh in range(3):
        for dw in range(3):
            tap = z_scr[:, pl.ds(dh, H2), pl.ds(dw, W2), :]             # (NB,H2,W2,C1)
            tap = tap.reshape(NB * H2 * W2, C1)
            acc = acc + jnp.dot(tap, w2_ref[dh * 3 + dw],
                                preferred_element_type=jnp.float32)
    y2 = jnp.maximum(acc * s2_ref[...] + b2_ref[...], 0.0)              # (NB*H2*W2, C2)

    # ---- global max pool (AdaptiveMaxPool2d((1,1))) + fc1 + ReLU + fc2 ------
    g = jnp.max(y2.reshape(NB, H2 * W2, C2), axis=1)                    # (NB, C2)
    h = jnp.dot(g.astype(fw1_ref.dtype), fw1_ref[...],
                preferred_element_type=jnp.float32) + fb1_ref[...]
    h = jnp.maximum(h, 0.0)
    logits = jnp.dot(h.astype(fw2_ref.dtype), fw2_ref[...],
                     preferred_element_type=jnp.float32) + fb2_ref[...]
    o_ref[...] = logits[None]                                           # (1, NB, 128)


# ----------------------------------------------------------------------------
# Wrapper
# ----------------------------------------------------------------------------
def _im2col3x3(x_nhwc, k_pad):
    """(N,H,W,C) -> (N, H*W, k_pad) patches, (dh, dw, c) channel order."""
    N, H, W, C = x_nhwc.shape
    xp = jnp.pad(x_nhwc, ((0, 0), (1, 1), (1, 1), (0, 0)))
    cols = [xp[:, dh:dh + H, dw:dw + W, :] for dh in range(3) for dw in range(3)]
    p = jnp.concatenate(cols, axis=-1).reshape(N, H * W, 9 * C)
    if k_pad > 9 * C:
        p = jnp.pad(p, ((0, 0), (0, 0), (0, k_pad - 9 * C)))
    return p


def cnn_forward(x_nchw, p):
    x = jnp.transpose(x_nchw, (0, 2, 3, 1)).astype(jnp.float32)         # NCHW -> NHWC
    N, H, W, cin = x.shape
    C1 = p["w1"].shape[-1]
    C2 = p["w2"].shape[-1]
    ncls = p["fw2"].shape[-1]
    assert H % 2 == 0 and W % 2 == 0
    H2, W2 = H // 2, W // 2
    K1 = 32                                    # 9*cin (=27) padded to 32
    assert 9 * cin <= K1
    OUT_PAD = 128                              # lane-dense output store
    assert ncls <= OUT_PAD

    # conv1 im2col in the wrapper (input is tiny); bf16 operands, f32 accumulate.
    # TODO(synk): move the conv1 im2col in-kernel if H/W or batch ever scale.
    p1 = _im2col3x3(x, K1).astype(jnp.bfloat16)                         # (N, H*W, K1)
    w1k = p["w1"].reshape(9 * cin, C1)
    w1k = jnp.pad(w1k, ((0, K1 - 9 * cin), (0, 0))).astype(jnp.bfloat16)
    w2k = p["w2"].reshape(9, C1, C2).astype(jnp.bfloat16)               # per-tap
    fw1 = p["fw1"].astype(jnp.bfloat16)
    fw2 = jnp.pad(p["fw2"], ((0, 0), (0, OUT_PAD - ncls))).astype(jnp.bfloat16)
    fb2 = jnp.pad(p["fb2"], ((0, 0), (0, OUT_PAD - ncls)))

    # Single grid step: 1-TC v5e/v6e gain nothing from a grid split, and the
    # kernel is latency-bound at this size even on 2-TC v7x.
    NB, G = N, 1
    W2P = ((W2 + 2 + 7) // 8) * 8              # pool-buffer W padded to sublanes

    kern = functools.partial(fused_cnn_kernel, NB=NB, H=H, W=W, C1=C1, C2=C2)
    out = pl.pallas_call(
        kern,
        out_shape=jax.ShapeDtypeStruct((G, NB, OUT_PAD), jnp.float32),
        grid_spec=pltpu.PrefetchScalarGridSpec(
            num_scalar_prefetch=0,
            grid=(G,),
            in_specs=[
                pl.BlockSpec((NB, H * W, K1), lambda i: (i, 0, 0)),
                pl.BlockSpec((K1, C1), lambda i: (0, 0)),
                pl.BlockSpec((1, C1), lambda i: (0, 0)),
                pl.BlockSpec((1, C1), lambda i: (0, 0)),
                pl.BlockSpec((9, C1, C2), lambda i: (0, 0, 0)),
                pl.BlockSpec((1, C2), lambda i: (0, 0)),
                pl.BlockSpec((1, C2), lambda i: (0, 0)),
                pl.BlockSpec(fw1.shape, lambda i: (0, 0)),
                pl.BlockSpec(p["fb1"].shape, lambda i: (0, 0)),
                pl.BlockSpec(fw2.shape, lambda i: (0, 0)),
                pl.BlockSpec(fb2.shape, lambda i: (0, 0)),
            ],
            out_specs=pl.BlockSpec((1, NB, OUT_PAD), lambda i: (i, 0, 0)),
            scratch_shapes=[
                pltpu.VMEM((NB, H2 + 2, W2P, C1), jnp.bfloat16),        # zero-ringed pool
            ],
        ),
        compiler_params=pltpu.CompilerParams(dimension_semantics=("arbitrary",)),
    )(p1, w1k, p["s1"], p["bb1"], w2k, p["s2"], p["bb2"],
      fw1, p["fb1"], fw2, fb2)
    return out.reshape(N, OUT_PAD)[:, :ncls]


# ----------------------------------------------------------------------------
# BN folding / pure-JAX reference
# ----------------------------------------------------------------------------
def fold_bn(conv_bias, gamma, beta, mean, var, eps=1e-5):
    s = gamma / jnp.sqrt(var + eps)
    b = (conv_bias - mean) * s + beta
    return s.reshape(1, -1), b.reshape(1, -1)


def reference_forward(x_nchw, p):
    x = jnp.transpose(x_nchw, (0, 2, 3, 1))
    dn = ("NHWC", "HWIO", "NHWC")
    prec = lax.Precision.HIGHEST
    y = lax.conv_general_dilated(x, p["w1"], (1, 1), "SAME",
                                 dimension_numbers=dn, precision=prec)
    y = jnp.maximum(y * p["s1"].reshape(-1) + p["bb1"].reshape(-1), 0.0)
    y = lax.reduce_window(y, -jnp.inf, lax.max, (1, 2, 2, 1), (1, 2, 2, 1), "VALID")
    y = lax.conv_general_dilated(y, p["w2"], (1, 1), "SAME",
                                 dimension_numbers=dn, precision=prec)
    y = jnp.maximum(y * p["s2"].reshape(-1) + p["bb2"].reshape(-1), 0.0)
    g = jnp.max(y, axis=(1, 2))
    h = jnp.maximum(jnp.dot(g, p["fw1"], precision=prec) + p["fb1"].reshape(-1), 0.0)
    return jnp.dot(h, p["fw2"], precision=prec) + p["fb2"].reshape(-1)


if __name__ == "__main__":
    N, C, Hin, Win = 2, 3, 16, 16
    num_classes = 3

    key = jax.random.PRNGKey(0)
    ks = jax.random.split(key, 20)

    x_nchw = jax.random.normal(ks[0], (N, C, Hin, Win), jnp.float32)

    # conv1 / bn1 parameters
    w1 = jax.random.normal(ks[1], (3, 3, C, 32), jnp.float32) * 0.2
    cb1 = jax.random.normal(ks[2], (32,), jnp.float32) * 0.1
    g1 = 1.0 + 0.1 * jax.random.normal(ks[3], (32,), jnp.float32)
    be1 = 0.1 * jax.random.normal(ks[4], (32,), jnp.float32)
    m1 = 0.1 * jax.random.normal(ks[5], (32,), jnp.float32)
    v1 = 0.5 + jnp.abs(jax.random.normal(ks[6], (32,), jnp.float32))
    s1, bb1 = fold_bn(cb1, g1, be1, m1, v1)

    # conv2 / bn2 parameters
    w2 = jax.random.normal(ks[7], (3, 3, 32, 64), jnp.float32) * 0.1
    cb2 = jax.random.normal(ks[8], (64,), jnp.float32) * 0.1
    g2 = 1.0 + 0.1 * jax.random.normal(ks[9], (64,), jnp.float32)
    be2 = 0.1 * jax.random.normal(ks[10], (64,), jnp.float32)
    m2 = 0.1 * jax.random.normal(ks[11], (64,), jnp.float32)
    v2 = 0.5 + jnp.abs(jax.random.normal(ks[12], (64,), jnp.float32))
    s2, bb2 = fold_bn(cb2, g2, be2, m2, v2)

    # fc parameters, stored (in, out)
    fw1 = jax.random.normal(ks[13], (64, 32), jnp.float32) * 0.2
    fb1 = (jax.random.normal(ks[14], (32,), jnp.float32) * 0.1).reshape(1, -1)
    fw2 = jax.random.normal(ks[15], (32, num_classes), jnp.float32) * 0.2
    fb2 = (jax.random.normal(ks[16], (num_classes,), jnp.float32) * 0.1).reshape(1, -1)

    params = dict(w1=w1, s1=s1, bb1=bb1, w2=w2, s2=s2, bb2=bb2,
                  fw1=fw1, fb1=fb1, fw2=fw2, fb2=fb2)

    cnn_fwd = jax.jit(cnn_forward)
    out = cnn_fwd(x_nchw, params)
    out = jax.block_until_ready(out)
    assert out.shape == (N, num_classes), out.shape

    ref = reference_forward(x_nchw, params)
    max_err = float(jnp.max(jnp.abs(out - ref)))
    max_ref = float(jnp.max(jnp.abs(ref)))
    # Kernel uses bf16 matmul operands with f32 accumulation -> relaxed tolerance
    # vs. the f32 HIGHEST-precision reference.
    assert max_err < 2e-2 * (1.0 + max_ref), f"mismatch: {max_err} (ref max {max_ref})"

    print("KERNEL_OK")
</pallas_src>

<mosaic_0001>
module attributes {stable_mosaic.version = 11 : i64} {
  func.func @fused_cnn_kernel(%arg0: i32, %arg1: memref<2x256x32xbf16, #tpu.memory_space<vmem>>, %arg2: memref<32x32xbf16, #tpu.memory_space<vmem>>, %arg3: memref<1x32xf32, #tpu.memory_space<vmem>>, %arg4: memref<1x32xf32, #tpu.memory_space<vmem>>, %arg5: memref<9x32x64xbf16, #tpu.memory_space<vmem>>, %arg6: memref<1x64xf32, #tpu.memory_space<vmem>>, %arg7: memref<1x64xf32, #tpu.memory_space<vmem>>, %arg8: memref<64x32xbf16, #tpu.memory_space<vmem>>, %arg9: memref<1x32xf32, #tpu.memory_space<vmem>>, %arg10: memref<32x128xbf16, #tpu.memory_space<vmem>>, %arg11: memref<1x128xf32, #tpu.memory_space<vmem>>, %arg12: memref<1x2x128xf32, #tpu.memory_space<vmem>>, %arg13: memref<2x10x16x32xbf16, #tpu.memory_space<vmem>>) attributes {dimension_semantics = [#tpu.dimension_semantics<arbitrary>], iteration_bounds = array<i64: 1>, scalar_prefetch = 0 : i64, scratch_operands = 1 : i64, tpu.core_type = #tpu.core_type<tc>, window_params = [{transform_indices = @transform_0, window_bounds = array<i64: 2, 256, 32>}, {pipeline_mode = #tpu.pipeline_mode<synchronous>, transform_indices = @transform_1, window_bounds = array<i64: 32, 32>}, {pipeline_mode = #tpu.pipeline_mode<synchronous>, transform_indices = @transform_2, window_bounds = array<i64: 1, 32>}, {pipeline_mode = #tpu.pipeline_mode<synchronous>, transform_indices = @transform_3, window_bounds = array<i64: 1, 32>}, {pipeline_mode = #tpu.pipeline_mode<synchronous>, transform_indices = @transform_4, window_bounds = array<i64: 9, 32, 64>}, {pipeline_mode = #tpu.pipeline_mode<synchronous>, transform_indices = @transform_5, window_bounds = array<i64: 1, 64>}, {pipeline_mode = #tpu.pipeline_mode<synchronous>, transform_indices = @transform_6, window_bounds = array<i64: 1, 64>}, {pipeline_mode = #tpu.pipeline_mode<synchronous>, transform_indices = @transform_7, window_bounds = array<i64: 64, 32>}, {pipeline_mode = #tpu.pipeline_mode<synchronous>, transform_indices = @transform_8, window_bounds = array<i64: 1, 32>}, {pipeline_mode = #tpu.pipeline_mode<synchronous>, transform_indices = @transform_9, window_bounds = array<i64: 32, 128>}, {pipeline_mode = #tpu.pipeline_mode<synchronous>, transform_indices = @transform_10, window_bounds = array<i64: 1, 128>}, {transform_indices = @transform_11, window_bounds = array<i64: 1, 2, 128>}]} {
    %c0 = arith.constant 0 : index
    %c0_0 = arith.constant 0 : index
    %c0_1 = arith.constant 0 : index
    %0 = vector.load %arg1[%c0, %c0_0, %c0_1] : memref<2x256x32xbf16, #tpu.memory_space<vmem>>, vector<2x256x32xbf16>
    %1 = vector.shape_cast %0 : vector<2x256x32xbf16> to vector<512x32xbf16>
    %c0_2 = arith.constant 0 : index
    %c0_3 = arith.constant 0 : index
    %2 = vector.load %arg2[%c0_2, %c0_3] : memref<32x32xbf16, #tpu.memory_space<vmem>>, vector<32x32xbf16>
    %cst = arith.constant dense<0.000000e+00> : vector<512x32xf32>
    %3 = tpu.matmul %1, %2, %cst {dimension_numbers = #tpu.dot_dimension_numbers<[1], [0], [0], [1], [0, 0, 1, 1], [], []>} : vector<512x32xbf16>, vector<32x32xbf16>, vector<512x32xf32> -> vector<512x32xf32>
    %c0_4 = arith.constant 0 : index
    %c0_5 = arith.constant 0 : index
    %4 = vector.load %arg3[%c0_4, %c0_5] : memref<1x32xf32, #tpu.memory_space<vmem>>, vector<1x32xf32>
    %5 = vector.broadcast %4 : vector<1x32xf32> to vector<512x32xf32>
    %6 = arith.mulf %3, %5 : vector<512x32xf32>
    %c0_6 = arith.constant 0 : index
    %c0_7 = arith.constant 0 : index
    %7 = vector.load %arg4[%c0_6, %c0_7] : memref<1x32xf32, #tpu.memory_space<vmem>>, vector<1x32xf32>
    %8 = vector.broadcast %7 : vector<1x32xf32> to vector<512x32xf32>
    %9 = arith.addf %6, %8 : vector<512x32xf32>
    %cst_8 = arith.constant 0.000000e+00 : f32
    %10 = vector.broadcast %cst_8 : f32 to vector<512x32xf32>
    %11 = arith.maximumf %9, %10 : vector<512x32xf32>
    %12 = vector.shape_cast %11 : vector<512x32xf32> to vector<256x2x32xf32>
    %13 = vector.extract_strided_slice %12 {offsets = [0, 0, 0], sizes = [256, 1, 32], strides = [1, 1, 1]} : vector<256x2x32xf32> to vector<256x1x32xf32>
    %14 = vector.shape_cast %13 : vector<256x1x32xf32> to vector<256x32xf32>
    %15 = vector.extract_strided_slice %12 {offsets = [0, 1, 0], sizes = [256, 1, 32], strides = [1, 1, 1]} : vector<256x2x32xf32> to vector<256x1x32xf32>
    %16 = vector.shape_cast %15 : vector<256x1x32xf32> to vector<256x32xf32>
    %17 = arith.maximumf %14, %16 : vector<256x32xf32>
    %18 = vector.shape_cast %17 : vector<256x32xf32> to vector<16x2x8x32xf32>
    %19 = vector.extract_strided_slice %18 {offsets = [0, 0, 0, 0], sizes = [16, 1, 8, 32], strides = [1, 1, 1, 1]} : vector<16x2x8x32xf32> to vector<16x1x8x32xf32>
    %20 = vector.shape_cast %19 : vector<16x1x8x32xf32> to vector<16x8x32xf32>
    %21 = vector.extract_strided_slice %18 {offsets = [0, 1, 0, 0], sizes = [16, 1, 8, 32], strides = [1, 1, 1, 1]} : vector<16x2x8x32xf32> to vector<16x1x8x32xf32>
    %22 = vector.shape_cast %21 : vector<16x1x8x32xf32> to vector<16x8x32xf32>
    %23 = arith.maximumf %20, %22 : vector<16x8x32xf32>
    %c0_i32 = arith.constant 0 : i32
    %24 = arith.cmpi eq, %arg0, %c0_i32 : i32
    %25 = arith.extui %24 : i1 to i32
    %c0_i32_9 = arith.constant 0 : i32
    %26 = arith.cmpi ne, %25, %c0_i32_9 : i32
    scf.if %26 {
      %cst_99 = arith.constant 0.000000e+00 : bf16
      %111 = vector.broadcast %cst_99 : bf16 to vector<2x10x16x32xbf16>
      %c0_100 = arith.constant 0 : index
      %c0_101 = arith.constant 0 : index
      %c0_102 = arith.constant 0 : index
      %c0_103 = arith.constant 0 : index
      %112 = vector.load %arg13[%c0_100, %c0_101, %c0_102, %c0_103] : memref<2x10x16x32xbf16, #tpu.memory_space<vmem>>, vector<2x10x16x32xbf16>
      tpu.vector_store %arg13[%c0_100, %c0_101, %c0_102, %c0_103], %111 {strides = array<i32>} : memref<2x10x16x32xbf16, #tpu.memory_space<vmem>>, vector<2x10x16x32xbf16>,
    } else {
    }
    %27 = vector.shape_cast %23 : vector<16x8x32xf32> to vector<2x8x8x32xf32>
    %28 = arith.truncf %27 : vector<2x8x8x32xf32> to vector<2x8x8x32xbf16>
    %c0_10 = arith.constant 0 : index
    %c1 = arith.constant 1 : index
    %c1_11 = arith.constant 1 : index
    %c0_12 = arith.constant 0 : index
    %29 = vector.load %arg13[%c0_10, %c1, %c1_11, %c0_12] : memref<2x10x16x32xbf16, #tpu.memory_space<vmem>>, vector<2x8x8x32xbf16>
    tpu.vector_store %arg13[%c0_10, %c1, %c1_11, %c0_12], %28 {strides = array<i32>} : memref<2x10x16x32xbf16, #tpu.memory_space<vmem>>, vector<2x8x8x32xbf16>,
    %cst_13 = arith.constant 0.000000e+00 : f32
    %30 = vector.broadcast %cst_13 : f32 to vector<128x64xf32>
    %c0_14 = arith.constant 0 : index
    %c0_15 = arith.constant 0 : index
    %c0_16 = arith.constant 0 : index
    %c0_17 = arith.constant 0 : index
    %31 = vector.load %arg13[%c0_14, %c0_15, %c0_16, %c0_17] : memref<2x10x16x32xbf16, #tpu.memory_space<vmem>>, vector<2x8x8x32xbf16>
    %32 = vector.shape_cast %31 : vector<2x8x8x32xbf16> to vector<128x32xbf16>
    %c0_18 = arith.constant 0 : index
    %c0_19 = arith.constant 0 : index
    %c0_20 = arith.constant 0 : index
    %33 = vector.load %arg5[%c0_18, %c0_19, %c0_20] : memref<9x32x64xbf16, #tpu.memory_space<vmem>>, vector<1x32x64xbf16>
    %34 = vector.shape_cast %33 : vector<1x32x64xbf16> to vector<32x64xbf16>
    %cst_21 = arith.constant dense<0.000000e+00> : vector<128x64xf32>
    %35 = tpu.matmul %32, %34, %cst_21 {dimension_numbers = #tpu.dot_dimension_numbers<[1], [0], [0], [1], [0, 0, 1, 1], [], []>} : vector<128x32xbf16>, vector<32x64xbf16>, vector<128x64xf32> -> vector<128x64xf32>
    %36 = arith.addf %30, %35 : vector<128x64xf32>
    %c0_22 = arith.constant 0 : index
    %c0_23 = arith.constant 0 : index
    %c1_24 = arith.constant 1 : index
    %c0_25 = arith.constant 0 : index
    %37 = vector.load %arg13[%c0_22, %c0_23, %c1_24, %c0_25] : memref<2x10x16x32xbf16, #tpu.memory_space<vmem>>, vector<2x8x8x32xbf16>
    %38 = vector.shape_cast %37 : vector<2x8x8x32xbf16> to vector<128x32xbf16>
    %c1_26 = arith.constant 1 : index
    %c0_27 = arith.constant 0 : index
    %c0_28 = arith.constant 0 : index
    %39 = vector.load %arg5[%c1_26, %c0_27, %c0_28] : memref<9x32x64xbf16, #tpu.memory_space<vmem>>, vector<1x32x64xbf16>
    %40 = vector.shape_cast %39 : vector<1x32x64xbf16> to vector<32x64xbf16>
    %cst_29 = arith.constant dense<0.000000e+00> : vector<128x64xf32>
    %41 = tpu.matmul %38, %40, %cst_29 {dimension_numbers = #tpu.dot_dimension_numbers<[1], [0], [0], [1], [0, 0, 1, 1], [], []>} : vector<128x32xbf16>, vector<32x64xbf16>, vector<128x64xf32> -> vector<128x64xf32>
    %42 = arith.addf %36, %41 : vector<128x64xf32>
    %c0_30 = arith.constant 0 : index
    %c0_31 = arith.constant 0 : index
    %c2 = arith.constant 2 : index
    %c0_32 = arith.constant 0 : index
    %43 = vector.load %arg13[%c0_30, %c0_31, %c2, %c0_32] : memref<2x10x16x32xbf16, #tpu.memory_space<vmem>>, vector<2x8x8x32xbf16>
    %44 = vector.shape_cast %43 : vector<2x8x8x32xbf16> to vector<128x32xbf16>
    %c2_33 = arith.constant 2 : index
    %c0_34 = arith.constant 0 : index
    %c0_35 = arith.constant 0 : index
    %45 = vector.load %arg5[%c2_33, %c0_34, %c0_35] : memref<9x32x64xbf16, #tpu.memory_space<vmem>>, vector<1x32x64xbf16>
    %46 = vector.shape_cast %45 : vector<1x32x64xbf16> to vector<32x64xbf16>
    %cst_36 = arith.constant dense<0.000000e+00> : vector<128x64xf32>
    %47 = tpu.matmul %44, %46, %cst_36 {dimension_numbers = #tpu.dot_dimension_numbers<[1], [0], [0], [1], [0, 0, 1, 1], [], []>} : vector<128x32xbf16>, vector<32x64xbf16>, vector<128x64xf32> -> vector<128x64xf32>
    %48 = arith.addf %42, %47 : vector<128x64xf32>
    %c0_37 = arith.constant 0 : index
    %c1_38 = arith.constant 1 : index
    %c0_39 = arith.constant 0 : index
    %c0_40 = arith.constant 0 : index
    %49 = vector.load %arg13[%c0_37, %c1_38, %c0_39, %c0_40] : memref<2x10x16x32xbf16, #tpu.memory_space<vmem>>, vector<2x8x8x32xbf16>
    %50 = vector.shape_cast %49 : vector<2x8x8x32xbf16> to vector<128x32xbf16>
    %c3 = arith.constant 3 : index
    %c0_41 = arith.constant 0 : index
    %c0_42 = arith.constant 0 : index
    %51 = vector.load %arg5[%c3, %c0_41, %c0_42] : memref<9x32x64xbf16, #tpu.memory_space<vmem>>, vector<1x32x64xbf16>
    %52 = vector.shape_cast %51 : vector<1x32x64xbf16> to vector<32x64xbf16>
    %cst_43 = arith.constant dense<0.000000e+00> : vector<128x64xf32>
    %53 = tpu.matmul %50, %52, %cst_43 {dimension_numbers = #tpu.dot_dimension_numbers<[1], [0], [0], [1], [0, 0, 1, 1], [], []>} : vector<128x32xbf16>, vector<32x64xbf16>, vector<128x64xf32> -> vector<128x64xf32>
    %54 = arith.addf %48, %53 : vector<128x64xf32>
    %c0_44 = arith.constant 0 : index
    %c1_45 = arith.constant 1 : index
    %c1_46 = arith.constant 1 : index
    %c0_47 = arith.constant 0 : index
    %55 = vector.load %arg13[%c0_44, %c1_45, %c1_46, %c0_47] : memref<2x10x16x32xbf16, #tpu.memory_space<vmem>>, vector<2x8x8x32xbf16>
    %56 = vector.shape_cast %55 : vector<2x8x8x32xbf16> to vector<128x32xbf16>
    %c4 = arith.constant 4 : index
    %c0_48 = arith.constant 0 : index
    %c0_49 = arith.constant 0 : index
    %57 = vector.load %arg5[%c4, %c0_48, %c0_49] : memref<9x32x64xbf16, #tpu.memory_space<vmem>>, vector<1x32x64xbf16>
    %58 = vector.shape_cast %57 : vector<1x32x64xbf16> to vector<32x64xbf16>
    %cst_50 = arith.constant dense<0.000000e+00> : vector<128x64xf32>
    %59 = tpu.matmul %56, %58, %cst_50 {dimension_numbers = #tpu.dot_dimension_numbers<[1], [0], [0], [1], [0, 0, 1, 1], [], []>} : vector<128x32xbf16>, vector<32x64xbf16>, vector<128x64xf32> -> vector<128x64xf32>
    %60 = arith.addf %54, %59 : vector<128x64xf32>
    %c0_51 = arith.constant 0 : index
    %c1_52 = arith.constant 1 : index
    %c2_53 = arith.constant 2 : index
    %c0_54 = arith.constant 0 : index
    %61 = vector.load %arg13[%c0_51, %c1_52, %c2_53, %c0_54] : memref<2x10x16x32xbf16, #tpu.memory_space<vmem>>, vector<2x8x8x32xbf16>
    %62 = vector.shape_cast %61 : vector<2x8x8x32xbf16> to vector<128x32xbf16>
    %c5 = arith.constant 5 : index
    %c0_55 = arith.constant 0 : index
    %c0_56 = arith.constant 0 : index
    %63 = vector.load %arg5[%c5, %c0_55, %c0_56] : memref<9x32x64xbf16, #tpu.memory_space<vmem>>, vector<1x32x64xbf16>
    %64 = vector.shape_cast %63 : vector<1x32x64xbf16> to vector<32x64xbf16>
    %cst_57 = arith.constant dense<0.000000e+00> : vector<128x64xf32>
    %65 = tpu.matmul %62, %64, %cst_57 {dimension_numbers = #tpu.dot_dimension_numbers<[1], [0], [0], [1], [0, 0, 1, 1], [], []>} : vector<128x32xbf16>, vector<32x64xbf16>, vector<128x64xf32> -> vector<128x64xf32>
    %66 = arith.addf %60, %65 : vector<128x64xf32>
    %c0_58 = arith.constant 0 : index
    %c2_59 = arith.constant 2 : index
    %c0_60 = arith.constant 0 : index
    %c0_61 = arith.constant 0 : index
    %67 = vector.load %arg13[%c0_58, %c2_59, %c0_60, %c0_61] : memref<2x10x16x32xbf16, #tpu.memory_space<vmem>>, vector<2x8x8x32xbf16>
    %68 = vector.shape_cast %67 : vector<2x8x8x32xbf16> to vector<128x32xbf16>
    %c6 = arith.constant 6 : index
    %c0_62 = arith.constant 0 : index
    %c0_63 = arith.constant 0 : index
    %69 = vector.load %arg5[%c6, %c0_62, %c0_63] : memref<9x32x64xbf16, #tpu.memory_space<vmem>>, vector<1x32x64xbf16>
    %70 = vector.shape_cast %69 : vector<1x32x64xbf16> to vector<32x64xbf16>
    %cst_64 = arith.constant dense<0.000000e+00> : vector<128x64xf32>
    %71 = tpu.matmul %68, %70, %cst_64 {dimension_numbers = #tpu.dot_dimension_numbers<[1], [0], [0], [1], [0, 0, 1, 1], [], []>} : vector<128x32xbf16>, vector<32x64xbf16>, vector<128x64xf32> -> vector<128x64xf32>
    %72 = arith.addf %66, %71 : vector<128x64xf32>
    %c0_65 = arith.constant 0 : index
    %c2_66 = arith.constant 2 : index
    %c1_67 = arith.constant 1 : index
    %c0_68 = arith.constant 0 : index
    %73 = vector.load %arg13[%c0_65, %c2_66, %c1_67, %c0_68] : memref<2x10x16x32xbf16, #tpu.memory_space<vmem>>, vector<2x8x8x32xbf16>
    %74 = vector.shape_cast %73 : vector<2x8x8x32xbf16> to vector<128x32xbf16>
    %c7 = arith.constant 7 : index
    %c0_69 = arith.constant 0 : index
    %c0_70 = arith.constant 0 : index
    %75 = vector.load %arg5[%c7, %c0_69, %c0_70] : memref<9x32x64xbf16, #tpu.memory_space<vmem>>, vector<1x32x64xbf16>
    %76 = vector.shape_cast %75 : vector<1x32x64xbf16> to vector<32x64xbf16>
    %cst_71 = arith.constant dense<0.000000e+00> : vector<128x64xf32>
    %77 = tpu.matmul %74, %76, %cst_71 {dimension_numbers = #tpu.dot_dimension_numbers<[1], [0], [0], [1], [0, 0, 1, 1], [], []>} : vector<128x32xbf16>, vector<32x64xbf16>, vector<128x64xf32> -> vector<128x64xf32>
    %78 = arith.addf %72, %77 : vector<128x64xf32>
    %c0_72 = arith.constant 0 : index
    %c2_73 = arith.constant 2 : index
    %c2_74 = arith.constant 2 : index
    %c0_75 = arith.constant 0 : index
    %79 = vector.load %arg13[%c0_72, %c2_73, %c2_74, %c0_75] : memref<2x10x16x32xbf16, #tpu.memory_space<vmem>>, vector<2x8x8x32xbf16>
    %80 = vector.shape_cast %79 : vector<2x8x8x32xbf16> to vector<128x32xbf16>
    %c8 = arith.constant 8 : index
    %c0_76 = arith.constant 0 : index
    %c0_77 = arith.constant 0 : index
    %81 = vector.load %arg5[%c8, %c0_76, %c0_77] : memref<9x32x64xbf16, #tpu.memory_space<vmem>>, vector<1x32x64xbf16>
    %82 = vector.shape_cast %81 : vector<1x32x64xbf16> to vector<32x64xbf16>
    %cst_78 = arith.constant dense<0.000000e+00> : vector<128x64xf32>
    %83 = tpu.matmul %80, %82, %cst_78 {dimension_numbers = #tpu.dot_dimension_numbers<[1], [0], [0], [1], [0, 0, 1, 1], [], []>} : vector<128x32xbf16>, vector<32x64xbf16>, vector<128x64xf32> -> vector<128x64xf32>
    %84 = arith.addf %78, %83 : vector<128x64xf32>
    %c0_79 = arith.constant 0 : index
    %c0_80 = arith.constant 0 : index
    %85 = vector.load %arg6[%c0_79, %c0_80] : memref<1x64xf32, #tpu.memory_space<vmem>>, vector<1x64xf32>
    %86 = vector.broadcast %85 : vector<1x64xf32> to vector<128x64xf32>
    %87 = arith.mulf %84, %86 : vector<128x64xf32>
    %c0_81 = arith.constant 0 : index
    %c0_82 = arith.constant 0 : index
    %88 = vector.load %arg7[%c0_81, %c0_82] : memref<1x64xf32, #tpu.memory_space<vmem>>, vector<1x64xf32>
    %89 = vector.broadcast %88 : vector<1x64xf32> to vector<128x64xf32>
    %90 = arith.addf %87, %89 : vector<128x64xf32>
    %cst_83 = arith.constant 0.000000e+00 : f32
    %91 = vector.broadcast %cst_83 : f32 to vector<128x64xf32>
    %92 = arith.maximumf %90, %91 : vector<128x64xf32>
    %93 = vector.shape_cast %92 : vector<128x64xf32> to vector<2x64x64xf32>
    %cst_84 = arith.constant dense<0xFF800000> : vector<2x64xf32>
    %94 = vector.multi_reduction <maximumf>, %93, %cst_84 [1] : vector<2x64x64xf32> to vector<2x64xf32>
    %95 = arith.truncf %94 : vector<2x64xf32> to vector<2x64xbf16>
    %c0_85 = arith.constant 0 : index
    %c0_86 = arith.constant 0 : index
    %96 = vector.load %arg8[%c0_85, %c0_86] : memref<64x32xbf16, #tpu.memory_space<vmem>>, vector<64x32xbf16>
    %cst_87 = arith.constant dense<0.000000e+00> : vector<2x32xf32>
    %97 = tpu.matmul %95, %96, %cst_87 {dimension_numbers = #tpu.dot_dimension_numbers<[1], [0], [0], [1], [0, 0, 1, 1], [], []>} : vector<2x64xbf16>, vector<64x32xbf16>, vector<2x32xf32> -> vector<2x32xf32>
    %c0_88 = arith.constant 0 : index
    %c0_89 = arith.constant 0 : index
    %98 = vector.load %arg9[%c0_88, %c0_89] : memref<1x32xf32, #tpu.memory_space<vmem>>, vector<1x32xf32>
    %99 = vector.broadcast %98 : vector<1x32xf32> to vector<2x32xf32>
    %100 = arith.addf %97, %99 : vector<2x32xf32>
    %cst_90 = arith.constant 0.000000e+00 : f32
    %101 = vector.broadcast %cst_90 : f32 to vector<2x32xf32>
    %102 = arith.maximumf %100, %101 : vector<2x32xf32>
    %103 = arith.truncf %102 : vector<2x32xf32> to vector<2x32xbf16>
    %c0_91 = arith.constant 0 : index
    %c0_92 = arith.constant 0 : index
    %104 = vector.load %arg10[%c0_91, %c0_92] : memref<32x128xbf16, #tpu.memory_space<vmem>>, vector<32x128xbf16>
    %cst_93 = arith.constant dense<0.000000e+00> : vector<2x128xf32>
    %105 = tpu.matmul %103, %104, %cst_93 {dimension_numbers = #tpu.dot_dimension_numbers<[1], [0], [0], [1], [0, 0, 1, 1], [], []>} : vector<2x32xbf16>, vector<32x128xbf16>, vector<2x128xf32> -> vector<2x128xf32>
    %c0_94 = arith.constant 0 : index
    %c0_95 = arith.constant 0 : index
    %106 = vector.load %arg11[%c0_94, %c0_95] : memref<1x128xf32, #tpu.memory_space<vmem>>, vector<1x128xf32>
    %107 = vector.broadcast %106 : vector<1x128xf32> to vector<2x128xf32>
    %108 = arith.addf %105, %107 : vector<2x128xf32>
    %109 = vector.shape_cast %108 : vector<2x128xf32> to vector<1x2x128xf32>
    %c0_96 = arith.constant 0 : index
    %c0_97 = arith.constant 0 : index
    %c0_98 = arith.constant 0 : index
    %110 = vector.load %arg12[%c0_96, %c0_97, %c0_98] : memref<1x2x128xf32, #tpu.memory_space<vmem>>, vector<1x2x128xf32>
    tpu.vector_store %arg12[%c0_96, %c0_97, %c0_98], %109 {strides = array<i32>} : memref<1x2x128xf32, #tpu.memory_space<vmem>>, vector<1x2x128xf32>,
    return
  }
  func.func @transform_0(%arg0: i32) -> (i32, i32, i32) {
    %c0_i32 = arith.constant 0 : i32
    %c0_i32_0 = arith.constant 0 : i32
    %c0_i32_1 = arith.constant 0 : i32
    return %arg0, %c0_i32, %c0_i32_0 : i32, i32, i32
  }
  func.func @transform_1(%arg0: i32) -> (i32, i32) {
    %c0_i32 = arith.constant 0 : i32
    %c0_i32_0 = arith.constant 0 : i32
    %c0_i32_1 = arith.constant 0 : i32
    return %c0_i32, %c0_i32_0 : i32, i32
  }
  func.func @transform_2(%arg0: i32) -> (i32, i32) {
    %c0_i32 = arith.constant 0 : i32
    %c0_i32_0 = arith.constant 0 : i32
    %c0_i32_1 = arith.constant 0 : i32
    return %c0_i32, %c0_i32_0 : i32, i32
  }
  func.func @transform_3(%arg0: i32) -> (i32, i32) {
    %c0_i32 = arith.constant 0 : i32
    %c0_i32_0 = arith.constant 0 : i32
    %c0_i32_1 = arith.constant 0 : i32
    return %c0_i32, %c0_i32_0 : i32, i32
  }
  func.func @transform_4(%arg0: i32) -> (i32, i32, i32) {
    %c0_i32 = arith.constant 0 : i32
    %c0_i32_0 = arith.constant 0 : i32
    %c0_i32_1 = arith.constant 0 : i32
    %c0_i32_2 = arith.constant 0 : i32
    return %c0_i32, %c0_i32_0, %c0_i32_1 : i32, i32, i32
  }
  func.func @transform_5(%arg0: i32) -> (i32, i32) {
    %c0_i32 = arith.constant 0 : i32
    %c0_i32_0 = arith.constant 0 : i32
    %c0_i32_1 = arith.constant 0 : i32
    return %c0_i32, %c0_i32_0 : i32, i32
  }
  func.func @transform_6(%arg0: i32) -> (i32, i32) {
    %c0_i32 = arith.constant 0 : i32
    %c0_i32_0 = arith.constant 0 : i32
    %c0_i32_1 = arith.constant 0 : i32
    return %c0_i32, %c0_i32_0 : i32, i32
  }
  func.func @transform_7(%arg0: i32) -> (i32, i32) {
    %c0_i32 = arith.constant 0 : i32
    %c0_i32_0 = arith.constant 0 : i32
    %c0_i32_1 = arith.constant 0 : i32
    return %c0_i32, %c0_i32_0 : i32, i32
  }
  func.func @transform_8(%arg0: i32) -> (i32, i32) {
    %c0_i32 = arith.constant 0 : i32
    %c0_i32_0 = arith.constant 0 : i32
    %c0_i32_1 = arith.constant 0 : i32
    return %c0_i32, %c0_i32_0 : i32, i32
  }
  func.func @transform_9(%arg0: i32) -> (i32, i32) {
    %c0_i32 = arith.constant 0 : i32
    %c0_i32_0 = arith.constant 0 : i32
    %c0_i32_1 = arith.constant 0 : i32
    return %c0_i32, %c0_i32_0 : i32, i32
  }
  func.func @transform_10(%arg0: i32) -> (i32, i32) {
    %c0_i32 = arith.constant 0 : i32
    %c0_i32_0 = arith.constant 0 : i32
    %c0_i32_1 = arith.constant 0 : i32
    return %c0_i32, %c0_i32_0 : i32, i32
  }
  func.func @transform_11(%arg0: i32) -> (i32, i32, i32) {
    %c0_i32 = arith.constant 0 : i32
    %c0_i32_0 = arith.constant 0 : i32
    %c0_i32_1 = arith.constant 0 : i32
    return %arg0, %c0_i32, %c0_i32_0 : i32, i32, i32
  }
}

</mosaic_0001>

<bundles_post_ra>
// kernel: cnn_forward.1
= control target key start
LH: loop header
LB: loop body
LE: loop exit
PB: predicated region body
PF: predicated region fallthrough
CT: control target
= control target key end

     0   :  { %vm280_vm0 = vcmask 261120   ;;  %s10815_s0 = inlined_call_operand.vmem [shape: bf16[2,256,32], index: 0, kind: input, shape index: {}]   ;;  %s10816_s1 = inlined_call_operand.vmem [shape: bf16[32,32], index: 1, kind: input, shape index: {}]   ;;  %s10817_s2 = inlined_call_operand.vmem [shape: f32[1,32], index: 2, kind: input, shape index: {}]   ;;  %s10818_s3 = inlined_call_operand.vmem [shape: f32[1,32], index: 3, kind: input, shape index: {}]   ;;  %s10819_s4 = inlined_call_operand.vmem [shape: bf16[9,32,64], index: 4, kind: input, shape index: {}]   ;;  %s10820_s5 = inlined_call_operand.vmem [shape: f32[1,64], index: 5, kind: input, shape index: {}]   ;;  %s10821_s6 = inlined_call_operand.vmem [shape: f32[1,64], index: 6, kind: input, shape index: {}]   ;;  %s10822_s7 = inlined_call_operand.vmem [shape: bf16[64,32], index: 7, kind: input, shape index: {}]   ;;  %s10823_s8 = inlined_call_operand.vmem [shape: f32[1,32], index: 8, kind: input, shape index: {}]   ;;  %s10824_s9 = inlined_call_operand.vmem [shape: bf16[32,128], index: 9, kind: input, shape index: {}]   ;;  %s10825_s10 = inlined_call_operand.vmem [shape: f32[1,128], index: 10, kind: input, shape index: {}]   ;;  %s10826_s11 = inlined_call_operand.hbm [shape: f32[1,2,128], index: 11, kind: output, shape index: {}]  }
   0x1   :  { %v8832_v0 = vld [vmem:[%s10816_s1] sm:$0xff]   ;;  %v8833_v1 = vld [vmem:[%s10816_s1 + $0x8] sm:$0xff]   ;;  %v8836_v4 = vld [vmem:[%s10815_s0 + $0x10] sm:$0xff]  }
   0x2   :  { %8431 = vmatprep.subr.bf16.mxu0 %v8832_v0  ;;  %v8834_v2 = vld [vmem:[%s10815_s0] sm:$0xff]   ;;  %v8835_v3 = vld [vmem:[%s10815_s0 + $0x8] sm:$0xff]   ;;  %v8837_v5 = vld [vmem:[%s10815_s0 + $0x18] sm:$0xff]  }
   0x3   :  { %8432 = vmatpush3.bf16.msra.mxu0 %v8832_v0  ;;  %8435 = vmatprep.mubr.msk.bf16.mxu0 %vm280_vm0, %v8834_v2  ;;  %v8838_v6 = vld [vmem:[%s10815_s0 + $0x20] sm:$0xff]   ;;  %v8839_v7 = vld [vmem:[%s10815_s0 + $0x28] sm:$0xff]   ;;  %v8840_v8 = vld [vmem:[%s10815_s0 + $0x30] sm:$0xff]  }
   0x4   :  { %8433 = vmatprep.subr.bf16.mxu0 %v8833_v1  ;;  %v8841_v9 = vld [vmem:[%s10815_s0 + $0x38] sm:$0xff]   ;;  %v8842_v10 = vld [vmem:[%s10815_s0 + $0x40] sm:$0xff]   ;;  %v8843_v11 = vld [vmem:[%s10815_s0 + $0x48] sm:$0xff]  }
   0x5   :  { %v8844_v12 = vld [vmem:[%s10815_s0 + $0x50] sm:$0xff]   ;;  %v8845_v13 = vld [vmem:[%s10815_s0 + $0x58] sm:$0xff]   ;;  %v8846_v14 = vld [vmem:[%s10815_s0 + $0x60] sm:$0xff]  }
   0x7   :  { %8434 = vmatpush3.bf16.msra.mxu0 %v8833_v1 }
   0xa   :  { %8436 = vmatmul.mubr.msk.bf16.vlgmr.msra.gmra.mrb[0].mxu0 %vm280_vm0, %v8835_v3 }
   0xb   :  { %8439 = vmatprep.mubr.msk.bf16.mxu0 %vm280_vm0, %v8836_v4 }
  0x12   :  { %8440 = vmatmul.mubr.msk.bf16.gmra.mrb[4].mxu0 %vm280_vm0, %v8837_v5 }
  0x13   :  { %8443 = vmatprep.mubr.msk.bf16.mxu0 %vm280_vm0, %v8838_v6 }
  0x1a   :  { %8444 = vmatmul.mubr.msk.bf16.gmra.mrb[8].mxu0 %vm280_vm0, %v8839_v7 }
  0x1b   :  { %8447 = vmatprep.mubr.msk.bf16.mxu0 %vm280_vm0, %v8840_v8 }
  0x22   :  { %8448 = vmatmul.mubr.msk.bf16.gmra.mrb[12].mxu0 %vm280_vm0, %v8841_v9 }
  0x23   :  { %8451 = vmatprep.mubr.msk.bf16.mxu0 %vm280_vm0, %v8842_v10 }
  0x2a   :  { %8452 = vmatmul.mubr.msk.bf16.gmra.mrb[16].mxu0 %vm280_vm0, %v8843_v11 }
  0x2b   :  { %8455 = vmatprep.mubr.msk.bf16.mxu0 %vm280_vm0, %v8844_v12 }
  0x32   :  { %8456 = vmatmul.mubr.msk.bf16.gmra.mrb[20].mxu0 %vm280_vm0, %v8845_v13 }
  0x33   :  { %16 = vsyncpa [#allocation4], 0  ;;  %8459 = vmatprep.mubr.msk.bf16.mxu0 %vm280_vm0, %v8846_v14  ;;  %v8847_v15 = vld [vmem:[%s10815_s0 + $0x68] sm:$0xff]   ;;  %v8848_v16 = vld [vmem:[%s10815_s0 + $0x70] sm:$0xff]   ;;  %v9137_v33 = vmov 0   ;;  %v940_v37 = vlaneseq  ;;  %vm3842_vm1 = vcmask 1042434  }
  0x34   :  { %v8849_v17 = vld [vmem:[%s10815_s0 + $0x78] sm:$0xff]   ;;  %v8850_v18 = vld [vmem:[%s10815_s0 + $0x80] sm:$0xff]   ;;  %v8851_v19 = vld [vmem:[%s10815_s0 + $0x88] sm:$0xff]   ;;  %3437 = vst.msk [vmem:[#allocation2 + $0x8] sm:$0xff] %vm280_vm0, %v9137_v33  ;;  %v9138_v35 = vmov 1983009808  }
  0x35   :  { %v8852_v20 = vld [vmem:[%s10815_s0 + $0x90] sm:$0xff]   ;;  %v8853_v21 = vld [vmem:[%s10815_s0 + $0x98] sm:$0xff]   ;;  %v8854_v22 = vld [vmem:[%s10815_s0 + $0xa0] sm:$0xff]   ;;  %3436 = vst.msk [vmem:[#allocation2] sm:$0xff] %vm280_vm0, %v9137_v33  ;;  %v938_v36 = vunpack.c.l.s4 %v9138_v35  ;;  %v941_v40 = vshrl.u32 %v940_v37, 7  ;;  %vm3845_vm2 = vcmask 1043459  }
  0x36   :  { %v8855_v23 = vld [vmem:[%s10815_s0 + $0xa8] sm:$0xff]   ;;  %v8856_v24 = vld [vmem:[%s10815_s0 + $0xb0] sm:$0xff]   ;;  %v8857_v25 = vld [vmem:[%s10815_s0 + $0xb8] sm:$0xff]   ;;  %3438 = vst.msk [vmem:[#allocation2 + $0x10] sm:$0xff] %vm280_vm0, %v9137_v33  ;;  %vm3848_vm3 = vcmask 1044484   ;;  %vm3851_vm4 = vcmask 1045509  }
  0x37   :  { %v8858_v26 = vld [vmem:[%s10815_s0 + $0xc0] sm:$0xff]   ;;  %v8859_v27 = vld [vmem:[%s10815_s0 + $0xc8] sm:$0xff]   ;;  %v8860_v28 = vld [vmem:[%s10815_s0 + $0xd0] sm:$0xff]   ;;  %3439 = vst.msk [vmem:[#allocation2 + $0x18] sm:$0xff] %vm280_vm0, %v9137_v33  ;;  %v939_v39 = vunpack.c.0.s8 %v938_v36  ;;  %vm3854_vm5 = vcmask 1046534   ;;  %vm3857_vm6 = vcmask 1047559  }
  0x38   :  { %v8861_v29 = vld [vmem:[%s10815_s0 + $0xd8] sm:$0xff]   ;;  %v8862_v30 = vld [vmem:[%s10815_s0 + $0xe0] sm:$0xff]   ;;  %v8863_v31 = vld [vmem:[%s10815_s0 + $0xe8] sm:$0xff]   ;;  %3440 = vst.msk [vmem:[#allocation2 + $0x20] sm:$0xff] %vm280_vm0, %v9137_v33  ;;  %vm4087_vm7 = vcmask 258048   ;;  %vm4912_vm10 = vcmask 1042432  }
  0x39   :  { %v8864_v32 = vld [vmem:[%s10815_s0 + $0xf0] sm:$0xff]   ;;  %3441 = vst.msk [vmem:[#allocation2 + $0x28] sm:$0xff] %vm280_vm0, %v9137_v33  ;;  %3442 = vst.msk [vmem:[#allocation2 + $0x30] sm:$0xff] %vm280_vm0, %v9137_v33  ;;  %v8865_v34 = vld [vmem:[%s10815_s0 + $0xf8] sm:$0xff]   ;;  %v9369_v48 = vsub.s32 %v939_v39, %v941_v40  ;;  %vm4088_vm8 = vsmask.f32 4354 }
  0x3a   :  { %8460 = vmatmul.mubr.msk.bf16.gmra.mrb[24].mxu0 %vm280_vm0, %v8847_v15  ;;  %3443 = vst.msk [vmem:[#allocation2 + $0x38] sm:$0xff] %vm280_vm0, %v9137_v33  ;;  %3444 = vst.msk [vmem:[#allocation2 + $0x40] sm:$0xff] %vm280_vm0, %v9137_v33  ;;  %v9359_v38 = vld [vmem:[%s10817_s2] ss:$0 sm:$0xff]  ;;  %vm4913_vm11 = vcmask 1046532   ;;  %s9141_s27 = smov [#allocation3]  }
  0x3b   :  { %8463 = vmatprep.mubr.msk.bf16.mxu0 %vm280_vm0, %v8848_v16  ;;  %3445 = vst.msk [vmem:[#allocation2 + $0x48] sm:$0xff] %vm280_vm0, %v9137_v33  ;;  %3446 = vst.msk [vmem:[#allocation2 + $0x50] sm:$0xff] %vm280_vm0, %v9137_v33  ;;  %v9364_v42 = vld [vmem:[%s10818_s3] ss:$0 sm:$0xff]  ;;  %vm4254_vm13 = vsmask.f32 3328 }
  0x3c   :  { %3447 = vst.msk [vmem:[#allocation2 + $0x58] sm:$0xff] %vm280_vm0, %v9137_v33  ;;  %3448 = vst.msk [vmem:[#allocation2 + $0x60] sm:$0xff] %vm280_vm0, %v9137_v33  ;;  %vm4255_vm14 = vsmask.f32 7440 }
  0x3d   :  { %3449 = vst.msk [vmem:[#allocation2 + $0x68] sm:$0xff] %vm280_vm0, %v9137_v33  ;;  %3450 = vst.msk [vmem:[#allocation2 + $0x70] sm:$0xff] %vm280_vm0, %v9137_v33 }
  0x3e   :  { %3451 = vst.msk [vmem:[#allocation2 + $0x78] sm:$0xff] %vm280_vm0, %v9137_v33  ;;  %3452 = vst.msk [vmem:[#allocation2 + $0x80] sm:$0xff] %vm280_vm0, %v9137_v33 }
  0x3f   :  { %3453 = vst.msk [vmem:[#allocation2 + $0x88] sm:$0xff] %vm280_vm0, %v9137_v33  ;;  %3454 = vst.msk [vmem:[#allocation2 + $0x90] sm:$0xff] %vm280_vm0, %v9137_v33 }
  0x40   :  { %3455 = vst.msk [vmem:[#allocation2 + $0x98] sm:$0xff] %vm280_vm0, %v9137_v33  ;;  %vm9430_vm9 = vmand %vm4087_vm7, %vm4088_vm8 }
  0x41   :  { %vm9638_vm12 = vmor %vm4912_vm10, %vm4913_vm11 }
  0x42   :  { %8464 = vmatmul.mubr.msk.bf16.gmra.mrb[28].mxu0 %vm280_vm0, %v8849_v17  ;;  %vm9693_vm15 = vmor %vm4254_vm13, %vm4255_vm14 }
  0x43   :  { %8467 = vmatprep.mubr.msk.bf16.mxu0 %vm280_vm0, %v8850_v18 }
  0x4a   :  { %8468 = vmatmul.mubr.msk.bf16.gmra.mrb[32].mxu0 %vm280_vm0, %v8851_v19 }
  0x4b   :  { %8471 = vmatprep.mubr.msk.bf16.mxu0 %vm280_vm0, %v8852_v20 }
  0x52   :  { %8472 = vmatmul.mubr.msk.bf16.gmra.mrb[36].mxu0 %vm280_vm0, %v8853_v21 }
  0x53   :  { %8475 = vmatprep.mubr.msk.bf16.mxu0 %vm280_vm0, %v8854_v22 }
  0x5a   :  { %8476 = vmatmul.mubr.msk.bf16.gmra.mrb[40].mxu0 %vm280_vm0, %v8855_v23 }
  0x5b   :  { %8479 = vmatprep.mubr.msk.bf16.mxu0 %vm280_vm0, %v8856_v24 }
  0x62   :  { %8480 = vmatmul.mubr.msk.bf16.gmra.mrb[44].mxu0 %vm280_vm0, %v8857_v25 }
  0x63   :  { %8483 = vmatprep.mubr.msk.bf16.mxu0 %vm280_vm0, %v8858_v26 }
  0x6a   :  { %8484 = vmatmul.mubr.msk.bf16.gmra.mrb[48].mxu0 %vm280_vm0, %v8859_v27 }
  0x6b   :  { %8487 = vmatprep.mubr.msk.bf16.mxu0 %vm280_vm0, %v8860_v28 }
  0x72   :  { %8488 = vmatmul.mubr.msk.bf16.gmra.mrb[52].mxu0 %vm280_vm0, %v8861_v29 }
  0x73   :  { %8491 = vmatprep.mubr.msk.bf16.mxu0 %vm280_vm0, %v8862_v30 }
  0x7a   :  { %8492 = vmatmul.mubr.msk.bf16.gmra.mrb[56].mxu0 %vm280_vm0, %v8863_v31 }
  0x7b   :  { %8495 = vmatprep.mubr.msk.bf16.mxu0 %vm280_vm0, %v8864_v32 }
  0x82   :  { %8496 = vmatmul.mubr.msk.bf16.gmra.mrb[60].mxu0 %vm280_vm0, %v8865_v34 }
  0xdd   :  { %v8437_v41 = vpop.f32.mrb[0].mxu0 }
  0xde   :  { %v675_v43 = vmul.f32 %v8437_v41, %v9359_v38  ;;  %v411_v44 = vpop.f32.mrb[1].mxu0 }
  0xdf   :  { %v673_v45 = vmul.f32 %v9359_v38, %v411_v44  ;;  %v8438_v46 = vpop.f32.mrb[2].mxu0 }
  0xe0   :  { %v746_v47 = vadd.f32 %v9364_v42, %v675_v43  ;;  %v676_v49 = vmul.f32 %v8438_v46, %v9359_v38  ;;  %v414_v50 = vpop.f32.mrb[3].mxu0 }
  0xe1   :  { %v744_v51 = vadd.f32 %v9364_v42, %v673_v45  ;;  %v674_v52 = vmul.f32 %v9359_v38, %v414_v50 }
  0xe2   :  { %v810_v53 = vmax.f32 %v746_v47, 0.0  ;;  %v747_v54 = vadd.f32 %v9364_v42, %v676_v49 }
  0xe3   :  { %v808_v55 = vmax.f32 %v744_v51, 0.0  ;;  %v745_v56 = vadd.f32 %v9364_v42, %v674_v52 }
  0xe4   :  { %v970_v57 = vcombine.high %v810_v53, %v810_v53  ;;  %v977_v58 = vrot.slane %v810_v53, %v9369_v48  ;;  %v811_v59 = vmax.f32 %v747_v54, 0.0 }
  0xe5   :  { %v936_v60 = vcombine.high %v808_v55, %v808_v55  ;;  %v943_v61 = vrot.slane %v808_v55, %v9369_v48  ;;  %v809_v62 = vmax.f32 %v745_v56, 0.0  ;;  %v8441_v63 = vpop.f32.mrb[4].mxu0 }
  0xe6   :  { %v984_v0 = vrot.slane %v970_v57, %v9369_v48  ;;  %v985_v1 = vcombine.high %v977_v58, %v977_v58  ;;  %v7605_v2 = vrot.slane %v977_v58, 9  ;;  %v987_v3 = vcombine.high %v811_v59, %v811_v59  ;;  %v427_v4 = vpop.f32.mrb[5].mxu0 }
  0xe7   :  { %v950_v5 = vrot.slane %v936_v60, %v9369_v48  ;;  %v951_v6 = vcombine.high %v943_v61, %v943_v61  ;;  %v7597_v7 = vrot.slane %v943_v61, 9  ;;  %v994_v8 = vrot.slane %v811_v59, %v9369_v48  ;;  %v8442_v9 = vpop.f32.mrb[6].mxu0 }
  0xe8   :  { %v986_v10 = vcombine.high %v984_v0, %v984_v0  ;;  %v7606_v11 = vrot.slane %v985_v1, 9  ;;  %v7607_v12 = vrot.slane %v984_v0, 9  ;;  %v3056_v13 = vmax.f32 %v977_v58, %v7605_v2  ;;  %v9381_v14 = vpop.f32.mrb[7].mxu0 }
  0xe9   :  { %v952_v15 = vcombine.high %v950_v5, %v950_v5  ;;  %v7598_v16 = vrot.slane %v951_v6, 9  ;;  %v7599_v17 = vrot.slane %v950_v5, 9  ;;  %v3048_v18 = vmax.f32 %v943_v61, %v7597_v7 }
  0xea   :  { %v7608_v19 = vrot.slane %v986_v10, 9  ;;  %v3057_v20 = vmax.f32 %v985_v1, %v7606_v11  ;;  %v3058_v21 = vmax.f32 %v984_v0, %v7607_v12  ;;  %v1001_v22 = vrot.slane %v987_v3, %v9369_v48 }
  0xeb   :  { %v7600_v23 = vrot.slane %v952_v15, 9  ;;  %v3049_v24 = vmax.f32 %v951_v6, %v7598_v16  ;;  %v3050_v25 = vmax.f32 %v950_v5, %v7599_v17  ;;  %v3304_v26 = vmax.f32 %v3048_v18, %v3056_v13 }
  0xec   :  { %v3059_v27 = vmax.f32 %v986_v10, %v7608_v19  ;;  %v1002_v28 = vcombine.high %v994_v8, %v994_v8  ;;  %v1003_v29 = vcombine.high %v1001_v22, %v1001_v22  ;;  %v7609_v30 = vrot.slane %v994_v8, 9 }
  0xed   :  { %v3051_v31 = vmax.f32 %v952_v15, %v7600_v23  ;;  %v3305_v32 = vmax.f32 %v3049_v24, %v3057_v20  ;;  %v3306_v33 = vmax.f32 %v3050_v25, %v3058_v21  ;;  %v3456_v34 = vpack.c.bf16 %v3304_v26, %v3304_v26  ;;  %v9384_v35 = vpop.f32.mrb[8].mxu0 }
  0xee   :  { %v7610_v36 = vrot.slane %v1002_v28, 9  ;;  %v7611_v37 = vrot.slane %v1001_v22, 9  ;;  %v7612_v39 = vrot.slane %v1003_v29, 9  ;;  %v3060_v40 = vmax.f32 %v994_v8, %v7609_v30  ;;  %v9386_v41 = vpop.f32.mrb[9].mxu0 }
  0xef   :  { %v3307_v43 = vmax.f32 %v3051_v31, %v3059_v27  ;;  %v3457_v44 = vpack.c.bf16 %v3305_v32, %v3305_v32  ;;  %v3458_v45 = vpack.c.bf16 %v3306_v33, %v3306_v33  ;;  %v3712_v46 = vunpack.c.l.b16 %v3456_v34  ;;  %v9388_v47 = vpop.f32.mrb[10].mxu0 }
  0xf0   :  { %v3061_v49 = vmax.f32 %v1002_v28, %v7610_v36  ;;  %v3062_v50 = vmax.f32 %v1001_v22, %v7611_v37  ;;  %v3063_v51 = vmax.f32 %v1003_v29, %v7612_v39  ;;  %v953_v52 = vcombine.high %v809_v62, %v809_v62  ;;  %v9390_v53 = vpop.f32.mrb[11].mxu0 }
  0xf1   :  { %v3459_v54 = vpack.c.bf16 %v3307_v43, %v3307_v43  ;;  %v3713_v55 = vunpack.c.l.b16 %v3457_v44  ;;  %v3714_v56 = vunpack.c.l.b16 %v3458_v45  ;;  %v3840_v57 = vrot.slane %v3712_v46, 7 }
  0xf2   :  { %v960_v58 = vrot.slane %v809_v62, %v9369_v48  ;;  %v967_v59 = vrot.slane %v953_v52, %v9369_v48  ;;  %v679_v60 = vmul.f32 %v8441_v63, %v9359_v38  ;;  %v677_v61 = vmul.f32 %v9359_v38, %v427_v4 }
  0xf3   :  { %v3715_v0 = vunpack.c.l.b16 %v3459_v54  ;;  %v3841_v1 = vrot.slane %v3713_v55, 6  ;;  %v3844_v2 = vrot.slane %v3714_v56, 5  ;;  %v680_v3 = vmul.f32 %v8442_v9, %v9359_v38 }
  0xf4   :  { %v968_v5 = vcombine.high %v960_v58, %v960_v58  ;;  %v969_v6 = vcombine.high %v967_v59, %v967_v59  ;;  %v7601_v7 = vrot.slane %v960_v58, 9  ;;  %v7603_v8 = vrot.slane %v967_v59, 9 }
  0xf5   :  { %v3843_v10 = vsel %vm3842_vm1, %v3841_v1, %v3840_v57  ;;  %v3847_v11 = vrot.slane %v3715_v0, 4  ;;  %v750_v62 = vadd.f32 %v9364_v42, %v679_v60  ;;  %v748_v12 = vadd.f32 %v9364_v42, %v677_v61  ;;  %v9400_v63 = vpop.f32.mrb[12].mxu0 }
  0xf6   :  { %v3846_v4 = vsel %vm3845_vm2, %v3844_v2, %v3843_v10  ;;  %v7602_v13 = vrot.slane %v968_v5, 9  ;;  %v7604_v15 = vrot.slane %v969_v6, 9  ;;  %v3052_v16 = vmax.f32 %v960_v58, %v7601_v7  ;;  %v9403_v9 = vpop.f32.mrb[13].mxu0 }
  0xf7   :  { %v3054_v17 = vmax.f32 %v967_v59, %v7603_v8  ;;  %v3849_v18 = vsel %vm3848_vm3, %v3847_v11, %v3846_v4  ;;  %v814_v19 = vmax.f32 %v750_v62, 0.0  ;;  %v812_v20 = vmax.f32 %v748_v12, 0.0  ;;  %v9406_v21 = vpop.f32.mrb[14].mxu0 }
  0xf8   :  { %v3053_v22 = vmax.f32 %v968_v5, %v7602_v13  ;;  %v3055_v23 = vmax.f32 %v969_v6, %v7604_v15  ;;  %v3308_v24 = vmax.f32 %v3052_v16, %v3060_v40  ;;  %v751_v25 = vadd.f32 %v9364_v42, %v680_v3  ;;  %v9409_v26 = vpop.f32.mrb[15].mxu0 }
  0xf9   :  { %v3310_v27 = vmax.f32 %v3054_v17, %v3062_v50  ;;  %v1038_v28 = vcombine.high %v814_v19, %v814_v19  ;;  %v1045_v29 = vrot.slane %v814_v19, %v9369_v48  ;;  %v1004_v30 = vcombine.high %v812_v20, %v812_v20  ;;  %v4090_v19 = vld [vmem:[#allocation2 + $0x8] sm:$0x1f] }
  0xfa   :  { %v3309_v31 = vmax.f32 %v3053_v22, %v3061_v49  ;;  %v3311_v32 = vmax.f32 %v3055_v23, %v3063_v51  ;;  %v3460_v33 = vpack.c.bf16 %v3308_v24, %v3308_v24  ;;  %v1011_v34 = vrot.slane %v812_v20, %v9369_v48 }
  0xfb   :  { %v3462_v36 = vpack.c.bf16 %v3310_v27, %v3310_v27  ;;  %v1052_v37 = vrot.slane %v1038_v28, %v9369_v48  ;;  %v1053_v39 = vcombine.high %v1045_v29, %v1045_v29  ;;  %v7621_v40 = vrot.slane %v1045_v29, 9 }
  0xfc   :  { %v3461_v43 = vpack.c.bf16 %v3309_v31, %v3309_v31  ;;  %v3463_v44 = vpack.c.bf16 %v3311_v32, %v3311_v32  ;;  %v3716_v45 = vunpack.c.l.b16 %v3460_v33  ;;  %v1018_v46 = vrot.slane %v1004_v30, %v9369_v48 }
  0xfd   :  { %v3718_v50 = vunpack.c.l.b16 %v3462_v36  ;;  %v1054_v52 = vcombine.high %v1052_v37, %v1052_v37  ;;  %v7622_v54 = vrot.slane %v1053_v39, 9  ;;  %v7623_v55 = vrot.slane %v1052_v37, 9  ;;  %v9415_v56 = vpop.f32.mrb[16].mxu0 }
  0xfe   :  { %v3717_v49 = vunpack.c.l.b16 %v3461_v43  ;;  %v3719_v51 = vunpack.c.l.b16 %v3463_v44  ;;  %v3850_v57 = vrot.slane %v3716_v45, 3  ;;  %v3072_v58 = vmax.f32 %v1045_v29, %v7621_v40  ;;  %v9417_v59 = vpop.f32.mrb[17].mxu0 }
  0xff   :  { %v3856_v60 = vrot.slane %v3718_v50, 1  ;;  %v7624_v61 = vrot.slane %v1054_v52, 9  ;;  %v3073_v0 = vmax.f32 %v1053_v39, %v7622_v54  ;;  %v3074_v1 = vmax.f32 %v1052_v37, %v7623_v55  ;;  %v9419_v2 = vpop.f32.mrb[18].mxu0 }
 0x100   :  { %v3852_v3 = vsel %vm3851_vm4, %v3850_v57, %v3849_v18  ;;  %v3853_v5 = vrot.slane %v3717_v49, 2  ;;  %v1019_v6 = vcombine.high %v1011_v34, %v1011_v34  ;;  %v1020_v7 = vcombine.high %v1018_v46, %v1018_v46  ;;  %v9422_v8 = vpop.f32.mrb[19].mxu0 }
 0x101   :  { %v3075_v10 = vmax.f32 %v1054_v52, %v7624_v61  ;;  %v7613_v11 = vrot.slane %v1011_v34, 9  ;;  %v7615_v62 = vrot.slane %v1018_v46, 9  ;;  %v815_v12 = vmax.f32 %v751_v25, 0.0 }
 0x102   :  { %v3855_v4 = vsel %vm3854_vm5, %v3853_v5, %v3852_v3  ;;  %v7614_v13 = vrot.slane %v1019_v6, 9  ;;  %v7616_v15 = vrot.slane %v1020_v7, 9  ;;  %v678_v16 = vmul.f32 %v9359_v38, %v9381_v14 }
 0x103   :  { %v3858_v17 = vsel %vm3857_vm6, %v3856_v60, %v3855_v4  ;;  %v3064_v20 = vmax.f32 %v1011_v34, %v7613_v11  ;;  %v3066_v22 = vmax.f32 %v1018_v46, %v7615_v62  ;;  %v1055_v23 = vcombine.high %v815_v12, %v815_v12 }
 0x104   :  { %v4054_v24 = vpack.c.b16 %v3719_v51, %v3858_v17  ;;  %v3065_v25 = vmax.f32 %v1019_v6, %v7614_v13  ;;  %v3067_v27 = vmax.f32 %v1020_v7, %v7616_v15  ;;  %v1062_v28 = vrot.slane %v815_v12, %v9369_v48 }
 0x105   :  { %v3312_v29 = vmax.f32 %v3064_v20, %v3072_v58  ;;  %v3314_v30 = vmax.f32 %v3066_v22, %v3074_v1  ;;  %v1069_v14 = vrot.slane %v1055_v23, %v9369_v48  ;;  %v749_v31 = vadd.f32 %v9364_v42, %v678_v16  ;;  %v9437_v32 = vpop.f32.mrb[20].mxu0 }
 0x106   :  { %v4091_v33 = vsel %vm9430_vm9, %v4054_v24, %v4090_v19  ;;  %v3313_v36 = vmax.f32 %v3065_v25, %v3073_v0  ;;  %v3315_v34 = vmax.f32 %v3067_v27, %v3075_v10  ;;  %v1070_v37 = vcombine.high %v1062_v28, %v1062_v28  ;;  %v9441_v39 = vpop.f32.mrb[21].mxu0 }
 0x107   :  { %4092 = vst [vmem:[#allocation2 + $0x8] sm:$0x1f] %v4091_v33  ;;  %v3464_v40 = vpack.c.bf16 %v3312_v29, %v3312_v29  ;;  %v3466_v43 = vpack.c.bf16 %v3314_v30, %v3314_v30  ;;  %v1071_v44 = vcombine.high %v1069_v14, %v1069_v14  ;;  %v7625_v45 = vrot.slane %v1062_v28, 9  ;;  %v9443_v46 = vpop.f32.mrb[22].mxu0 }
 0x108   :  { %v3465_v50 = vpack.c.bf16 %v3313_v36, %v3313_v36  ;;  %v3467_v52 = vpack.c.bf16 %v3315_v34, %v3315_v34  ;;  %v7626_v54 = vrot.slane %v1070_v37, 9  ;;  %v7627_v55 = vrot.slane %v1069_v14, 9  ;;  %v9445_v49 = vpop.f32.mrb[23].mxu0 }
 0x109   :  { %v3720_v51 = vunpack.c.l.b16 %v3464_v40  ;;  %v3722_v57 = vunpack.c.l.b16 %v3466_v43  ;;  %v7628_v58 = vrot.slane %v1071_v44, 9  ;;  %v3076_v60 = vmax.f32 %v1062_v28, %v7625_v45 }
 0x10a   :  { %v3721_v61 = vunpack.c.l.b16 %v3465_v50  ;;  %v3723_v0 = vunpack.c.l.b16 %v3467_v52  ;;  %v3077_v1 = vmax.f32 %v1070_v37, %v7626_v54  ;;  %v3078_v3 = vmax.f32 %v1069_v14, %v7627_v55 }
 0x10b   :  { %v3859_v5 = vrot.slane %v3720_v51, 7  ;;  %v3862_v6 = vrot.slane %v3722_v57, 5  ;;  %v3079_v7 = vmax.f32 %v1071_v44, %v7628_v58  ;;  %v813_v10 = vmax.f32 %v749_v31, 0.0 }
 0x10c   :  { %v3860_v11 = vrot.slane %v3721_v61, 6  ;;  %v3864_v62 = vrot.slane %v3723_v0, 4  ;;  %v683_v12 = vmul.f32 %v9384_v35, %v9359_v38  ;;  %v681_v4 = vmul.f32 %v9359_v38, %v9386_v41 }
 0x10d   :  { %v1021_v13 = vcombine.high %v813_v10, %v813_v10  ;;  %v1028_v15 = vrot.slane %v813_v10, %v9369_v48  ;;  %v684_v16 = vmul.f32 %v9388_v47, %v9359_v38  ;;  %v9456_v17 = vmul.f32 %v9359_v38, %v9390_v53  ;;  %v9458_v19 = vpop.f32.mrb[24].mxu0 }
 0x10e   :  { %v3861_v20 = vsel %vm3842_vm1, %v3860_v11, %v3859_v5  ;;  %v754_v22 = vadd.f32 %v9364_v42, %v683_v12  ;;  %v752_v35 = vadd.f32 %v9364_v42, %v681_v4  ;;  %v9465_v41 = vmul.f32 %v9400_v63, %v9359_v38  ;;  %v9467_v23 = vpop.f32.mrb[25].mxu0 }
 0x10f   :  { %v3863_v47 = vsel %vm3845_vm2, %v3862_v6, %v3861_v20  ;;  %v1035_v24 = vrot.slane %v1021_v13, %v9369_v48  ;;  %v1036_v53 = vcombine.high %v1028_v15, %v1028_v15  ;;  %v7617_v25 = vrot.slane %v1028_v15, 9  ;;  %v9471_v27 = vpop.f32.mrb[26].mxu0 }
 0x110   :  { %v3865_v28 = vsel %vm3848_vm3, %v3864_v62, %v3863_v47  ;;  %v818_v29 = vmax.f32 %v754_v22, 0.0  ;;  %v816_v30 = vmax.f32 %v752_v35, 0.0  ;;  %v755_v14 = vadd.f32 %v9364_v42, %v684_v16  ;;  %v9475_v31 = vpop.f32.mrb[27].mxu0 }
 0x111   :  { %v1037_v63 = vcombine.high %v1035_v24, %v1035_v24  ;;  %v7618_v33 = vrot.slane %v1036_v53, 9  ;;  %v7619_v36 = vrot.slane %v1035_v24, 9  ;;  %v3068_v34 = vmax.f32 %v1028_v15, %v7617_v25 }
 0x112   :  { %v1106_v37 = vcombine.high %v818_v29, %v818_v29  ;;  %v1113_v40 = vrot.slane %v818_v29, %v9369_v48  ;;  %v1072_v43 = vcombine.high %v816_v30, %v816_v30  ;;  %v1079_v44 = vrot.slane %v816_v30, %v9369_v48 }
 0x113   :  { %v7620_v45 = vrot.slane %v1037_v63, 9  ;;  %v3069_v50 = vmax.f32 %v1036_v53, %v7618_v33  ;;  %v3070_v52 = vmax.f32 %v1035_v24, %v7619_v36  ;;  %v3316_v54 = vmax.f32 %v3068_v34, %v3076_v60 }
 0x114   :  { %v1120_v55 = vrot.slane %v1106_v37, %v9369_v48  ;;  %v1121_v51 = vcombine.high %v1113_v40, %v1113_v40  ;;  %v7637_v57 = vrot.slane %v1113_v40, 9  ;;  %v1086_v58 = vrot.slane %v1072_v43, %v9369_v48 }
 0x115   :  { %v3071_v61 = vmax.f32 %v1037_v63, %v7620_v45  ;;  %v3317_v0 = vmax.f32 %v3069_v50, %v3077_v1  ;;  %v3318_v5 = vmax.f32 %v3070_v52, %v3078_v3  ;;  %v3468_v6 = vpack.c.bf16 %v3316_v54, %v3316_v54 }
 0x116   :  { %v1122_v10 = vcombine.high %v1120_v55, %v1120_v55  ;;  %v7638_v11 = vrot.slane %v1121_v51, 9  ;;  %v7639_v62 = vrot.slane %v1120_v55, 9  ;;  %v3088_v12 = vmax.f32 %v1113_v40, %v7637_v57 }
 0x117   :  { %v3319_v4 = vmax.f32 %v3071_v61, %v3079_v7  ;;  %v3469_v13 = vpack.c.bf16 %v3317_v0, %v3317_v0  ;;  %v3470_v15 = vpack.c.bf16 %v3318_v5, %v3318_v5  ;;  %v3724_v16 = vunpack.c.l.b16 %v3468_v6 }
 0x118   :  { %v7640_v20 = vrot.slane %v1122_v10, 9  ;;  %v3089_v60 = vmax.f32 %v1121_v51, %v7638_v11  ;;  %v3090_v22 = vmax.f32 %v1120_v55, %v7639_v62  ;;  %v1087_v35 = vcombine.high %v1079_v44, %v1079_v44  ;;  %v4093_v51 = vld [vmem:[#allocation2 + $0x10] sm:$0x1f] }
 0x119   :  { %v3471_v47 = vpack.c.bf16 %v3319_v4, %v3319_v4  ;;  %v3725_v24 = vunpack.c.l.b16 %v3469_v13  ;;  %v3726_v53 = vunpack.c.l.b16 %v3470_v15  ;;  %v3866_v25 = vrot.slane %v3724_v16, 3 }
 0x11a   :  { %v3091_v29 = vmax.f32 %v1122_v10, %v7640_v20  ;;  %v1088_v1 = vcombine.high %v1086_v58, %v1086_v58  ;;  %v7629_v3 = vrot.slane %v1079_v44, 9  ;;  %v7630_v30 = vrot.slane %v1087_v35, 9 }
 0x11b   :  { %v3727_v63 = vunpack.c.l.b16 %v3471_v47  ;;  %v3867_v33 = vsel %vm3851_vm4, %v3866_v25, %v3865_v28  ;;  %v3868_v36 = vrot.slane %v3725_v24, 2  ;;  %v3870_v7 = vrot.slane %v3726_v53, 1 }
 0x11c   :  { %v7631_v34 = vrot.slane %v1086_v58, 9  ;;  %v7632_v37 = vrot.slane %v1088_v1, 9  ;;  %v3080_v40 = vmax.f32 %v1079_v44, %v7629_v3  ;;  %v3081_v43 = vmax.f32 %v1087_v35, %v7630_v30 }
 0x11d   :  { %v3869_v45 = vsel %vm3854_vm5, %v3868_v36, %v3867_v33  ;;  %v819_v50 = vmax.f32 %v755_v14, 0.0  ;;  %v753_v52 = vadd.f32 %v9364_v42, %v9456_v17  ;;  %v758_v54 = vadd.f32 %v9364_v42, %v9465_v41 }
 0x11e   :  { %v3871_v55 = vsel %vm3857_vm6, %v3870_v7, %v3869_v45  ;;  %v3082_v57 = vmax.f32 %v1086_v58, %v7631_v34  ;;  %v3083_v28 = vmax.f32 %v1088_v1, %v7632_v37  ;;  %v3320_v61 = vmax.f32 %v3080_v40, %v3088_v12  ;;  %v9493_v34 = vpop.f32.mrb[28].mxu0 }
 0x11f   :  { %v4055_v0 = vpack.c.b16 %v3727_v63, %v3871_v55  ;;  %v3321_v5 = vmax.f32 %v3081_v43, %v3089_v60  ;;  %v1123_v6 = vcombine.high %v819_v50, %v819_v50  ;;  %v1130_v44 = vrot.slane %v819_v50, %v9369_v48  ;;  %v8874_v50 = vld [vmem:[%s10819_s4 + $0x20] sm:$0xff]  }
 0x120   :  { %v3322_v10 = vmax.f32 %v3082_v57, %v3090_v22  ;;  %v3323_v11 = vmax.f32 %v3083_v28, %v3091_v29  ;;  %v3472_v14 = vpack.c.bf16 %v3320_v61, %v3320_v61  ;;  %v817_v62 = vmax.f32 %v753_v52, 0.0  ;;  %8539 = vmatprep.subr.bf16.mxu1 %v8874_v50 }
 0x121   :  { %v4094_v17 = vsel %vm9430_vm9, %v4055_v0, %v4093_v51  ;;  %v3473_v4 = vpack.c.bf16 %v3321_v5, %v3321_v5  ;;  %v1137_v41 = vrot.slane %v1123_v6, %v9369_v48  ;;  %v1138_v13 = vcombine.high %v1130_v44, %v1130_v44  ;;  %8540 = vmatpush3.bf16.msra.mxu1 %v8874_v50 }
 0x122   :  { %4095 = vst [vmem:[#allocation2 + $0x10] sm:$0x1f] %v4094_v17  ;;  %v3474_v58 = vpack.c.bf16 %v3322_v10, %v3322_v10  ;;  %v3475_v15 = vpack.c.bf16 %v3323_v11, %v3323_v11  ;;  %v3728_v12 = vunpack.c.l.b16 %v3472_v14  ;;  %v7641_v16 = vrot.slane %v1130_v44, 9  ;;  %v9506_v10 = vpop.f32.mrb[29].mxu0 }
 0x123   :  { %v3729_v20 = vunpack.c.l.b16 %v3473_v4  ;;  %v1139_v60 = vcombine.high %v1137_v41, %v1137_v41  ;;  %v7642_v35 = vrot.slane %v1138_v13, 9  ;;  %v7643_v47 = vrot.slane %v1137_v41, 9  ;;  %v9509_v4 = vpop.f32.mrb[30].mxu0 }
 0x124   :  { %v3730_v22 = vunpack.c.l.b16 %v3474_v58  ;;  %v3731_v24 = vunpack.c.l.b16 %v3475_v15  ;;  %v3872_v53 = vrot.slane %v3728_v12, 7  ;;  %v3092_v25 = vmax.f32 %v1130_v44, %v7641_v16  ;;  %v9514_v16 = vpop.f32.mrb[31].mxu0 }
 0x125   :  { %v3873_v29 = vrot.slane %v3729_v20, 6  ;;  %v7644_v1 = vrot.slane %v1139_v60, 9  ;;  %v3093_v3 = vmax.f32 %v1138_v13, %v7642_v35  ;;  %v3094_v30 = vmax.f32 %v1137_v41, %v7643_v47  ;;  %v8875_v41 = vld [vmem:[%s10819_s4 + $0x28] sm:$0xff]  }
 0x126   :  { %v3875_v63 = vrot.slane %v3730_v22, 5  ;;  %v3877_v33 = vrot.slane %v3731_v24, 4  ;;  %v1089_v36 = vcombine.high %v817_v62, %v817_v62  ;;  %v1096_v7 = vrot.slane %v817_v62, %v9369_v48  ;;  %8541 = vmatprep.subr.bf16.mxu1 %v8875_v41  ;;  %v8876_v22 = vld [vmem:[%s10819_s4 + $0x10] sm:$0xff]  }
 0x127   :  { %v3874_v37 = vsel %vm3842_vm1, %v3873_v29, %v3872_v53  ;;  %v3095_v40 = vmax.f32 %v1139_v60, %v7644_v1  ;;  %v822_v43 = vmax.f32 %v758_v54, 0.0  ;;  %v685_v45 = vmul.f32 %v9359_v38, %v9403_v9  ;;  %8542 = vmatpush3.bf16.msra.mxu1 %v8875_v41  ;;  %8499 = vmatprep.subr.bf16.mxu0 %v8876_v22 }
 0x128   :  { %v3876_v52 = vsel %vm3845_vm2, %v3875_v63, %v3874_v37  ;;  %v1103_v55 = vrot.slane %v1089_v36, %v9369_v48  ;;  %v1104_v51 = vcombine.high %v1096_v7, %v1096_v7  ;;  %v7633_v57 = vrot.slane %v1096_v7, 9  ;;  %8500 = vmatpush3.bf16.msra.mxu0 %v8876_v22 }
 0x129   :  { %v3878_v28 = vsel %vm3848_vm3, %v3877_v33, %v3876_v52  ;;  %v1174_v61 = vcombine.high %v822_v43, %v822_v43  ;;  %v1181_v0 = vrot.slane %v822_v43, %v9369_v48  ;;  %v756_v54 = vadd.f32 %v9364_v42, %v685_v45 }
 0x12a   :  { %v1105_v5 = vcombine.high %v1103_v55, %v1103_v55  ;;  %v7634_v9 = vrot.slane %v1104_v51, 9  ;;  %v7635_v6 = vrot.slane %v1103_v55, 9  ;;  %v3084_v44 = vmax.f32 %v1096_v7, %v7633_v57 }
 0x12b   :  { %v1188_v11 = vrot.slane %v1174_v61, %v9369_v48  ;;  %v1189_v14 = vcombine.high %v1181_v0, %v1181_v0  ;;  %v7653_v62 = vrot.slane %v1181_v0, 9  ;;  %v820_v17 = vmax.f32 %v756_v54, 0.0 }
 0x12c   :  { %v7636_v13 = vrot.slane %v1105_v5, 9  ;;  %v3085_v58 = vmax.f32 %v1104_v51, %v7634_v9  ;;  %v3086_v15 = vmax.f32 %v1103_v55, %v7635_v6  ;;  %v3324_v12 = vmax.f32 %v3084_v44, %v3092_v25 }
 0x12d   :  { %v1190_v20 = vcombine.high %v1188_v11, %v1188_v11  ;;  %v7654_v60 = vrot.slane %v1189_v14, 9  ;;  %v7655_v35 = vrot.slane %v1188_v11, 9  ;;  %v3104_v47 = vmax.f32 %v1181_v0, %v7653_v62 }
 0x12e   :  { %v3087_v24 = vmax.f32 %v1105_v5, %v7636_v13  ;;  %v3325_v53 = vmax.f32 %v3085_v58, %v3093_v3  ;;  %v3326_v29 = vmax.f32 %v3086_v15, %v3094_v30  ;;  %v3476_v1 = vpack.c.bf16 %v3324_v12, %v3324_v12  ;;  %v9523_v30 = vpop.f32.mrb[32].mxu0 }
 0x12f   :  { %v7656_v63 = vrot.slane %v1190_v20, 9  ;;  %v3105_v33 = vmax.f32 %v1189_v14, %v7654_v60  ;;  %v3106_v36 = vmax.f32 %v1188_v11, %v7655_v35  ;;  %v1140_v25 = vcombine.high %v820_v17, %v820_v17  ;;  %v4096_v60 = vld [vmem:[#allocation2 + $0x18] sm:$0x1f] }
 0x130   :  { %v3327_v7 = vmax.f32 %v3087_v24, %v3095_v40  ;;  %v3477_v37 = vpack.c.bf16 %v3325_v53, %v3325_v53  ;;  %v3478_v43 = vpack.c.bf16 %v3326_v29, %v3326_v29  ;;  %v3732_v45 = vunpack.c.l.b16 %v3476_v1 }
 0x131   :  { %v3107_v50 = vmax.f32 %v1190_v20, %v7656_v63  ;;  %v1147_v52 = vrot.slane %v820_v17, %v9369_v48  ;;  %v1154_v55 = vrot.slane %v1140_v25, %v9369_v48  ;;  %v688_v3 = vmul.f32 %v9406_v21, %v9359_v38 }
 0x132   :  { %v3479_v51 = vpack.c.bf16 %v3327_v7, %v3327_v7  ;;  %v3733_v57 = vunpack.c.l.b16 %v3477_v37  ;;  %v3734_v61 = vunpack.c.l.b16 %v3478_v43  ;;  %v3879_v0 = vrot.slane %v3732_v45, 3 }
 0x133   :  { %v1155_v54 = vcombine.high %v1147_v52, %v1147_v52  ;;  %v1156_v40 = vcombine.high %v1154_v55, %v1154_v55  ;;  %v7645_v5 = vrot.slane %v1147_v52, 9  ;;  %v7647_v9 = vrot.slane %v1154_v55, 9 }
 0x134   :  { %v3735_v6 = vunpack.c.l.b16 %v3479_v51  ;;  %v3880_v44 = vsel %vm3851_vm4, %v3879_v0, %v3878_v28  ;;  %v3881_v11 = vrot.slane %v3733_v57, 2  ;;  %v3883_v14 = vrot.slane %v3734_v61, 1 }
 0x135   :  { %v7646_v62 = vrot.slane %v1155_v54, 9  ;;  %v7648_v17 = vrot.slane %v1156_v40, 9  ;;  %v3096_v41 = vmax.f32 %v1147_v52, %v7645_v5  ;;  %v3098_v13 = vmax.f32 %v1154_v55, %v7647_v9 }
 0x136   :  { %v3882_v21 = vsel %vm3854_vm5, %v3881_v11, %v3880_v44  ;;  %v759_v58 = vadd.f32 %v9364_v42, %v688_v3  ;;  %v686_v15 = vmul.f32 %v9359_v38, %v9409_v26  ;;  %v691_v12 = vmul.f32 %v9415_v56, %v9359_v38 }
 0x137   :  { %v3884_v20 = vsel %vm3857_vm6, %v3883_v14, %v3882_v21  ;;  %v3097_v28 = vmax.f32 %v1155_v54, %v7646_v62  ;;  %v3099_v35 = vmax.f32 %v1156_v40, %v7648_v17  ;;  %v3328_v22 = vmax.f32 %v3096_v41, %v3104_v47 }
 0x138   :  { %v4056_v24 = vpack.c.b16 %v3735_v6, %v3884_v20  ;;  %v3330_v53 = vmax.f32 %v3098_v13, %v3106_v36  ;;  %v823_v29 = vmax.f32 %v759_v58, 0.0  ;;  %v757_v1 = vadd.f32 %v9364_v42, %v686_v15 }
 0x139   :  { %v3329_v63 = vmax.f32 %v3097_v28, %v3105_v33  ;;  %v3331_v25 = vmax.f32 %v3099_v35, %v3107_v50  ;;  %v3480_v7 = vpack.c.bf16 %v3328_v22, %v3328_v22  ;;  %v762_v37 = vadd.f32 %v9364_v42, %v691_v12 }
 0x13a   :  { %v4097_v26 = vsel %vm9430_vm9, %v4056_v24, %v4096_v60  ;;  %v3482_v56 = vpack.c.bf16 %v3330_v53, %v3330_v53  ;;  %v1191_v43 = vcombine.high %v823_v29, %v823_v29  ;;  %v1198_v45 = vrot.slane %v823_v29, %v9369_v48 }
 0x13b   :  { %4098 = vst [vmem:[#allocation2 + $0x18] sm:$0x1f] %v4097_v26  ;;  %v3481_v52 = vpack.c.bf16 %v3329_v63, %v3329_v63  ;;  %v3483_v47 = vpack.c.bf16 %v3331_v25, %v3331_v25  ;;  %v3736_v55 = vunpack.c.l.b16 %v3480_v7  ;;  %v821_v36 = vmax.f32 %v757_v1, 0.0 }
 0x13c   :  { %v3738_v3 = vunpack.c.l.b16 %v3482_v56  ;;  %v1205_v51 = vrot.slane %v1191_v43, %v9369_v48  ;;  %v1206_v33 = vcombine.high %v1198_v45, %v1198_v45  ;;  %v7657_v50 = vrot.slane %v1198_v45, 9  ;;  %v9547_v56 = vpop.f32.mrb[33].mxu0 }
 0x13d   :  { %v3737_v57 = vunpack.c.l.b16 %v3481_v52  ;;  %v3739_v61 = vunpack.c.l.b16 %v3483_v47  ;;  %v3885_v0 = vrot.slane %v3736_v55, 7  ;;  %v1157_v54 = vcombine.high %v821_v36, %v821_v36 }
 0x13e   :  { %v3888_v40 = vrot.slane %v3738_v3, 5  ;;  %v1207_v5 = vcombine.high %v1205_v51, %v1205_v51  ;;  %v7658_v9 = vrot.slane %v1206_v33, 9  ;;  %v7659_v6 = vrot.slane %v1205_v51, 9 }
 0x13f   :  { %v3886_v44 = vrot.slane %v3737_v57, 6  ;;  %v3890_v11 = vrot.slane %v3739_v61, 4  ;;  %v3108_v14 = vmax.f32 %v1198_v45, %v7657_v50  ;;  %v1164_v62 = vrot.slane %v821_v36, %v9369_v48 }
 0x140   :  { %v7660_v17 = vrot.slane %v1207_v5, 9  ;;  %v3109_v41 = vmax.f32 %v1206_v33, %v7658_v9  ;;  %v3110_v13 = vmax.f32 %v1205_v51, %v7659_v6  ;;  %v1171_v21 = vrot.slane %v1157_v54, %v9369_v48 }
 0x141   :  { %v3887_v58 = vsel %vm3842_vm1, %v3886_v44, %v3885_v0  ;;  %v1172_v15 = vcombine.high %v1164_v62, %v1164_v62  ;;  %v7649_v12 = vrot.slane %v1164_v62, 9  ;;  %v826_v20 = vmax.f32 %v762_v37, 0.0 }
 0x142   :  { %v3889_v60 = vsel %vm3845_vm2, %v3888_v40, %v3887_v58  ;;  %v3111_v28 = vmax.f32 %v1207_v5, %v7660_v17  ;;  %v1173_v35 = vcombine.high %v1171_v21, %v1171_v21  ;;  %v7651_v22 = vrot.slane %v1171_v21, 9  ;;  %v9557_v58 = vpop.f32.mrb[34].mxu0 }
 0x143   :  { %v7650_v24 = vrot.slane %v1172_v15, 9  ;;  %v3100_v53 = vmax.f32 %v1164_v62, %v7649_v12  ;;  %v3891_v29 = vsel %vm3848_vm3, %v3890_v11, %v3889_v60  ;;  %v1242_v1 = vcombine.high %v826_v20, %v826_v20 }
 0x144   :  { %v7652_v63 = vrot.slane %v1173_v35, 9  ;;  %v3102_v25 = vmax.f32 %v1171_v21, %v7651_v22  ;;  %v1249_v7 = vrot.slane %v826_v20, %v9369_v48  ;;  %v689_v26 = vmul.f32 %v9359_v38, %v9417_v59 }
 0x145   :  { %v3101_v37 = vmax.f32 %v1172_v15, %v7650_v24  ;;  %v3332_v43 = vmax.f32 %v3100_v53, %v3108_v14  ;;  %v1256_v45 = vrot.slane %v1242_v1, %v9369_v48  ;;  %v692_v52 = vmul.f32 %v9419_v2, %v9359_v38  ;;  %v8881_v2 = vld [vmem:[%s10819_s4 + $0x18] sm:$0xff]  }
 0x146   :  { %v3103_v47 = vmax.f32 %v1173_v35, %v7652_v63  ;;  %v3334_v55 = vmax.f32 %v3102_v25, %v3110_v13  ;;  %v1257_v36 = vcombine.high %v1249_v7, %v1249_v7  ;;  %v7669_v3 = vrot.slane %v1249_v7, 9  ;;  %8501 = vmatprep.subr.bf16.mxu0 %v8881_v2 }
 0x147   :  { %v3333_v51 = vmax.f32 %v3101_v37, %v3109_v41  ;;  %v3484_v33 = vpack.c.bf16 %v3332_v43, %v3332_v43  ;;  %v1258_v50 = vcombine.high %v1256_v45, %v1256_v45  ;;  %v7671_v57 = vrot.slane %v1256_v45, 9  ;;  %8502 = vmatpush3.bf16.msra.mxu0 %v8881_v2 }
 0x148   :  { %v3335_v61 = vmax.f32 %v3103_v47, %v3111_v28  ;;  %v3486_v0 = vpack.c.bf16 %v3334_v55, %v3334_v55  ;;  %v7670_v59 = vrot.slane %v1257_v36, 9  ;;  %v3120_v54 = vmax.f32 %v1249_v7, %v7669_v3  ;;  %v9561_v28 = vpop.f32.mrb[35].mxu0 }
 0x149   :  { %v3485_v40 = vpack.c.bf16 %v3333_v51, %v3333_v51  ;;  %v3740_v5 = vunpack.c.l.b16 %v3484_v33  ;;  %v7672_v9 = vrot.slane %v1258_v50, 9  ;;  %v3122_v6 = vmax.f32 %v1256_v45, %v7671_v57  ;;  %v4099_v45 = vld [vmem:[#allocation2 + $0x20] sm:$0x1f] }
 0x14a   :  { %v3487_v44 = vpack.c.bf16 %v3335_v61, %v3335_v61  ;;  %v3742_v11 = vunpack.c.l.b16 %v3486_v0  ;;  %v3121_v14 = vmax.f32 %v1257_v36, %v7670_v59  ;;  %v760_v62 = vadd.f32 %v9364_v42, %v689_v26 }
 0x14b   :  { %v3741_v17 = vunpack.c.l.b16 %v3485_v40  ;;  %v3892_v41 = vrot.slane %v3740_v5, 3  ;;  %v3123_v13 = vmax.f32 %v1258_v50, %v7672_v9  ;;  %v763_v21 = vadd.f32 %v9364_v42, %v692_v52 }
 0x14c   :  { %v3743_v15 = vunpack.c.l.b16 %v3487_v44  ;;  %v3896_v12 = vrot.slane %v3742_v11, 1  ;;  %v824_v20 = vmax.f32 %v760_v62, 0.0  ;;  %v690_v60 = vmul.f32 %v9359_v38, %v9422_v8 }
 0x14d   :  { %v3893_v35 = vsel %vm3851_vm4, %v3892_v41, %v3891_v29  ;;  %v3894_v22 = vrot.slane %v3741_v17, 2  ;;  %v827_v24 = vmax.f32 %v763_v21, 0.0  ;;  %v695_v53 = vmul.f32 %v9437_v32, %v9359_v38 }
 0x14e   :  { %v1208_v1 = vcombine.high %v824_v20, %v824_v20  ;;  %v1215_v63 = vrot.slane %v824_v20, %v9369_v48  ;;  %v761_v25 = vadd.f32 %v9364_v42, %v690_v60  ;;  %v693_v7 = vmul.f32 %v9359_v38, %v9441_v39 }
 0x14f   :  { %v3895_v8 = vsel %vm3854_vm5, %v3894_v22, %v3893_v35  ;;  %v1259_v26 = vcombine.high %v827_v24, %v827_v24  ;;  %v1266_v37 = vrot.slane %v827_v24, %v9369_v48  ;;  %v766_v29 = vadd.f32 %v9364_v42, %v695_v53  ;;  %v9581_v35 = vld [vmem:[%s10818_s3] ss:$0 sm:$0xff] }
 0x150   :  { %v3897_v43 = vsel %vm3857_vm6, %v3896_v12, %v3895_v8  ;;  %v1222_v32 = vrot.slane %v1208_v1, %v9369_v48  ;;  %v1223_v52 = vcombine.high %v1215_v63, %v1215_v63  ;;  %v7661_v47 = vrot.slane %v1215_v63, 9 }
 0x151   :  { %v4057_v55 = vpack.c.b16 %v3743_v15, %v3897_v43  ;;  %v1273_v36 = vrot.slane %v1259_v26, %v9369_v48  ;;  %v1274_v3 = vcombine.high %v1266_v37, %v1266_v37  ;;  %v7673_v51 = vrot.slane %v1266_v37, 9 }
 0x152   :  { %v1224_v38 = vcombine.high %v1222_v32, %v1222_v32  ;;  %v7662_v39 = vrot.slane %v1223_v52, 9  ;;  %v7663_v33 = vrot.slane %v1222_v32, 9  ;;  %v3112_v50 = vmax.f32 %v1215_v63, %v7661_v47 }
 0x153   :  { %v4100_v57 = vsel %vm9430_vm9, %v4057_v55, %v4099_v45  ;;  %v1275_v42 = vcombine.high %v1273_v36, %v1273_v36  ;;  %v7674_v61 = vrot.slane %v1274_v3, 9  ;;  %v7675_v0 = vrot.slane %v1273_v36, 9 }
 0x154   :  { %4101 = vst [vmem:[#allocation2 + $0x20] sm:$0x1f] %v4100_v57  ;;  %v7664_v59 = vrot.slane %v1224_v38, 9  ;;  %v3113_v40 = vmax.f32 %v1223_v52, %v7662_v39  ;;  %v3114_v5 = vmax.f32 %v1222_v32, %v7663_v33  ;;  %v3336_v9 = vmax.f32 %v3112_v50, %v3120_v54 }
 0x155   :  { %v7676_v2 = vrot.slane %v1275_v42, 9  ;;  %v3124_v44 = vmax.f32 %v1266_v37, %v7673_v51  ;;  %v3125_v11 = vmax.f32 %v1274_v3, %v7674_v61  ;;  %v3126_v62 = vmax.f32 %v1273_v36, %v7675_v0 }
 0x156   :  { %v3115_v17 = vmax.f32 %v1224_v38, %v7664_v59  ;;  %v3337_v41 = vmax.f32 %v3113_v40, %v3121_v14  ;;  %v3338_v21 = vmax.f32 %v3114_v5, %v3122_v6  ;;  %v3488_v15 = vpack.c.bf16 %v3336_v9, %v3336_v9 }
 0x157   :  { %v3127_v12 = vmax.f32 %v1275_v42, %v7676_v2  ;;  %v825_v20 = vmax.f32 %v761_v25, 0.0  ;;  %v830_v60 = vmax.f32 %v766_v29, 0.0  ;;  %v764_v22 = vadd.f32 %v9581_v35, %v693_v7 }
 0x158   :  { %v3339_v24 = vmax.f32 %v3115_v17, %v3123_v13  ;;  %v3489_v54 = vpack.c.bf16 %v3337_v41, %v3337_v41  ;;  %v3490_v53 = vpack.c.bf16 %v3338_v21, %v3338_v21  ;;  %v3744_v1 = vunpack.c.l.b16 %v3488_v15 }
 0x159   :  { %v1225_v63 = vcombine.high %v825_v20, %v825_v20  ;;  %v1232_v8 = vrot.slane %v825_v20, %v9369_v48  ;;  %v1310_v14 = vcombine.high %v830_v60, %v830_v60  ;;  %v1317_v6 = vrot.slane %v830_v60, %v9369_v48 }
 0x15a   :  { %v3491_v26 = vpack.c.bf16 %v3339_v24, %v3339_v24  ;;  %v3745_v25 = vunpack.c.l.b16 %v3489_v54  ;;  %v3746_v37 = vunpack.c.l.b16 %v3490_v53  ;;  %v3898_v29 = vrot.slane %v3744_v1, 7  ;;  %v9591_v53 = vpop.f32.mrb[36].mxu0 }
 0x15b   :  { %v1239_v43 = vrot.slane %v1225_v63, %v9369_v48  ;;  %v1240_v45 = vcombine.high %v1232_v8, %v1232_v8  ;;  %v7665_v32 = vrot.slane %v1232_v8, 9  ;;  %v1324_v7 = vrot.slane %v1310_v14, %v9369_v48 }
 0x15c   :  { %v3747_v13 = vunpack.c.l.b16 %v3491_v26  ;;  %v3899_v52 = vrot.slane %v3745_v25, 6  ;;  %v3901_v47 = vrot.slane %v3746_v37, 5  ;;  %v1325_v55 = vcombine.high %v1317_v6, %v1317_v6  ;;  %v9596_v25 = vld [vmem:[%s10817_s2] ss:$0 sm:$0xff] }
 0x15d   :  { %v1241_v36 = vcombine.high %v1239_v43, %v1239_v43  ;;  %v7666_v3 = vrot.slane %v1240_v45, 9  ;;  %v7667_v51 = vrot.slane %v1239_v43, 9  ;;  %v3116_v38 = vmax.f32 %v1232_v8, %v7665_v32 }
 0x15e   :  { %v3900_v39 = vsel %vm3842_vm1, %v3899_v52, %v3898_v29  ;;  %v3903_v33 = vrot.slane %v3747_v13, 4  ;;  %v1326_v50 = vcombine.high %v1324_v7, %v1324_v7  ;;  %v7685_v57 = vrot.slane %v1317_v6, 9 }
 0x15f   :  { %v3902_v42 = vsel %vm3845_vm2, %v3901_v47, %v3900_v39  ;;  %v7668_v61 = vrot.slane %v1241_v36, 9  ;;  %v3117_v0 = vmax.f32 %v1240_v45, %v7666_v3  ;;  %v3118_v59 = vmax.f32 %v1239_v43, %v7667_v51 }
 0x160   :  { %v3340_v40 = vmax.f32 %v3116_v38, %v3124_v44  ;;  %v3904_v5 = vsel %vm3848_vm3, %v3903_v33, %v3902_v42  ;;  %v7686_v9 = vrot.slane %v1325_v55, 9  ;;  %v7687_v2 = vrot.slane %v1324_v7, 9 }
 0x161   :  { %v3119_v17 = vmax.f32 %v1241_v36, %v7668_v61  ;;  %v3341_v41 = vmax.f32 %v3117_v0, %v3125_v11  ;;  %v3342_v21 = vmax.f32 %v3118_v59, %v3126_v62  ;;  %v7688_v15 = vrot.slane %v1326_v50, 9 }
 0x162   :  { %v3492_v20 = vpack.c.bf16 %v3340_v40, %v3340_v40  ;;  %v3136_v60 = vmax.f32 %v1317_v6, %v7685_v57  ;;  %v3137_v24 = vmax.f32 %v1325_v55, %v7686_v9  ;;  %v3138_v54 = vmax.f32 %v1324_v7, %v7687_v2  ;;  %v9606_v7 = vpop.f32.mrb[37].mxu0  ;;  %v4102_v57 = vld [vmem:[#allocation2 + $0x28] sm:$0x1f] }
 0x163   :  { %v3343_v1 = vmax.f32 %v3119_v17, %v3127_v12  ;;  %v3493_v63 = vpack.c.bf16 %v3341_v41, %v3341_v41  ;;  %v3494_v8 = vpack.c.bf16 %v3342_v21, %v3342_v21  ;;  %v3139_v14 = vmax.f32 %v1326_v50, %v7688_v15  ;;  %v9613_v33 = vpop.f32.mrb[38].mxu0 }
 0x164   :  { %v3748_v26 = vunpack.c.l.b16 %v3492_v20  ;;  %v828_v44 = vmax.f32 %v764_v22, 0.0  ;;  %v696_v11 = vmul.f32 %v9596_v25, %v9443_v46  ;;  %v694_v62 = vmul.f32 %v9596_v25, %v9445_v49  ;;  %v9616_v59 = vpop.f32.mrb[39].mxu0 }
 0x165   :  { %v3495_v6 = vpack.c.bf16 %v3343_v1, %v3343_v1  ;;  %v3749_v37 = vunpack.c.l.b16 %v3493_v63  ;;  %v3750_v29 = vunpack.c.l.b16 %v3494_v8  ;;  %v699_v12 = vmul.f32 %v9596_v25, %v9458_v19 }
 0x166   :  { %v3905_v43 = vrot.slane %v3748_v26, 3  ;;  %v1276_v45 = vcombine.high %v828_v44, %v828_v44  ;;  %v1283_v22 = vrot.slane %v828_v44, %v9369_v48  ;;  %v767_v32 = vadd.f32 %v9581_v35, %v696_v11 }
 0x167   :  { %v3751_v13 = vunpack.c.l.b16 %v3495_v6  ;;  %v3907_v52 = vrot.slane %v3749_v37, 2  ;;  %v3909_v46 = vrot.slane %v3750_v29, 1  ;;  %v765_v47 = vadd.f32 %v9581_v35, %v694_v62 }
 0x168   :  { %v3906_v49 = vsel %vm3851_vm4, %v3905_v43, %v3904_v5  ;;  %v1290_v55 = vrot.slane %v1276_v45, %v9369_v48  ;;  %v1291_v36 = vcombine.high %v1283_v22, %v1283_v22  ;;  %v7677_v3 = vrot.slane %v1283_v22, 9  ;;  %v9622_v43 = vpop.f32.mrb[40].mxu0 }
 0x169   :  { %v3908_v19 = vsel %vm3854_vm5, %v3907_v52, %v3906_v49  ;;  %v831_v51 = vmax.f32 %v767_v32, 0.0  ;;  %v829_v38 = vmax.f32 %v765_v47, 0.0  ;;  %v770_v39 = vadd.f32 %v9581_v35, %v699_v12 }
 0x16a   :  { %v3910_v50 = vsel %vm3857_vm6, %v3909_v46, %v3908_v19  ;;  %v1292_v42 = vcombine.high %v1290_v55, %v1290_v55  ;;  %v7678_v61 = vrot.slane %v1291_v36, 9  ;;  %v7679_v0 = vrot.slane %v1290_v55, 9 }
 0x16b   :  { %v4058_v40 = vpack.c.b16 %v3751_v13, %v3910_v50  ;;  %v3128_v5 = vmax.f32 %v1283_v22, %v7677_v3  ;;  %v1327_v9 = vcombine.high %v831_v51, %v831_v51  ;;  %v1334_v2 = vrot.slane %v831_v51, %v9369_v48 }
 0x16c   :  { %v7680_v17 = vrot.slane %v1292_v42, 9  ;;  %v3129_v41 = vmax.f32 %v1291_v36, %v7678_v61  ;;  %v3130_v21 = vmax.f32 %v1290_v55, %v7679_v0  ;;  %v1293_v15 = vcombine.high %v829_v38, %v829_v38 }
 0x16d   :  { %v4103_v20 = vsel %vm9430_vm9, %v4058_v40, %v4102_v57  ;;  %v3344_v1 = vmax.f32 %v3128_v5, %v3136_v60  ;;  %v1341_v63 = vrot.slane %v1327_v9, %v9369_v48  ;;  %v1342_v8 = vcombine.high %v1334_v2, %v1334_v2 }
 0x16e   :  { %4104 = vst [vmem:[#allocation2 + $0x28] sm:$0x1f] %v4103_v20  ;;  %v3131_v26 = vmax.f32 %v1292_v42, %v7680_v17  ;;  %v3345_v44 = vmax.f32 %v3129_v41, %v3137_v24  ;;  %v3346_v11 = vmax.f32 %v3130_v21, %v3138_v54  ;;  %v7689_v62 = vrot.slane %v1334_v2, 9 }
 0x16f   :  { %v3496_v6 = vpack.c.bf16 %v3344_v1, %v3344_v1  ;;  %v1343_v37 = vcombine.high %v1341_v63, %v1341_v63  ;;  %v7690_v29 = vrot.slane %v1342_v8, 9  ;;  %v7691_v12 = vrot.slane %v1341_v63, 9 }
 0x170   :  { %v3347_v45 = vmax.f32 %v3131_v26, %v3139_v14  ;;  %v3497_v22 = vpack.c.bf16 %v3345_v44, %v3345_v44  ;;  %v3498_v32 = vpack.c.bf16 %v3346_v11, %v3346_v11  ;;  %v3140_v13 = vmax.f32 %v1334_v2, %v7689_v62 }
 0x171   :  { %v3752_v52 = vunpack.c.l.b16 %v3496_v6  ;;  %v7692_v60 = vrot.slane %v1343_v37, 9  ;;  %v3141_v46 = vmax.f32 %v1342_v8, %v7690_v29  ;;  %v3142_v47 = vmax.f32 %v1341_v63, %v7691_v12  ;;  %v4816_v12 = vld [vmem:[#allocation2] sm:$0x1e] }
 0x172   :  { %v3499_v49 = vpack.c.bf16 %v3347_v45, %v3347_v45  ;;  %v3753_v55 = vunpack.c.l.b16 %v3497_v22  ;;  %v3754_v36 = vunpack.c.l.b16 %v3498_v32  ;;  %v1300_v24 = vrot.slane %v829_v38, %v9369_v48 }
 0x173   :  { %v3911_v54 = vrot.slane %v3752_v52, 7  ;;  %v3143_v3 = vmax.f32 %v1343_v37, %v7692_v60  ;;  %v1307_v19 = vrot.slane %v1293_v15, %v9369_v48  ;;  %v834_v51 = vmax.f32 %v770_v39, 0.0  ;;  %v4817_v52 = vld [vmem:[#allocation2 + $0x8] sm:$0x1e] }
 0x174   :  { %v3755_v50 = vunpack.c.l.b16 %v3499_v49  ;;  %v3912_v57 = vrot.slane %v3753_v55, 6  ;;  %v3914_v14 = vrot.slane %v3754_v36, 5  ;;  %v1308_v42 = vcombine.high %v1300_v24, %v1300_v24 }
 0x175   :  { %v1309_v61 = vcombine.high %v1307_v19, %v1307_v19  ;;  %v7681_v0 = vrot.slane %v1300_v24, 9  ;;  %v7683_v40 = vrot.slane %v1307_v19, 9  ;;  %v1378_v5 = vcombine.high %v834_v51, %v834_v51 }
 0x176   :  { %v3913_v9 = vsel %vm3842_vm1, %v3912_v57, %v3911_v54  ;;  %v3916_v2 = vrot.slane %v3755_v50, 4  ;;  %v7682_v17 = vrot.slane %v1308_v42, 9  ;;  %v1385_v41 = vrot.slane %v834_v51, %v9369_v48 }
 0x177   :  { %v3915_v38 = vsel %vm3845_vm2, %v3914_v14, %v3913_v9  ;;  %v7684_v21 = vrot.slane %v1309_v61, 9  ;;  %v3132_v20 = vmax.f32 %v1300_v24, %v7681_v0  ;;  %v3134_v15 = vmax.f32 %v1307_v19, %v7683_v40  ;;  %v9635_v40 = vld [vmem:[#allocation2] sm:$0x1f] }
 0x178   :  { %v3133_v39 = vmax.f32 %v1308_v42, %v7682_v17  ;;  %v3917_v1 = vsel %vm3848_vm3, %v3916_v2, %v3915_v38  ;;  %v1392_v63 = vrot.slane %v1378_v5, %v9369_v48  ;;  %v1393_v8 = vcombine.high %v1385_v41, %v1385_v41  ;;  %v9642_v38 = vpop.f32.mrb[41].mxu0 }
 0x179   :  { %v3135_v26 = vmax.f32 %v1309_v61, %v7684_v21  ;;  %v3348_v44 = vmax.f32 %v3132_v20, %v3140_v13  ;;  %v3350_v11 = vmax.f32 %v3134_v15, %v3142_v47  ;;  %v7701_v62 = vrot.slane %v1385_v41, 9 }
 0x17a   :  { %v3349_v6 = vmax.f32 %v3133_v39, %v3141_v46  ;;  %v1394_v37 = vcombine.high %v1392_v63, %v1392_v63  ;;  %v7702_v29 = vrot.slane %v1393_v8, 9  ;;  %v7703_v49 = vrot.slane %v1392_v63, 9 }
 0x17b   :  { %v3351_v45 = vmax.f32 %v3135_v26, %v3143_v3  ;;  %v3500_v22 = vpack.c.bf16 %v3348_v44, %v3348_v44  ;;  %v3502_v32 = vpack.c.bf16 %v3350_v11, %v3350_v11  ;;  %v9631_v36 = vmax.f32 %v1385_v41, %v7701_v62  ;;  %v9656_v11 = vld [vmem:[#allocation2 + $0x8] sm:$0x1f] }
 0x17c   :  { %v3501_v60 = vpack.c.bf16 %v3349_v6, %v3349_v6  ;;  %v7704_v55 = vrot.slane %v1394_v37, 9  ;;  %v7925_v51 = vcombine.low %v4816_v12, %v4816_v12  ;;  %v9633_v47 = vmax.f32 %v1393_v8, %v7702_v29  ;;  %v4105_v8 = vld [vmem:[#allocation2 + $0x30] sm:$0x1f] }
 0x17d   :  { %v3503_v24 = vpack.c.bf16 %v3351_v45, %v3351_v45  ;;  %v3756_v54 = vunpack.c.l.b16 %v3500_v22  ;;  %v3758_v19 = vunpack.c.l.b16 %v3502_v32  ;;  %v7926_v46 = vcombine.high %v4816_v12, %v4816_v12 }
 0x17e   :  { %v3757_v13 = vunpack.c.l.b16 %v3501_v60  ;;  %v7927_v50 = vcombine.low %v4817_v52, %v4817_v52  ;;  %v7928_v42 = vcombine.high %v4817_v52, %v4817_v52  ;;  %v7957_v0 = vrot.slane %v7925_v51, 9 }
 0x17f   :  { %v3759_v57 = vunpack.c.l.b16 %v3503_v24  ;;  %v3918_v14 = vrot.slane %v3756_v54, 3  ;;  %v3922_v3 = vrot.slane %v3758_v19, 1  ;;  %v4917_v2 = vrot.slane %v7926_v46, 5 }
 0x180   :  { %v3920_v61 = vrot.slane %v3757_v13, 2  ;;  %v7958_v17 = vrot.slane %v7927_v50, 9  ;;  %v4921_v41 = vrot.slane %v7928_v42, 5  ;;  %v697_v20 = vmul.f32 %v9596_v25, %v9467_v23 }
 0x181   :  { %v3919_v5 = vsel %vm3851_vm4, %v3918_v14, %v3917_v1  ;;  %v700_v15 = vmul.f32 %v9596_v25, %v9471_v27  ;;  %v698_v39 = vmul.f32 %v9596_v25, %v9475_v31  ;;  %v4918_v26 = vsel %vm9638_vm12, %v7957_v0, %v4917_v2 }
 0x182   :  { %v3921_v21 = vsel %vm3854_vm5, %v3920_v61, %v3919_v5  ;;  %v4922_v44 = vsel %vm9638_vm12, %v7958_v17, %v4921_v41  ;;  %v7853_v23 = vcombine.low %v9635_v40, %v9635_v40  ;;  %v768_v27 = vadd.f32 %v9581_v35, %v697_v20 }
 0x183   :  { %v3923_v1 = vsel %vm3857_vm6, %v3922_v3, %v3921_v21  ;;  %v7977_v6 = vcombine.low %v4918_v26, %v4922_v44  ;;  %v771_v31 = vadd.f32 %v9581_v35, %v700_v15  ;;  %v3154_v29 = vmax.f32 %v1392_v63, %v7703_v49 }
 0x184   :  { %v4059_v62 = vpack.c.b16 %v3759_v57, %v3923_v1  ;;  %v3155_v12 = vmax.f32 %v1394_v37, %v7704_v55  ;;  %v769_v45 = vadd.f32 %v9581_v35, %v698_v39  ;;  %v7854_v22 = vcombine.high %v9635_v40, %v9635_v40  ;;  %v9674_v55 = vpop.f32.mrb[42].mxu0 }
 0x185   :  { %8543 = vmatprep.mubr.msk.bf16.mxu1 %vm280_vm0, %v7977_v6  ;;  %v832_v52 = vmax.f32 %v768_v27, 0.0  ;;  %v835_v60 = vmax.f32 %v771_v31, 0.0  ;;  %v9670_v24 = vcombine.low %v9656_v11, %v9656_v11  ;;  %v4258_v37 = vshrl.u32 %v7853_v23, 16  ;;  %v9678_v50 = vpop.f32.mrb[43].mxu0 }
 0x186   :  { %v4106_v32 = vsel %vm9430_vm9, %v4059_v62, %v4105_v8  ;;  %v833_v54 = vmax.f32 %v769_v45, 0.0  ;;  %v4261_v49 = vshll.u32 %v7853_v23, 16 }
 0x187   :  { %4107 = vst [vmem:[#allocation2 + $0x30] sm:$0x1f] %v4106_v32  ;;  %v1344_v19 = vcombine.high %v832_v52, %v832_v52  ;;  %v1351_v51 = vrot.slane %v832_v52, %v9369_v48  ;;  %v1395_v13 = vcombine.high %v835_v60, %v835_v60  ;;  %v1402_v46 = vrot.slane %v835_v60, %v9369_v48 }
 0x188   :  { %v1361_v57 = vcombine.high %v833_v54, %v833_v54  ;;  %v1368_v14 = vrot.slane %v833_v54, %v9369_v48  ;;  %v4260_v3 = vrot.slane %v4258_v37, 4  ;;  %v4263_v42 = vrot.slane %v4261_v49, 5 }
 0x189   :  { %v1358_v61 = vrot.slane %v1344_v19, %v9369_v48  ;;  %v1359_v0 = vcombine.high %v1351_v51, %v1351_v51  ;;  %v7693_v5 = vrot.slane %v1351_v51, 9  ;;  %v1409_v2 = vrot.slane %v1395_v13, %v9369_v48 }
 0x18a   :  { %v1410_v17 = vcombine.high %v1402_v46, %v1402_v46  ;;  %v7705_v41 = vrot.slane %v1402_v46, 9  ;;  %v1375_v21 = vrot.slane %v1361_v57, %v9369_v48  ;;  %v1376_v20 = vcombine.high %v1368_v14, %v1368_v14 }
 0x18b   :  { %v1360_v15 = vcombine.high %v1358_v61, %v1358_v61  ;;  %v7694_v39 = vrot.slane %v1359_v0, 9  ;;  %v7695_v1 = vrot.slane %v1358_v61, 9  ;;  %v3144_v8 = vmax.f32 %v1351_v51, %v7693_v5 }
 0x18c   :  { %v1411_v26 = vcombine.high %v1409_v2, %v1409_v2  ;;  %v7706_v44 = vrot.slane %v1410_v17, 9  ;;  %v7707_v23 = vrot.slane %v1409_v2, 9  ;;  %v3156_v62 = vmax.f32 %v1402_v46, %v7705_v41 }
 0x18d   :  { %v7696_v6 = vrot.slane %v1360_v15, 9  ;;  %v3145_v27 = vmax.f32 %v1359_v0, %v7694_v39  ;;  %v3146_v31 = vmax.f32 %v1358_v61, %v7695_v1  ;;  %v3352_v45 = vmax.f32 %v3144_v8, %v9631_v36 }
 0x18e   :  { %v7708_v32 = vrot.slane %v1411_v26, 9  ;;  %v3157_v52 = vmax.f32 %v1410_v17, %v7706_v44  ;;  %v3158_v60 = vmax.f32 %v1409_v2, %v7707_v23  ;;  %v1377_v54 = vcombine.high %v1375_v21, %v1375_v21 }
 0x18f   :  { %v3147_v37 = vmax.f32 %v1360_v15, %v7696_v6  ;;  %v3353_v49 = vmax.f32 %v3145_v27, %v9633_v47  ;;  %v3354_v19 = vmax.f32 %v3146_v31, %v3154_v29  ;;  %v3504_v51 = vpack.c.bf16 %v3352_v45, %v3352_v45 }
 0x190   :  { %v3159_v13 = vmax.f32 %v1411_v26, %v7708_v32  ;;  %v7697_v57 = vrot.slane %v1368_v14, 9  ;;  %v7698_v5 = vrot.slane %v1376_v20, 9  ;;  %v7699_v46 = vrot.slane %v1375_v21, 9 }
 0x191   :  { %v3355_v41 = vmax.f32 %v3147_v37, %v3155_v12  ;;  %v3505_v0 = vpack.c.bf16 %v3353_v49, %v3353_v49  ;;  %v3506_v61 = vpack.c.bf16 %v3354_v19, %v3354_v19  ;;  %v3760_v39 = vunpack.c.l.b16 %v3504_v51 }
 0x192   :  { %v7700_v36 = vrot.slane %v1377_v54, 9  ;;  %v3148_v1 = vmax.f32 %v1368_v14, %v7697_v57  ;;  %v3149_v8 = vmax.f32 %v1376_v20, %v7698_v5  ;;  %v3150_v63 = vmax.f32 %v1375_v21, %v7699_v46 }
 0x193   :  { %v3507_v17 = vpack.c.bf16 %v3355_v41, %v3355_v41  ;;  %v3761_v2 = vunpack.c.l.b16 %v3505_v0  ;;  %v3762_v44 = vunpack.c.l.b16 %v3506_v61  ;;  %v3924_v15 = vrot.slane %v3760_v39, 7 }
 0x194   :  { %v3151_v23 = vmax.f32 %v1377_v54, %v7700_v36  ;;  %v3356_v47 = vmax.f32 %v3148_v1, %v3156_v62  ;;  %v3357_v29 = vmax.f32 %v3149_v8, %v3157_v52  ;;  %v3358_v6 = vmax.f32 %v3150_v63, %v3158_v60 }
 0x195   :  { %v3763_v26 = vunpack.c.l.b16 %v3507_v17  ;;  %v3925_v27 = vrot.slane %v3761_v2, 6  ;;  %v3927_v31 = vrot.slane %v3762_v44, 5  ;;  %v4264_v45 = vor.u32 %v4263_v42, %v4260_v3 }
 0x196   :  { %v3359_v12 = vmax.f32 %v3151_v23, %v3159_v13  ;;  %v3508_v32 = vpack.c.bf16 %v3356_v47, %v3356_v47  ;;  %v3509_v37 = vpack.c.bf16 %v3357_v29, %v3357_v29  ;;  %v3510_v49 = vpack.c.bf16 %v3358_v6, %v3358_v6  ;;  %v9717_v23 = vpop.f32.mrb[44].mxu0  ;;  %v4108_v29 = vld [vmem:[#allocation2 + $0x38] sm:$0x1f] }
 0x197   :  { %v3926_v14 = vsel %vm3842_vm1, %v3925_v27, %v3924_v15  ;;  %v3929_v20 = vrot.slane %v3763_v26, 4  ;;  %v4265_v21 = vrot.slane %v4264_v45, 4  ;;  %v4267_v19 = vshll.u32 %v7854_v22, 16 }
 0x198   :  { %v3928_v62 = vsel %vm3845_vm2, %v3927_v31, %v3926_v14  ;;  %v3511_v52 = vpack.c.bf16 %v3359_v12, %v3359_v12  ;;  %v3764_v63 = vunpack.c.l.b16 %v3508_v32  ;;  %v3765_v60 = vunpack.c.l.b16 %v3509_v37 }
 0x199   :  { %v3766_v42 = vunpack.c.l.b16 %v3510_v49  ;;  %v3930_v54 = vsel %vm3848_vm3, %v3929_v20, %v3928_v62  ;;  %v4269_v51 = vrot.slane %v4267_v19, 5  ;;  %v4272_v13 = vshrl.u32 %v9670_v24, 16 }
 0x19a   :  { %v3767_v57 = vunpack.c.l.b16 %v3511_v52  ;;  %v3931_v40 = vrot.slane %v3764_v63, 3  ;;  %v3933_v22 = vrot.slane %v3765_v60, 2  ;;  %v4275_v5 = vshll.u32 %v9670_v24, 16 }
 0x19b   :  { %v3935_v46 = vrot.slane %v3766_v42, 1  ;;  %v4270_v41 = vsel %vm9693_vm15, %v4265_v21, %v4269_v51  ;;  %v4274_v0 = vrot.slane %v4272_v13, 4  ;;  %v10833_v61 = vcombine.high %v9656_v11, %v9656_v11  ;;  %v9715_v11 = vld [vmem:[#allocation2 + $0x10] sm:$0x1e]  ;;  %v9733_v21 = vpop.f32.mrb[45].mxu0 }
 0x19c   :  { %v3932_v36 = vsel %vm3851_vm4, %v3931_v40, %v3930_v54  ;;  %v4277_v1 = vrot.slane %v4275_v5, 5  ;;  %v703_v8 = vmul.f32 %v9596_v25, %v9493_v34  ;;  %v701_v17 = vmul.f32 %v9596_v25, %v9506_v10 }
 0x19d   :  { %v4281_v39 = vshll.u32 %v10833_v61, 16  ;;  %v3934_v24 = vsel %vm3854_vm5, %v3933_v22, %v3932_v36  ;;  %v704_v44 = vmul.f32 %v9596_v25, %v9509_v4  ;;  %v702_v15 = vmul.f32 %v9596_v25, %v9514_v16  ;;  %v9742_v22 = vpop.f32.mrb[46].mxu0 }
 0x19e   :  { %v3936_v47 = vsel %vm3857_vm6, %v3935_v46, %v3934_v24  ;;  %v4278_v34 = vor.u32 %v4277_v1, %v4274_v0  ;;  %v774_v6 = vadd.f32 %v9581_v35, %v703_v8  ;;  %v772_v10 = vadd.f32 %v9581_v35, %v701_v17  ;;  %v9746_v61 = vpop.f32.mrb[47].mxu0 }
 0x19f   :  { %v4283_v2 = vrot.slane %v4281_v39, 5  ;;  %v4060_v26 = vpack.c.b16 %v3767_v57, %v3936_v47  ;;  %v775_v27 = vadd.f32 %v9581_v35, %v704_v44  ;;  %v773_v4 = vadd.f32 %v9581_v35, %v702_v15 }
 0x1a0   :  { %v707_v16 = vmul.f32 %v9596_v25, %v9523_v30  ;;  %v4279_v31 = vrot.slane %v4278_v34, 4  ;;  %v838_v45 = vmax.f32 %v774_v6, 0.0  ;;  %v836_v12 = vmax.f32 %v772_v10, 0.0 }
 0x1a1   :  { %v7929_v32 = vcombine.low %v9715_v11, %v9715_v11  ;;  %v4109_v37 = vsel %vm9430_vm9, %v4060_v26, %v4108_v29  ;;  %v839_v49 = vmax.f32 %v775_v27, 0.0  ;;  %v9730_v14 = vmax.f32 %v773_v4, 0.0 }
 0x1a2   :  { %v778_v20 = vadd.f32 %v9581_v35, %v707_v16  ;;  %4110 = vst [vmem:[#allocation2 + $0x38] sm:$0x1f] %v4109_v37  ;;  %v4284_v30 = vsel %vm9693_vm15, %v4279_v31, %v4283_v2  ;;  %v1446_v19 = vcombine.high %v838_v45, %v838_v45  ;;  %v1453_v62 = vrot.slane %v838_v45, %v9369_v48 }
 0x1a3   :  { %v1412_v52 = vcombine.high %v836_v12, %v836_v12  ;;  %v7889_v63 = vcombine.low %v4270_v41, %v4284_v30  ;;  %v1419_v60 = vrot.slane %v836_v12, %v9369_v48  ;;  %v1463_v42 = vcombine.high %v839_v49, %v839_v49  ;;  %v9748_v12 = vpop.f32.mrb[48].mxu0 }
 0x1a4   :  { %v1470_v54 = vrot.slane %v839_v49, %v9369_v48  ;;  %v1460_v51 = vrot.slane %v1446_v19, %v9369_v48  ;;  %v1461_v13 = vcombine.high %v1453_v62, %v1453_v62  ;;  %v7717_v57 = vrot.slane %v1453_v62, 9 }
 0x1a5   :  { %v1426_v40 = vrot.slane %v1412_v52, %v9369_v48  ;;  %8503 = vmatprep.mubr.msk.bf16.mxu0 %vm280_vm0, %v7889_v63  ;;  %v1427_v5 = vcombine.high %v1419_v60, %v1419_v60  ;;  %v7709_v46 = vrot.slane %v1419_v60, 9  ;;  %v1477_v0 = vrot.slane %v1463_v42, %v9369_v48 }
 0x1a6   :  { %v1478_v41 = vcombine.high %v1470_v54, %v1470_v54  ;;  %v1462_v39 = vcombine.high %v1460_v51, %v1460_v51  ;;  %v7718_v36 = vrot.slane %v1461_v13, 9  ;;  %v7719_v1 = vrot.slane %v1460_v51, 9 }
 0x1a7   :  { %v3168_v8 = vmax.f32 %v1453_v62, %v7717_v57  ;;  %v1428_v17 = vcombine.high %v1426_v40, %v1426_v40  ;;  %v7710_v24 = vrot.slane %v1427_v5, 9  ;;  %v7711_v2 = vrot.slane %v1426_v40, 9 }
 0x1a8   :  { %v3160_v44 = vmax.f32 %v1419_v60, %v7709_v46  ;;  %v7720_v15 = vrot.slane %v1462_v39, 9  ;;  %v3169_v47 = vmax.f32 %v1461_v13, %v7718_v36  ;;  %v3170_v29 = vmax.f32 %v1460_v51, %v7719_v1 }
 0x1a9   :  { %v1479_v34 = vcombine.high %v1477_v0, %v1477_v0  ;;  %v7712_v6 = vrot.slane %v1428_v17, 9  ;;  %v3161_v10 = vmax.f32 %v1427_v5, %v7710_v24  ;;  %v3162_v26 = vmax.f32 %v1426_v40, %v7711_v2 }
 0x1aa   :  { %v3360_v27 = vmax.f32 %v3160_v44, %v3168_v8  ;;  %v3171_v4 = vmax.f32 %v1462_v39, %v7720_v15  ;;  %v7721_v16 = vrot.slane %v1470_v54, 9  ;;  %v7722_v31 = vrot.slane %v1478_v41, 9 }
 0x1ab   :  { %v7723_v45 = vrot.slane %v1477_v0, 9  ;;  %v3163_v37 = vmax.f32 %v1428_v17, %v7712_v6  ;;  %v3361_v49 = vmax.f32 %v3161_v10, %v3169_v47  ;;  %v3362_v30 = vmax.f32 %v3162_v26, %v3170_v29 }
 0x1ac   :  { %v3512_v19 = vpack.c.bf16 %v3360_v27, %v3360_v27  ;;  %v7724_v62 = vrot.slane %v1479_v34, 9  ;;  %v3172_v52 = vmax.f32 %v1470_v54, %v7721_v16  ;;  %v3173_v63 = vmax.f32 %v1478_v41, %v7722_v31 }
 0x1ad   :  { %v3174_v60 = vmax.f32 %v1477_v0, %v7723_v45  ;;  %v3363_v42 = vmax.f32 %v3163_v37, %v3171_v4  ;;  %v3513_v51 = vpack.c.bf16 %v3361_v49, %v3361_v49  ;;  %v3514_v13 = vpack.c.bf16 %v3362_v30, %v3362_v30 }
 0x1ae   :  { %v3768_v57 = vunpack.c.l.b16 %v3512_v19  ;;  %v3175_v40 = vmax.f32 %v1479_v34, %v7724_v62  ;;  %v1429_v5 = vcombine.high %v9730_v14, %v9730_v14  ;;  %v1436_v46 = vrot.slane %v9730_v14, %v9369_v48 }
 0x1af   :  { %v842_v39 = vmax.f32 %v778_v20, 0.0  ;;  %v3515_v36 = vpack.c.bf16 %v3363_v42, %v3363_v42  ;;  %v3769_v1 = vunpack.c.l.b16 %v3513_v51  ;;  %v3770_v8 = vunpack.c.l.b16 %v3514_v13 }
 0x1b0   :  { %v3937_v17 = vrot.slane %v3768_v57, 7  ;;  %v1443_v54 = vrot.slane %v1429_v5, %v9369_v48  ;;  %v1444_v41 = vcombine.high %v1436_v46, %v1436_v46  ;;  %v7713_v0 = vrot.slane %v1436_v46, 9 }
 0x1b1   :  { %v1514_v24 = vcombine.high %v842_v39, %v842_v39  ;;  %v3771_v2 = vunpack.c.l.b16 %v3515_v36  ;;  %v3938_v44 = vrot.slane %v3769_v1, 6  ;;  %v3940_v15 = vrot.slane %v3770_v8, 5  ;;  %v4819_v36 = vld [vmem:[#allocation2 + $0x18] sm:$0x1e] }
 0x1b2   :  { %v1521_v47 = vrot.slane %v842_v39, %v9369_v48  ;;  %v1445_v29 = vcombine.high %v1443_v54, %v1443_v54  ;;  %v7714_v34 = vrot.slane %v1444_v41, 9  ;;  %v7715_v6 = vrot.slane %v1443_v54, 9 }
 0x1b3   :  { %v3164_v10 = vmax.f32 %v1436_v46, %v7713_v0  ;;  %v3939_v14 = vsel %vm3842_vm1, %v3938_v44, %v3937_v17  ;;  %v3942_v20 = vrot.slane %v3771_v2, 4  ;;  %v1528_v26 = vrot.slane %v1514_v24, %v9369_v48 }
 0x1b4   :  { %v1529_v27 = vcombine.high %v1521_v47, %v1521_v47  ;;  %v3941_v4 = vsel %vm3845_vm2, %v3940_v15, %v3939_v14  ;;  %v7716_v16 = vrot.slane %v1445_v29, 9  ;;  %v3165_v31 = vmax.f32 %v1444_v41, %v7714_v34  ;;  %v4160_v34 = vld [vmem:[#allocation2 + $0x10] sm:$0x1f] }
 0x1b5   :  { %v3166_v45 = vmax.f32 %v1443_v54, %v7715_v6  ;;  %v3364_v37 = vmax.f32 %v3164_v10, %v3172_v52  ;;  %v3943_v49 = vsel %vm3848_vm3, %v3942_v20, %v3941_v4  ;;  %v1530_v30 = vcombine.high %v1528_v26, %v1528_v26 }
 0x1b6   :  { %v7733_v19 = vrot.slane %v1521_v47, 9  ;;  %v3167_v62 = vmax.f32 %v1445_v29, %v7716_v16  ;;  %v3365_v42 = vmax.f32 %v3165_v31, %v3173_v63  ;;  %v7734_v13 = vrot.slane %v1529_v27, 9 }
 0x1b7   :  { %v3366_v51 = vmax.f32 %v3166_v45, %v3174_v60  ;;  %v3516_v57 = vpack.c.bf16 %v3364_v37, %v3364_v37  ;;  %v7735_v5 = vrot.slane %v1528_v26, 9  ;;  %v7736_v46 = vrot.slane %v1530_v30, 9  ;;  %v9785_v37 = vld [vmem:[#allocation2 + $0x18] sm:$0x1f] }
 0x1b8   :  { %v9760_v39 = vmax.f32 %v1521_v47, %v7733_v19  ;;  %v3367_v1 = vmax.f32 %v3167_v62, %v3175_v40  ;;  %v3517_v8 = vpack.c.bf16 %v3365_v42, %v3365_v42  ;;  %v9762_v41 = vmax.f32 %v1529_v27, %v7734_v13  ;;  %v4111_v19 = vld [vmem:[#allocation2 + $0x40] sm:$0x1f] }
 0x1b9   :  { %v3518_v17 = vpack.c.bf16 %v3366_v51, %v3366_v51  ;;  %v3772_v52 = vunpack.c.l.b16 %v3516_v57  ;;  %v9764_v54 = vmax.f32 %v1528_v26, %v7735_v5  ;;  %v9766_v0 = vmax.f32 %v1530_v30, %v7736_v46  ;;  %v9773_v26 = vpop.f32.mrb[49].mxu0 }
 0x1ba   :  { %v7930_v63 = vcombine.high %v9715_v11, %v9715_v11  ;;  %v3519_v60 = vpack.c.bf16 %v3367_v1, %v3367_v1  ;;  %v3773_v24 = vunpack.c.l.b16 %v3517_v8  ;;  %v7931_v44 = vcombine.low %v4819_v36, %v4819_v36 }
 0x1bb   :  { %v3774_v2 = vunpack.c.l.b16 %v3518_v17  ;;  %v3944_v15 = vrot.slane %v3772_v52, 3  ;;  %v7932_v47 = vcombine.high %v4819_v36, %v4819_v36  ;;  %v7959_v40 = vrot.slane %v7929_v32, 9  ;;  %v9802_v52 = vpop.f32.mrb[50].mxu0 }
 0x1bc   :  { %v4925_v29 = vrot.slane %v7930_v63, 5  ;;  %v3775_v6 = vunpack.c.l.b16 %v3519_v60  ;;  %v3946_v10 = vrot.slane %v3773_v24, 2  ;;  %v7960_v20 = vrot.slane %v7931_v44, 9 }
 0x1bd   :  { %v3948_v14 = vrot.slane %v3774_v2, 1  ;;  %v3945_v27 = vsel %vm3851_vm4, %v3944_v15, %v3943_v49  ;;  %v4929_v16 = vrot.slane %v7932_v47, 5  ;;  %v705_v31 = vmul.f32 %v9596_v25, %v9547_v56  ;;  %v9809_v2 = vpop.f32.mrb[51].mxu0 }
 0x1be   :  { %v4926_v4 = vsel %vm9638_vm12, %v7959_v40, %v4925_v29  ;;  %v3947_v11 = vsel %vm3854_vm5, %v3946_v10, %v3945_v27  ;;  %v708_v32 = vmul.f32 %v9596_v25, %v9557_v58  ;;  %v706_v45 = vmul.f32 %v9596_v25, %v9561_v28 }
 0x1bf   :  { %v7857_v30 = vcombine.low %v4160_v34, %v4160_v34  ;;  %v3949_v49 = vsel %vm3857_vm6, %v3948_v14, %v3947_v11  ;;  %v4930_v62 = vsel %vm9638_vm12, %v7960_v20, %v4929_v16  ;;  %v776_v42 = vadd.f32 %v9581_v35, %v705_v31 }
 0x1c0   :  { %v7858_v56 = vcombine.high %v4160_v34, %v4160_v34  ;;  %v4061_v51 = vpack.c.b16 %v3775_v6, %v3949_v49  ;;  %v7978_v13 = vcombine.low %v4926_v4, %v4930_v62  ;;  %v779_v57 = vadd.f32 %v9581_v35, %v708_v32 }
 0x1c1   :  { %v777_v58 = vadd.f32 %v9581_v35, %v706_v45  ;;  %v840_v5 = vmax.f32 %v776_v42, 0.0  ;;  %v9795_v28 = vcombine.low %v9785_v37, %v9785_v37  ;;  %v7860_v25 = vcombine.high %v9785_v37, %v9785_v37  ;;  %v9846_v37 = vld [vmem:[%s10818_s3] ss:$0 sm:$0xff] }
 0x1c2   :  { %v4286_v46 = vshrl.u32 %v7857_v30, 16  ;;  %v4112_v36 = vsel %vm9430_vm9, %v4061_v51, %v4111_v19  ;;  %8544 = vmatmul.mubr.msk.bf16.vlgmr.msra.gmra.mrb[0].mxu1 %vm280_vm0, %v7978_v13  ;;  %v843_v1 = vmax.f32 %v779_v57, 0.0  ;;  %v4289_v17 = vshll.u32 %v7857_v30, 16 }
 0x1c3   :  { %v841_v8 = vmax.f32 %v777_v58, 0.0  ;;  %4113 = vst [vmem:[#allocation2 + $0x40] sm:$0x1f] %v4112_v36  ;;  %v1480_v35 = vcombine.high %v840_v5, %v840_v5  ;;  %v1487_v63 = vrot.slane %v840_v5, %v9369_v48  ;;  %v9807_v24 = vshll.u32 %v7858_v56, 16 }
 0x1c4   :  { %v9805_v60 = vrot.slane %v4286_v46, 4  ;;  %v1531_v44 = vcombine.high %v843_v1, %v843_v1  ;;  %v1538_v15 = vrot.slane %v843_v1, %v9369_v48  ;;  %v4291_v10 = vrot.slane %v4289_v17, 5 }
 0x1c5   :  { %v1497_v47 = vcombine.high %v841_v8, %v841_v8  ;;  %v1504_v40 = vrot.slane %v841_v8, %v9369_v48  ;;  %v1494_v29 = vrot.slane %v1480_v35, %v9369_v48  ;;  %v1495_v34 = vcombine.high %v1487_v63, %v1487_v63 }
 0x1c6   :  { %v7725_v6 = vrot.slane %v1487_v63, 9  ;;  %v1545_v14 = vrot.slane %v1531_v44, %v9369_v48  ;;  %v1546_v20 = vcombine.high %v1538_v15, %v1538_v15  ;;  %v7737_v27 = vrot.slane %v1538_v15, 9 }
 0x1c7   :  { %v1511_v4 = vrot.slane %v1497_v47, %v9369_v48  ;;  %v1496_v16 = vcombine.high %v1494_v29, %v1494_v29  ;;  %v7726_v31 = vrot.slane %v1495_v34, 9  ;;  %v7727_v11 = vrot.slane %v1494_v29, 9 }
 0x1c8   :  { %v3176_v32 = vmax.f32 %v1487_v63, %v7725_v6  ;;  %v1547_v45 = vcombine.high %v1545_v14, %v1545_v14  ;;  %v7738_v30 = vrot.slane %v1546_v20, 9  ;;  %v7739_v49 = vrot.slane %v1545_v14, 9 }
 0x1c9   :  { %v3188_v19 = vmax.f32 %v1538_v15, %v7737_v27  ;;  %v7728_v62 = vrot.slane %v1496_v16, 9  ;;  %v3177_v42 = vmax.f32 %v1495_v34, %v7726_v31  ;;  %v3178_v56 = vmax.f32 %v1494_v29, %v7727_v11 }
 0x1ca   :  { %v3368_v51 = vmax.f32 %v3176_v32, %v9760_v39  ;;  %v7740_v13 = vrot.slane %v1547_v45, 9  ;;  %v3189_v57 = vmax.f32 %v1546_v20, %v7738_v30  ;;  %v3190_v58 = vmax.f32 %v1545_v14, %v7739_v49 }
 0x1cb   :  { %v1512_v5 = vcombine.high %v1504_v40, %v1504_v40  ;;  %v3179_v46 = vmax.f32 %v1496_v16, %v7728_v62  ;;  %v3369_v36 = vmax.f32 %v3177_v42, %v9762_v41  ;;  %v3370_v1 = vmax.f32 %v3178_v56, %v9764_v54 }
 0x1cc   :  { %v3520_v8 = vpack.c.bf16 %v3368_v51, %v3368_v51  ;;  %v3191_v17 = vmax.f32 %v1547_v45, %v7740_v13  ;;  %v1513_v35 = vcombine.high %v1511_v4, %v1511_v4  ;;  %v7729_v63 = vrot.slane %v1504_v40, 9 }
 0x1cd   :  { %v7730_v44 = vrot.slane %v1512_v5, 9  ;;  %v3371_v15 = vmax.f32 %v3179_v46, %v9766_v0  ;;  %v3521_v47 = vpack.c.bf16 %v3369_v36, %v3369_v36  ;;  %v3522_v29 = vpack.c.bf16 %v3370_v1, %v3370_v1 }
 0x1ce   :  { %v3776_v34 = vunpack.c.l.b16 %v3520_v8  ;;  %v7731_v39 = vrot.slane %v1511_v4, 9  ;;  %v7732_v6 = vrot.slane %v1513_v35, 9  ;;  %v3180_v20 = vmax.f32 %v1504_v40, %v7729_v63 }
 0x1cf   :  { %v3181_v14 = vmax.f32 %v1512_v5, %v7730_v44  ;;  %v3523_v27 = vpack.c.bf16 %v3371_v15, %v3371_v15  ;;  %v3777_v16 = vunpack.c.l.b16 %v3521_v47  ;;  %v3778_v31 = vunpack.c.l.b16 %v3522_v29  ;;  %v9835_v29 = vld [vmem:[%s10817_s2] ss:$0 sm:$0xff] }
 0x1d0   :  { %v3950_v41 = vrot.slane %v3776_v34, 7  ;;  %v3182_v11 = vmax.f32 %v1511_v4, %v7731_v39  ;;  %v3183_v54 = vmax.f32 %v1513_v35, %v7732_v6  ;;  %v3372_v32 = vmax.f32 %v3180_v20, %v3188_v19 }
 0x1d1   :  { %v3373_v45 = vmax.f32 %v3181_v14, %v3189_v57  ;;  %v3779_v30 = vunpack.c.l.b16 %v3523_v27  ;;  %v3951_v49 = vrot.slane %v3777_v16, 6  ;;  %v3953_v62 = vrot.slane %v3778_v31, 5  ;;  %v9851_v16 = vld [vmem:[#allocation2 + $0x20] sm:$0x1e]  ;;  %v9853_v31 = vpop.f32.mrb[52].mxu0 }
 0x1d2   :  { %v4292_v0 = vor.u32 %v4291_v10, %v9805_v60  ;;  %v3374_v42 = vmax.f32 %v3182_v11, %v3190_v58  ;;  %v3375_v56 = vmax.f32 %v3183_v54, %v3191_v17  ;;  %v3524_v51 = vpack.c.bf16 %v3372_v32, %v3372_v32 }
 0x1d3   :  { %v3525_v13 = vpack.c.bf16 %v3373_v45, %v3373_v45  ;;  %v3952_v40 = vsel %vm3842_vm1, %v3951_v49, %v3950_v41  ;;  %v3955_v5 = vrot.slane %v3779_v30, 4  ;;  %v4297_v36 = vrot.slane %v9807_v24, 5 }
 0x1d4   :  { %v4293_v46 = vrot.slane %v4292_v0, 4  ;;  %v3954_v4 = vsel %vm3845_vm2, %v3953_v62, %v3952_v40  ;;  %v3526_v1 = vpack.c.bf16 %v3374_v42, %v3374_v42  ;;  %v3527_v19 = vpack.c.bf16 %v3375_v56, %v3375_v56 }
 0x1d5   :  { %v3780_v57 = vunpack.c.l.b16 %v3524_v51  ;;  %v3781_v8 = vunpack.c.l.b16 %v3525_v13  ;;  %v3956_v35 = vsel %vm3848_vm3, %v3955_v5, %v3954_v4  ;;  %v4300_v10 = vshrl.u32 %v9795_v28, 16  ;;  %v9870_v5 = vpop.f32.mrb[53].mxu0 }
 0x1d6   :  { %v4298_v60 = vsel %vm9693_vm15, %v4293_v46, %v4297_v36  ;;  %v3782_v58 = vunpack.c.l.b16 %v3526_v1  ;;  %v3783_v17 = vunpack.c.l.b16 %v3527_v19  ;;  %v4303_v44 = vshll.u32 %v9795_v28, 16 }
 0x1d7   :  { %v3957_v63 = vrot.slane %v3780_v57, 3  ;;  %v3959_v15 = vrot.slane %v3781_v8, 2  ;;  %v4302_v24 = vrot.slane %v4300_v10, 4  ;;  %v4309_v47 = vshll.u32 %v7860_v25, 16 }
 0x1d8   :  { %v711_v34 = vmul.f32 %v9835_v29, %v9591_v53  ;;  %v3961_v6 = vrot.slane %v3782_v58, 1  ;;  %v4305_v20 = vrot.slane %v4303_v44, 5  ;;  %v709_v28 = vmul.f32 %v9835_v29, %v9606_v7  ;;  %v4114_v7 = vld [vmem:[#allocation2 + $0x58] sm:$0x1f] }
 0x1d9   :  { %v3958_v39 = vsel %vm3851_vm4, %v3957_v63, %v3956_v35  ;;  %v4311_v27 = vrot.slane %v4309_v47, 5  ;;  %v712_v53 = vmul.f32 %v9835_v29, %v9613_v33  ;;  %v710_v32 = vmul.f32 %v9835_v29, %v9616_v59  ;;  %v9877_v63 = vpop.f32.mrb[54].mxu0 }
 0x1da   :  { %v3960_v14 = vsel %vm3854_vm5, %v3959_v15, %v3958_v39  ;;  %v782_v25 = vadd.f32 %v9846_v37, %v711_v34  ;;  %v4306_v11 = vor.u32 %v4305_v20, %v4302_v24  ;;  %v780_v54 = vadd.f32 %v9846_v37, %v709_v28  ;;  %v9880_v34 = vpop.f32.mrb[55].mxu0 }
 0x1db   :  { %v3962_v41 = vsel %vm3857_vm6, %v3961_v6, %v3960_v14  ;;  %v783_v49 = vadd.f32 %v9846_v37, %v712_v53  ;;  %v9862_v33 = vmul.f32 %v9835_v29, %v9622_v43  ;;  %v781_v42 = vadd.f32 %v9846_v37, %v710_v32 }
 0x1dc   :  { %v4062_v45 = vpack.c.b16 %v3783_v17, %v3962_v41  ;;  %v846_v30 = vmax.f32 %v782_v25, 0.0  ;;  %v4307_v62 = vrot.slane %v4306_v11, 4  ;;  %v844_v0 = vmax.f32 %v780_v54, 0.0 }
 0x1dd   :  { %v7933_v56 = vcombine.low %v9851_v16, %v9851_v16  ;;  %v847_v40 = vmax.f32 %v783_v49, 0.0  ;;  %v845_v4 = vmax.f32 %v781_v42, 0.0 }
 0x1de   :  { %v4115_v51 = vsel %vm9430_vm9, %v4062_v45, %v4114_v7  ;;  %v1582_v13 = vcombine.high %v846_v30, %v846_v30  ;;  %v1589_v59 = vrot.slane %v846_v30, %v9369_v48  ;;  %v4312_v43 = vsel %vm9693_vm15, %v4307_v62, %v4311_v27 }
 0x1df   :  { %4116 = vst [vmem:[#allocation2 + $0x58] sm:$0x1f] %v4115_v51  ;;  %v1548_v46 = vcombine.high %v844_v0, %v844_v0  ;;  %v1555_v36 = vrot.slane %v844_v0, %v9369_v48  ;;  %v7890_v1 = vcombine.low %v4298_v60, %v4312_v43  ;;  %v1599_v17 = vcombine.high %v847_v40, %v847_v40  ;;  %v9884_v51 = vpop.f32.mrb[56].mxu0 }
 0x1e0   :  { %v1596_v19 = vrot.slane %v1582_v13, %v9369_v48  ;;  %v1597_v57 = vcombine.high %v1589_v59, %v1589_v59  ;;  %v7749_v8 = vrot.slane %v1589_v59, 9  ;;  %v1606_v25 = vrot.slane %v847_v40, %v9369_v48 }
 0x1e1   :  { %v1562_v35 = vrot.slane %v1548_v46, %v9369_v48  ;;  %v1563_v10 = vcombine.high %v1555_v36, %v1555_v36  ;;  %v7741_v58 = vrot.slane %v1555_v36, 9  ;;  %8504 = vmatmul.mubr.msk.bf16.vlgmr.msra.gmra.mrb[64].mxu0 %vm280_vm0, %v7890_v1  ;;  %v1613_v32 = vrot.slane %v1599_v17, %v9369_v48 }
 0x1e2   :  { %v1598_v44 = vcombine.high %v1596_v19, %v1596_v19  ;;  %v7750_v15 = vrot.slane %v1597_v57, 9  ;;  %v7751_v24 = vrot.slane %v1596_v19, 9  ;;  %v3200_v47 = vmax.f32 %v1589_v59, %v7749_v8 }
 0x1e3   :  { %v1564_v60 = vcombine.high %v1562_v35, %v1562_v35  ;;  %v7742_v39 = vrot.slane %v1563_v10, 9  ;;  %v7743_v6 = vrot.slane %v1562_v35, 9  ;;  %v3192_v20 = vmax.f32 %v1555_v36, %v7741_v58 }
 0x1e4   :  { %v7752_v28 = vrot.slane %v1598_v44, 9  ;;  %v3201_v14 = vmax.f32 %v1597_v57, %v7750_v15  ;;  %v3202_v27 = vmax.f32 %v1596_v19, %v7751_v24  ;;  %v1614_v45 = vcombine.high %v1606_v25, %v1606_v25 }
 0x1e5   :  { %v7744_v53 = vrot.slane %v1564_v60, 9  ;;  %v3193_v41 = vmax.f32 %v1563_v10, %v7742_v39  ;;  %v3194_v7 = vmax.f32 %v1562_v35, %v7743_v6  ;;  %v3376_v11 = vmax.f32 %v3192_v20, %v3200_v47  ;;  %v4821_v6 = vld [vmem:[#allocation2 + $0x28] sm:$0x1e] }
 0x1e6   :  { %v3203_v54 = vmax.f32 %v1598_v44, %v7752_v28  ;;  %v7753_v30 = vrot.slane %v1606_v25, 9  ;;  %v1615_v13 = vcombine.high %v1613_v32, %v1613_v32  ;;  %v7754_v59 = vrot.slane %v1614_v45, 9 }
 0x1e7   :  { %v3195_v49 = vmax.f32 %v1564_v60, %v7744_v53  ;;  %v3377_v62 = vmax.f32 %v3193_v41, %v3201_v14  ;;  %v3378_v0 = vmax.f32 %v3194_v7, %v3202_v27  ;;  %v3528_v42 = vpack.c.bf16 %v3376_v11, %v3376_v11 }
 0x1e8   :  { %v7755_v43 = vrot.slane %v1613_v32, 9  ;;  %v3204_v46 = vmax.f32 %v1606_v25, %v7753_v30  ;;  %v7756_v57 = vrot.slane %v1615_v13, 9  ;;  %v3205_v8 = vmax.f32 %v1614_v45, %v7754_v59 }
 0x1e9   :  { %v3379_v40 = vmax.f32 %v3195_v49, %v3203_v54  ;;  %v3529_v36 = vpack.c.bf16 %v3377_v62, %v3377_v62  ;;  %v3530_v1 = vpack.c.bf16 %v3378_v0, %v3378_v0  ;;  %v3784_v19 = vunpack.c.l.b16 %v3528_v42 }
 0x1ea   :  { %v3206_v35 = vmax.f32 %v1613_v32, %v7755_v43  ;;  %v1565_v10 = vcombine.high %v845_v4, %v845_v4  ;;  %v3207_v24 = vmax.f32 %v1615_v13, %v7756_v57  ;;  %v1572_v47 = vrot.slane %v845_v4, %v9369_v48 }
 0x1eb   :  { %v3531_v58 = vpack.c.bf16 %v3379_v40, %v3379_v40  ;;  %v3785_v17 = vunpack.c.l.b16 %v3529_v36  ;;  %v3786_v44 = vunpack.c.l.b16 %v3530_v1  ;;  %v3963_v15 = vrot.slane %v3784_v19, 7 }
 0x1ec   :  { %v1579_v60 = vrot.slane %v1565_v10, %v9369_v48  ;;  %v786_v39 = vadd.f32 %v9846_v37, %v9862_v33  ;;  %v7934_v27 = vcombine.high %v9851_v16, %v9851_v16  ;;  %v1580_v25 = vcombine.high %v1572_v47, %v1572_v47 }
 0x1ed   :  { %v3787_v20 = vunpack.c.l.b16 %v3531_v58  ;;  %v3964_v28 = vrot.slane %v3785_v17, 6  ;;  %v3966_v14 = vrot.slane %v3786_v44, 5  ;;  %v7745_v41 = vrot.slane %v1572_v47, 9 }
 0x1ee   :  { %v1581_v53 = vcombine.high %v1579_v60, %v1579_v60  ;;  %v7747_v7 = vrot.slane %v1579_v60, 9  ;;  %v850_v4 = vmax.f32 %v786_v39, 0.0  ;;  %v7935_v32 = vcombine.low %v4821_v6, %v4821_v6 }
 0x1ef   :  { %v3965_v11 = vsel %vm3842_vm1, %v3964_v28, %v3963_v15  ;;  %v3968_v54 = vrot.slane %v3787_v20, 4  ;;  %v7746_v30 = vrot.slane %v1580_v25, 9  ;;  %v3196_v49 = vmax.f32 %v1572_v47, %v7745_v41 }
 0x1f0   :  { %v3967_v45 = vsel %vm3845_vm2, %v3966_v14, %v3965_v11  ;;  %v7748_v33 = vrot.slane %v1581_v53, 9  ;;  %v3198_v62 = vmax.f32 %v1579_v60, %v7747_v7  ;;  %v1650_v42 = vcombine.high %v850_v4, %v850_v4  ;;  %v4162_v11 = vld [vmem:[#allocation2 + $0x20] sm:$0x1f] }
 0x1f1   :  { %v3969_v0 = vsel %vm3848_vm3, %v3968_v54, %v3967_v45  ;;  %v1657_v13 = vrot.slane %v850_v4, %v9369_v48  ;;  %v3197_v59 = vmax.f32 %v1580_v25, %v7746_v30  ;;  %v3380_v40 = vmax.f32 %v3196_v49, %v3204_v46 }
 0x1f2   :  { %v3199_v43 = vmax.f32 %v1581_v53, %v7748_v33  ;;  %v7936_v36 = vcombine.high %v4821_v6, %v4821_v6  ;;  %v3382_v1 = vmax.f32 %v3198_v62, %v3206_v35  ;;  %v1664_v19 = vrot.slane %v1650_v42, %v9369_v48 }
 0x1f3   :  { %v1665_v57 = vcombine.high %v1657_v13, %v1657_v13  ;;  %v7765_v10 = vrot.slane %v1657_v13, 9  ;;  %v3381_v58 = vmax.f32 %v3197_v59, %v3205_v8  ;;  %v3532_v44 = vpack.c.bf16 %v3380_v40, %v3380_v40 }
 0x1f4   :  { %v3383_v17 = vmax.f32 %v3199_v43, %v3207_v24  ;;  %v7961_v15 = vrot.slane %v7933_v56, 9  ;;  %v3534_v47 = vpack.c.bf16 %v3382_v1, %v3382_v1  ;;  %v1666_v60 = vcombine.high %v1664_v19, %v1664_v19  ;;  %v9906_v24 = vpop.f32.mrb[57].mxu0 }
 0x1f5   :  { %v7766_v39 = vrot.slane %v1665_v57, 9  ;;  %v7767_v20 = vrot.slane %v1664_v19, 9  ;;  %v3533_v28 = vpack.c.bf16 %v3381_v58, %v3381_v58  ;;  %v3788_v46 = vunpack.c.l.b16 %v3532_v44  ;;  %v9908_v54 = vpop.f32.mrb[58].mxu0 }
 0x1f6   :  { %v3535_v14 = vpack.c.bf16 %v3383_v17, %v3383_v17  ;;  %v9900_v6 = vmax.f32 %v1657_v13, %v7765_v10  ;;  %v3790_v35 = vunpack.c.l.b16 %v3534_v47  ;;  %v7768_v25 = vrot.slane %v1666_v60, 9  ;;  %v9912_v49 = vpop.f32.mrb[59].mxu0  ;;  %v4117_v10 = vld [vmem:[#allocation2 + $0x60] sm:$0x1f] }
 0x1f7   :  { %v9902_v53 = vmax.f32 %v1665_v57, %v7766_v39  ;;  %v9904_v8 = vmax.f32 %v1664_v19, %v7767_v20  ;;  %v3789_v41 = vunpack.c.l.b16 %v3533_v28  ;;  %v3970_v56 = vrot.slane %v3788_v46, 3 }
 0x1f8   :  { %v3791_v16 = vunpack.c.l.b16 %v3535_v14  ;;  %v4933_v7 = vrot.slane %v7934_v27, 5  ;;  %v3974_v4 = vrot.slane %v3790_v35, 1  ;;  %v9910_v45 = vmax.f32 %v1666_v60, %v7768_v25  ;;  %v9919_v27 = vld [vmem:[#allocation2 + $0x28] sm:$0x1f] }
 0x1f9   :  { %v7962_v30 = vrot.slane %v7935_v32, 9  ;;  %v4937_v33 = vrot.slane %v7936_v36, 5  ;;  %v3971_v62 = vsel %vm3851_vm4, %v3970_v56, %v3969_v0  ;;  %v3972_v42 = vrot.slane %v3789_v41, 2 }
 0x1fa   :  { %v4934_v13 = vsel %vm9638_vm12, %v7961_v15, %v4933_v7  ;;  %v713_v59 = vmul.f32 %v9835_v29, %v9642_v38  ;;  %v716_v32 = vmul.f32 %v9835_v29, %v9674_v55  ;;  %v714_v40 = vmul.f32 %v9835_v29, %v9678_v50 }
 0x1fb   :  { %v4938_v43 = vsel %vm9638_vm12, %v7962_v30, %v4937_v33  ;;  %v7861_v36 = vcombine.low %v4162_v11, %v4162_v11  ;;  %v3973_v0 = vsel %vm3854_vm5, %v3972_v42, %v3971_v62  ;;  %v7862_v57 = vcombine.high %v4162_v11, %v4162_v11 }
 0x1fc   :  { %v7979_v1 = vcombine.low %v4934_v13, %v4938_v43  ;;  %v784_v19 = vadd.f32 %v9846_v37, %v713_v59  ;;  %v3975_v38 = vsel %vm3857_vm6, %v3974_v4, %v3973_v0  ;;  %v787_v58 = vadd.f32 %v9846_v37, %v716_v32 }
 0x1fd   :  { %v785_v17 = vadd.f32 %v9846_v37, %v714_v40  ;;  %v9934_v55 = vcombine.low %v9919_v27, %v9919_v27  ;;  %v4063_v44 = vpack.c.b16 %v3791_v16, %v3975_v38  ;;  %v7864_v15 = vcombine.high %v9919_v27, %v9919_v27  ;;  %v9976_v27 = vld [vmem:[#allocation2 + $0x30] sm:$0x1e] }
 0x1fe   :  { %8547 = vmatprep.mubr.msk.bf16.mxu1 %vm280_vm0, %v7979_v1  ;;  %v848_v50 = vmax.f32 %v784_v19, 0.0  ;;  %v4314_v47 = vshrl.u32 %v7861_v36, 16  ;;  %v851_v60 = vmax.f32 %v787_v58, 0.0  ;;  %v4317_v20 = vshll.u32 %v7861_v36, 16 }
 0x1ff   :  { %v849_v39 = vmax.f32 %v785_v17, 0.0  ;;  %v9939_v28 = vshll.u32 %v7862_v57, 16  ;;  %v4118_v14 = vsel %vm9430_vm9, %v4063_v44, %v4117_v10 }
 0x200   :  { %v1616_v46 = vcombine.high %v848_v50, %v848_v50  ;;  %v1623_v35 = vrot.slane %v848_v50, %v9369_v48  ;;  %v9944_v25 = vrot.slane %v4314_v47, 4  ;;  %4119 = vst [vmem:[#allocation2 + $0x60] sm:$0x1f] %v4118_v14  ;;  %v1667_v41 = vcombine.high %v851_v60, %v851_v60 }
 0x201   :  { %v1674_v16 = vrot.slane %v851_v60, %v9369_v48  ;;  %v1633_v56 = vcombine.high %v849_v39, %v849_v39  ;;  %v1640_v7 = vrot.slane %v849_v39, %v9369_v48  ;;  %v4319_v33 = vrot.slane %v4317_v20, 5 }
 0x202   :  { %v1630_v11 = vrot.slane %v1616_v46, %v9369_v48  ;;  %v1631_v4 = vcombine.high %v1623_v35, %v1623_v35  ;;  %v7757_v30 = vrot.slane %v1623_v35, 9  ;;  %v1681_v62 = vrot.slane %v1667_v41, %v9369_v48 }
 0x203   :  { %v1682_v42 = vcombine.high %v1674_v16, %v1674_v16  ;;  %v7769_v13 = vrot.slane %v1674_v16, 9  ;;  %v1647_v59 = vrot.slane %v1633_v56, %v9369_v48  ;;  %v1648_v60 = vcombine.high %v1640_v7, %v1640_v7 }
 0x204   :  { %v1632_v43 = vcombine.high %v1630_v11, %v1630_v11  ;;  %v7758_v32 = vrot.slane %v1631_v4, 9  ;;  %v7759_v40 = vrot.slane %v1630_v11, 9  ;;  %v3208_v36 = vmax.f32 %v1623_v35, %v7757_v30 }
 0x205   :  { %v1683_v0 = vcombine.high %v1681_v62, %v1681_v62  ;;  %v7770_v1 = vrot.slane %v1682_v42, 9  ;;  %v7771_v19 = vrot.slane %v1681_v62, 9  ;;  %v3220_v57 = vmax.f32 %v1674_v16, %v7769_v13 }
 0x206   :  { %v7760_v38 = vrot.slane %v1632_v43, 9  ;;  %v3209_v10 = vmax.f32 %v1631_v4, %v7758_v32  ;;  %v3210_v58 = vmax.f32 %v1630_v11, %v7759_v40  ;;  %v3384_v17 = vmax.f32 %v3208_v36, %v9900_v6 }
 0x207   :  { %v7772_v44 = vrot.slane %v1683_v0, 9  ;;  %v3221_v50 = vmax.f32 %v1682_v42, %v7770_v1  ;;  %v3222_v47 = vmax.f32 %v1681_v62, %v7771_v19  ;;  %v1649_v41 = vcombine.high %v1647_v59, %v1647_v59 }
 0x208   :  { %v3211_v39 = vmax.f32 %v1632_v43, %v7760_v38  ;;  %v3385_v20 = vmax.f32 %v3209_v10, %v9902_v53  ;;  %v3386_v14 = vmax.f32 %v3210_v58, %v9904_v8  ;;  %v3536_v46 = vpack.c.bf16 %v3384_v17, %v3384_v17 }
 0x209   :  { %v3223_v35 = vmax.f32 %v1683_v0, %v7772_v44  ;;  %v7761_v56 = vrot.slane %v1640_v7, 9  ;;  %v7762_v30 = vrot.slane %v1648_v60, 9  ;;  %v7763_v6 = vrot.slane %v1647_v59, 9 }
 0x20a   :  { %v3387_v16 = vmax.f32 %v3211_v39, %v9910_v45  ;;  %v3537_v4 = vpack.c.bf16 %v3385_v20, %v3385_v20  ;;  %v3538_v11 = vpack.c.bf16 %v3386_v14, %v3386_v14  ;;  %v3792_v13 = vunpack.c.l.b16 %v3536_v46 }
 0x20b   :  { %v7764_v32 = vrot.slane %v1649_v41, 9  ;;  %v3212_v42 = vmax.f32 %v1640_v7, %v7761_v56  ;;  %v3213_v62 = vmax.f32 %v1648_v60, %v7762_v30  ;;  %v3214_v1 = vmax.f32 %v1647_v59, %v7763_v6 }
 0x20c   :  { %v3539_v40 = vpack.c.bf16 %v3387_v16, %v3387_v16  ;;  %v3793_v43 = vunpack.c.l.b16 %v3537_v4  ;;  %v3794_v36 = vunpack.c.l.b16 %v3538_v11  ;;  %v3976_v53 = vrot.slane %v3792_v13, 7 }
 0x20d   :  { %v3215_v8 = vmax.f32 %v1649_v41, %v7764_v32  ;;  %v3388_v19 = vmax.f32 %v3212_v42, %v3220_v57  ;;  %v3389_v0 = vmax.f32 %v3213_v62, %v3221_v50  ;;  %v4320_v45 = vor.u32 %v4319_v33, %v9944_v25 }
 0x20e   :  { %v3795_v38 = vunpack.c.l.b16 %v3539_v40  ;;  %v3977_v10 = vrot.slane %v3793_v43, 6  ;;  %v3979_v58 = vrot.slane %v3794_v36, 5  ;;  %v3390_v17 = vmax.f32 %v3214_v1, %v3222_v47  ;;  %v4120_v1 = vld [vmem:[#allocation2 + $0x68] sm:$0x1f] }
 0x20f   :  { %v3391_v44 = vmax.f32 %v3215_v8, %v3223_v35  ;;  %v3540_v39 = vpack.c.bf16 %v3388_v19, %v3388_v19  ;;  %v3541_v20 = vpack.c.bf16 %v3389_v0, %v3389_v0  ;;  %v4321_v14 = vrot.slane %v4320_v45, 4 }
 0x210   :  { %v3978_v7 = vsel %vm3842_vm1, %v3977_v10, %v3976_v53  ;;  %v3981_v60 = vrot.slane %v3795_v38, 4  ;;  %v4325_v46 = vrot.slane %v9939_v28, 5  ;;  %v3542_v41 = vpack.c.bf16 %v3390_v17, %v3390_v17 }
 0x211   :  { %v3980_v59 = vsel %vm3845_vm2, %v3979_v58, %v3978_v7  ;;  %v3543_v57 = vpack.c.bf16 %v3391_v44, %v3391_v44  ;;  %v3796_v50 = vunpack.c.l.b16 %v3540_v39  ;;  %v3797_v56 = vunpack.c.l.b16 %v3541_v20 }
 0x212   :  { %v3982_v30 = vsel %vm3848_vm3, %v3981_v60, %v3980_v59  ;;  %v4326_v25 = vsel %vm9693_vm15, %v4321_v14, %v4325_v46  ;;  %v4328_v33 = vshrl.u32 %v9934_v55, 16  ;;  %v3798_v47 = vunpack.c.l.b16 %v3542_v41 }
 0x213   :  { %v3799_v35 = vunpack.c.l.b16 %v3543_v57  ;;  %v3983_v16 = vrot.slane %v3796_v50, 3  ;;  %v4331_v4 = vshll.u32 %v9934_v55, 16  ;;  %v3985_v11 = vrot.slane %v3797_v56, 2 }
 0x214   :  { %v4330_v28 = vrot.slane %v4328_v33, 4  ;;  %v4337_v13 = vshll.u32 %v7864_v15, 16  ;;  %v719_v6 = vmul.f32 %v9835_v29, %v9717_v23  ;;  %v3987_v42 = vrot.slane %v3798_v47, 1  ;;  %v9978_v15 = vpop.f32.mrb[60].mxu0 }
 0x215   :  { %v3984_v32 = vsel %vm3851_vm4, %v3983_v16, %v3982_v30  ;;  %v4333_v62 = vrot.slane %v4331_v4, 5  ;;  %v717_v40 = vmul.f32 %v9835_v29, %v9733_v21  ;;  %v720_v53 = vmul.f32 %v9835_v29, %v9742_v22  ;;  %v9995_v60 = vpop.f32.mrb[61].mxu0 }
 0x216   :  { %v3986_v43 = vsel %vm3854_vm5, %v3985_v11, %v3984_v32  ;;  %v4339_v36 = vrot.slane %v4337_v13, 5  ;;  %v790_v55 = vadd.f32 %v9846_v37, %v719_v6  ;;  %v718_v21 = vmul.f32 %v9835_v29, %v9746_v61  ;;  %v10002_v16 = vpop.f32.mrb[62].mxu0 }
 0x217   :  { %v3988_v23 = vsel %vm3857_vm6, %v3987_v42, %v3986_v43  ;;  %v4334_v8 = vor.u32 %v4333_v62, %v4330_v28  ;;  %v788_v19 = vadd.f32 %v9846_v37, %v717_v40  ;;  %v791_v10 = vadd.f32 %v9846_v37, %v720_v53  ;;  %v10005_v6 = vpop.f32.mrb[63].mxu0 }
 0x218   :  { %v4064_v0 = vpack.c.b16 %v3799_v35, %v3988_v23  ;;  %v854_v38 = vmax.f32 %v790_v55, 0.0  ;;  %v9987_v22 = vmul.f32 %v9835_v29, %v9748_v12  ;;  %v789_v17 = vadd.f32 %v9846_v37, %v718_v21 }
 0x219   :  { %v4335_v58 = vrot.slane %v4334_v8, 4  ;;  %v852_v45 = vmax.f32 %v788_v19, 0.0  ;;  %v7937_v44 = vcombine.low %v9976_v27, %v9976_v27  ;;  %v855_v7 = vmax.f32 %v791_v10, 0.0 }
 0x21a   :  { %v4121_v39 = vsel %vm9430_vm9, %v4064_v0, %v4120_v1  ;;  %v1718_v20 = vcombine.high %v854_v38, %v854_v38  ;;  %v1725_v61 = vrot.slane %v854_v38, %v9369_v48  ;;  %v853_v59 = vmax.f32 %v789_v17, 0.0 }
 0x21b   :  { %4122 = vst [vmem:[#allocation2 + $0x68] sm:$0x1f] %v4121_v39  ;;  %v4340_v12 = vsel %vm9693_vm15, %v4335_v58, %v4339_v36  ;;  %v1684_v14 = vcombine.high %v852_v45, %v852_v45  ;;  %v1691_v46 = vrot.slane %v852_v45, %v9369_v48  ;;  %v1735_v35 = vcombine.high %v855_v7, %v855_v7 }
 0x21c   :  { %v7891_v41 = vcombine.low %v4326_v25, %v4340_v12  ;;  %v1732_v57 = vrot.slane %v1718_v20, %v9369_v48  ;;  %v1733_v50 = vcombine.high %v1725_v61, %v1725_v61  ;;  %v7781_v56 = vrot.slane %v1725_v61, 9 }
 0x21d   :  { %v1698_v30 = vrot.slane %v1684_v14, %v9369_v48  ;;  %v1699_v33 = vcombine.high %v1691_v46, %v1691_v46  ;;  %v7773_v47 = vrot.slane %v1691_v46, 9  ;;  %v1742_v55 = vrot.slane %v855_v7, %v9369_v48 }
 0x21e   :  { %8507 = vmatprep.mubr.msk.bf16.mxu0 %vm280_vm0, %v7891_v41  ;;  %v1734_v4 = vcombine.high %v1732_v57, %v1732_v57  ;;  %v7782_v11 = vrot.slane %v1733_v50, 9  ;;  %v7783_v28 = vrot.slane %v1732_v57, 9  ;;  %v3232_v13 = vmax.f32 %v1725_v61, %v7781_v56 }
 0x21f   :  { %v1700_v25 = vcombine.high %v1698_v30, %v1698_v30  ;;  %v7774_v32 = vrot.slane %v1699_v33, 9  ;;  %v7775_v42 = vrot.slane %v1698_v30, 9  ;;  %v3224_v62 = vmax.f32 %v1691_v46, %v7773_v47 }
 0x220   :  { %v7784_v40 = vrot.slane %v1734_v4, 9  ;;  %v3233_v43 = vmax.f32 %v1733_v50, %v7782_v11  ;;  %v3234_v36 = vmax.f32 %v1732_v57, %v7783_v28  ;;  %v1749_v21 = vrot.slane %v1735_v35, %v9369_v48 }
 0x221   :  { %v7776_v53 = vrot.slane %v1700_v25, 9  ;;  %v3225_v23 = vmax.f32 %v1699_v33, %v7774_v32  ;;  %v3226_v1 = vmax.f32 %v1698_v30, %v7775_v42  ;;  %v3392_v8 = vmax.f32 %v3224_v62, %v3232_v13  ;;  %v4823_v32 = vld [vmem:[#allocation2 + $0x38] sm:$0x1e] }
 0x222   :  { %v3235_v19 = vmax.f32 %v1734_v4, %v7784_v40  ;;  %v1750_v0 = vcombine.high %v1742_v55, %v1742_v55  ;;  %v7785_v38 = vrot.slane %v1742_v55, 9  ;;  %v1751_v39 = vcombine.high %v1749_v21, %v1749_v21 }
 0x223   :  { %v3227_v10 = vmax.f32 %v1700_v25, %v7776_v53  ;;  %v3393_v58 = vmax.f32 %v3225_v23, %v3233_v43  ;;  %v3394_v45 = vmax.f32 %v3226_v1, %v3234_v36  ;;  %v3544_v17 = vpack.c.bf16 %v3392_v8, %v3392_v8 }
 0x224   :  { %v7786_v20 = vrot.slane %v1750_v0, 9  ;;  %v7787_v61 = vrot.slane %v1749_v21, 9  ;;  %v3236_v12 = vmax.f32 %v1742_v55, %v7785_v38  ;;  %v7788_v57 = vrot.slane %v1751_v39, 9 }
 0x225   :  { %v3395_v14 = vmax.f32 %v3227_v10, %v3235_v19  ;;  %v3545_v46 = vpack.c.bf16 %v3393_v58, %v3393_v58  ;;  %v3546_v7 = vpack.c.bf16 %v3394_v45, %v3394_v45  ;;  %v3800_v41 = vunpack.c.l.b16 %v3544_v17 }
 0x226   :  { %v3237_v50 = vmax.f32 %v1750_v0, %v7786_v20  ;;  %v3238_v56 = vmax.f32 %v1749_v21, %v7787_v61  ;;  %v1701_v30 = vcombine.high %v853_v59, %v853_v59  ;;  %v3239_v11 = vmax.f32 %v1751_v39, %v7788_v57 }
 0x227   :  { %v3547_v33 = vpack.c.bf16 %v3395_v14, %v3395_v14  ;;  %v3801_v47 = vunpack.c.l.b16 %v3545_v46  ;;  %v3802_v35 = vunpack.c.l.b16 %v3546_v7  ;;  %v3989_v4 = vrot.slane %v3800_v41, 7 }
 0x228   :  { %v1708_v28 = vrot.slane %v853_v59, %v9369_v48  ;;  %v1715_v13 = vrot.slane %v1701_v30, %v9369_v48  ;;  %v794_v25 = vadd.f32 %v9846_v37, %v9987_v22  ;;  %v7938_v43 = vcombine.high %v9976_v27, %v9976_v27 }
 0x229   :  { %v3803_v42 = vunpack.c.l.b16 %v3547_v33  ;;  %v3990_v62 = vrot.slane %v3801_v47, 6  ;;  %v3992_v40 = vrot.slane %v3802_v35, 5  ;;  %v7939_v19 = vcombine.low %v4823_v32, %v4823_v32 }
 0x22a   :  { %v1716_v36 = vcombine.high %v1708_v28, %v1708_v28  ;;  %v1717_v55 = vcombine.high %v1715_v13, %v1715_v13  ;;  %v7777_v53 = vrot.slane %v1708_v28, 9  ;;  %v7779_v23 = vrot.slane %v1715_v13, 9 }
 0x22b   :  { %v3991_v1 = vsel %vm3842_vm1, %v3990_v62, %v3989_v4  ;;  %v3994_v8 = vrot.slane %v3803_v42, 4  ;;  %v858_v59 = vmax.f32 %v794_v25, 0.0  ;;  %v7940_v14 = vcombine.high %v4823_v32, %v4823_v32 }
 0x22c   :  { %v3993_v21 = vsel %vm3845_vm2, %v3992_v40, %v3991_v1  ;;  %v7778_v0 = vrot.slane %v1716_v36, 9  ;;  %v7780_v22 = vrot.slane %v1717_v55, 9  ;;  %v3228_v38 = vmax.f32 %v1708_v28, %v7777_v53 }
 0x22d   :  { %v3230_v10 = vmax.f32 %v1715_v13, %v7779_v23  ;;  %v3995_v58 = vsel %vm3848_vm3, %v3994_v8, %v3993_v21  ;;  %v1786_v45 = vcombine.high %v858_v59, %v858_v59  ;;  %v1793_v17 = vrot.slane %v858_v59, %v9369_v48 }
 0x22e   :  { %v3229_v39 = vmax.f32 %v1716_v36, %v7778_v0  ;;  %v3231_v20 = vmax.f32 %v1717_v55, %v7780_v22  ;;  %v3396_v61 = vmax.f32 %v3228_v38, %v3236_v12  ;;  %v7963_v35 = vrot.slane %v7937_v44, 9  ;;  %v4164_v44 = vld [vmem:[#allocation2 + $0x30] sm:$0x1f] }
 0x22f   :  { %v3398_v46 = vmax.f32 %v3230_v10, %v3238_v56  ;;  %v1800_v7 = vrot.slane %v1786_v45, %v9369_v48  ;;  %v1801_v41 = vcombine.high %v1793_v17, %v1793_v17  ;;  %v7797_v57 = vrot.slane %v1793_v17, 9  ;;  %v10036_v10 = vld [vmem:[#allocation2 + $0x38] sm:$0x1f] }
 0x230   :  { %v3397_v30 = vmax.f32 %v3229_v39, %v3237_v50  ;;  %v3399_v33 = vmax.f32 %v3231_v20, %v3239_v11  ;;  %v3548_v47 = vpack.c.bf16 %v3396_v61, %v3396_v61  ;;  %v4941_v27 = vrot.slane %v7938_v43, 5 }
 0x231   :  { %v3550_v4 = vpack.c.bf16 %v3398_v46, %v3398_v46  ;;  %v1802_v28 = vcombine.high %v1800_v7, %v1800_v7  ;;  %v7798_v13 = vrot.slane %v1801_v41, 9  ;;  %v7799_v25 = vrot.slane %v1800_v7, 9  ;;  %v4123_v46 = vld [vmem:[#allocation2 + $0x70] sm:$0x1f] }
 0x232   :  { %v3549_v42 = vpack.c.bf16 %v3397_v30, %v3397_v30  ;;  %v3551_v62 = vpack.c.bf16 %v3399_v33, %v3399_v33  ;;  %v3804_v12 = vunpack.c.l.b16 %v3548_v47  ;;  %v10023_v32 = vmax.f32 %v1793_v17, %v7797_v57 }
 0x233   :  { %v3806_v56 = vunpack.c.l.b16 %v3550_v4  ;;  %v7800_v40 = vrot.slane %v1802_v28, 9  ;;  %v10025_v36 = vmax.f32 %v1801_v41, %v7798_v13  ;;  %v10027_v50 = vmax.f32 %v1800_v7, %v7799_v25 }
 0x234   :  { %v3805_v11 = vunpack.c.l.b16 %v3549_v42  ;;  %v3807_v55 = vunpack.c.l.b16 %v3551_v62  ;;  %v3996_v53 = vrot.slane %v3804_v12, 3  ;;  %v7964_v8 = vrot.slane %v7939_v19, 9 }
 0x235   :  { %v4000_v23 = vrot.slane %v3806_v56, 1  ;;  %v10029_v1 = vmax.f32 %v1802_v28, %v7800_v40  ;;  %v4945_v59 = vrot.slane %v7940_v14, 5  ;;  %v4942_v22 = vsel %vm9638_vm12, %v7963_v35, %v4941_v27 }
 0x236   :  { %v3997_v21 = vsel %vm3851_vm4, %v3996_v53, %v3995_v58  ;;  %v3998_v0 = vrot.slane %v3805_v11, 2  ;;  %v721_v38 = vmul.f32 %v9835_v29, %v9773_v26  ;;  %v724_v45 = vmul.f32 %v9835_v29, %v9802_v52  ;;  %v8918_v26 = vld [vmem:[%s10819_s4 + $0x30] sm:$0xff]  }
 0x237   :  { %v4946_v43 = vsel %vm9638_vm12, %v7964_v8, %v4945_v59  ;;  %v722_v19 = vmul.f32 %v9835_v29, %v9809_v2  ;;  %v7865_v17 = vcombine.low %v4164_v44, %v4164_v44  ;;  %v7866_v61 = vcombine.high %v4164_v44, %v4164_v44  ;;  %8559 = vmatprep.subr.bf16.mxu1 %v8918_v26 }
 0x238   :  { %v3999_v58 = vsel %vm3854_vm5, %v3998_v0, %v3997_v21  ;;  %v7980_v39 = vcombine.low %v4942_v22, %v4946_v43  ;;  %v792_v20 = vadd.f32 %v9846_v37, %v721_v38  ;;  %v795_v7 = vadd.f32 %v9846_v37, %v724_v45  ;;  %8560 = vmatpush3.bf16.msra.mxu1 %v8918_v26 }
 0x239   :  { %v4001_v14 = vsel %vm3857_vm6, %v4000_v23, %v3999_v58  ;;  %v793_v52 = vadd.f32 %v9846_v37, %v722_v19  ;;  %v10054_v2 = vcombine.low %v10036_v10, %v10036_v10  ;;  %v7868_v57 = vcombine.high %v10036_v10, %v10036_v10 }
 0x23a   :  { %v4065_v29 = vpack.c.b16 %v3807_v55, %v4001_v14  ;;  %8548 = vmatmul.mubr.msk.bf16.gmra.mrb[4].mxu1 %vm280_vm0, %v7980_v39  ;;  %v856_v41 = vmax.f32 %v792_v20, 0.0  ;;  %v4342_v30 = vshrl.u32 %v7865_v17, 16  ;;  %v859_v33 = vmax.f32 %v795_v7, 0.0 }
 0x23b   :  { %v857_v47 = vmax.f32 %v793_v52, 0.0  ;;  %v4345_v35 = vshll.u32 %v7865_v17, 16  ;;  %v10059_v4 = vshll.u32 %v7866_v61, 16  ;;  %v8927_v17 = vld [vmem:[%s10819_s4 + $0x38] sm:$0xff]  }
 0x23c   :  { %v4124_v37 = vsel %vm9430_vm9, %v4065_v29, %v4123_v46  ;;  %v1752_v28 = vcombine.high %v856_v41, %v856_v41  ;;  %v1759_v13 = vrot.slane %v856_v41, %v9369_v48  ;;  %v10064_v25 = vrot.slane %v4342_v30, 4  ;;  %8561 = vmatprep.subr.bf16.mxu1 %v8927_v17 }
 0x23d   :  { %4125 = vst [vmem:[#allocation2 + $0x70] sm:$0x1f] %v4124_v37  ;;  %v1803_v42 = vcombine.high %v859_v33, %v859_v33  ;;  %v1810_v62 = vrot.slane %v859_v33, %v9369_v48  ;;  %v1769_v12 = vcombine.high %v857_v47, %v857_v47  ;;  %v1776_v56 = vrot.slane %v857_v47, %v9369_v48 }
 0x23e   :  { %v1766_v40 = vrot.slane %v1752_v28, %v9369_v48  ;;  %v1767_v11 = vcombine.high %v1759_v13, %v1759_v13  ;;  %v7789_v55 = vrot.slane %v1759_v13, 9  ;;  %v4347_v53 = vrot.slane %v4345_v35, 5  ;;  %8562 = vmatpush3.bf16.msra.mxu1 %v8927_v17 }
 0x23f   :  { %v1817_v27 = vrot.slane %v1803_v42, %v9369_v48  ;;  %v1818_v44 = vcombine.high %v1810_v62, %v1810_v62  ;;  %v7801_v23 = vrot.slane %v1810_v62, 9  ;;  %v1783_v8 = vrot.slane %v1769_v12, %v9369_v48 }
 0x240   :  { %v1768_v59 = vcombine.high %v1766_v40, %v1766_v40  ;;  %v7790_v21 = vrot.slane %v1767_v11, 9  ;;  %v7791_v0 = vrot.slane %v1766_v40, 9  ;;  %v3240_v22 = vmax.f32 %v1759_v13, %v7789_v55 }
 0x241   :  { %v1819_v38 = vcombine.high %v1817_v27, %v1817_v27  ;;  %v7802_v43 = vrot.slane %v1818_v44, 9  ;;  %v7803_v45 = vrot.slane %v1817_v27, 9  ;;  %v3252_v19 = vmax.f32 %v1810_v62, %v7801_v23 }
 0x242   :  { %v7792_v58 = vrot.slane %v1768_v59, 9  ;;  %v3241_v39 = vmax.f32 %v1767_v11, %v7790_v21  ;;  %v3242_v20 = vmax.f32 %v1766_v40, %v7791_v0  ;;  %v3400_v61 = vmax.f32 %v3240_v22, %v10023_v32 }
 0x243   :  { %v7804_v26 = vrot.slane %v1819_v38, 9  ;;  %v3253_v14 = vmax.f32 %v1818_v44, %v7802_v43  ;;  %v3254_v46 = vmax.f32 %v1817_v27, %v7803_v45  ;;  %v1784_v7 = vcombine.high %v1776_v56, %v1776_v56  ;;  %v8937_v43 = vld [vmem:[%s10819_s4] sm:$0xff]  }
 0x244   :  { %v3243_v52 = vmax.f32 %v1768_v59, %v7792_v58  ;;  %v3401_v29 = vmax.f32 %v3241_v39, %v10025_v36  ;;  %v3402_v41 = vmax.f32 %v3242_v20, %v10027_v50  ;;  %v3552_v30 = vpack.c.bf16 %v3400_v61, %v3400_v61  ;;  %8519 = vmatprep.subr.bf16.mxu0 %v8937_v43 }
 0x245   :  { %v3255_v33 = vmax.f32 %v1819_v38, %v7804_v26  ;;  %v1785_v47 = vcombine.high %v1783_v8, %v1783_v8  ;;  %v7793_v35 = vrot.slane %v1776_v56, 9  ;;  %v7794_v37 = vrot.slane %v1784_v7, 9  ;;  %8520 = vmatpush3.bf16.msra.mxu0 %v8937_v43 }
 0x246   :  { %v3403_v28 = vmax.f32 %v3243_v52, %v10029_v1  ;;  %v3553_v13 = vpack.c.bf16 %v3401_v29, %v3401_v29  ;;  %v3554_v32 = vpack.c.bf16 %v3402_v41, %v3402_v41  ;;  %v3808_v42 = vunpack.c.l.b16 %v3552_v30 }
 0x247   :  { %v7795_v62 = vrot.slane %v1783_v8, 9  ;;  %v7796_v12 = vrot.slane %v1785_v47, 9  ;;  %v3244_v40 = vmax.f32 %v1776_v56, %v7793_v35  ;;  %v3245_v11 = vmax.f32 %v1784_v7, %v7794_v37 }
 0x248   :  { %v3555_v55 = vpack.c.bf16 %v3403_v28, %v3403_v28  ;;  %v3809_v27 = vunpack.c.l.b16 %v3553_v13  ;;  %v3810_v36 = vunpack.c.l.b16 %v3554_v32  ;;  %v4002_v44 = vrot.slane %v3808_v42, 7  ;;  %v10102_v13 = vld [vmem:[%s10817_s2] ss:$0 sm:$0xff] }
 0x249   :  { %v3246_v50 = vmax.f32 %v1783_v8, %v7795_v62  ;;  %v3247_v23 = vmax.f32 %v1785_v47, %v7796_v12  ;;  %v3404_v59 = vmax.f32 %v3244_v40, %v3252_v19  ;;  %v3405_v21 = vmax.f32 %v3245_v11, %v3253_v14  ;;  %v8939_v8 = vld [vmem:[%s10819_s4 + $0x40] sm:$0xff]   ;;  %v8942_v19 = vld [vmem:[%s10819_s4 + $0x8] sm:$0xff]  }
 0x24a   :  { %v3811_v0 = vunpack.c.l.b16 %v3555_v55  ;;  %v4003_v22 = vrot.slane %v3809_v27, 6  ;;  %v4005_v38 = vrot.slane %v3810_v36, 5  ;;  %v4348_v1 = vor.u32 %v4347_v53, %v10064_v25  ;;  %8579 = vmatprep.subr.bf16.mxu1 %v8939_v8  ;;  %8521 = vmatprep.subr.bf16.mxu0 %v8942_v19  ;;  %v10118_v55 = vld [vmem:[#allocation2 + $0x50] sm:$0x1e]  ;;  %v4126_v36 = vld [vmem:[#allocation2 + $0x78] sm:$0x1f] }
 0x24b   :  { %v3406_v45 = vmax.f32 %v3246_v50, %v3254_v46  ;;  %v3407_v56 = vmax.f32 %v3247_v23, %v3255_v33  ;;  %v3556_v17 = vpack.c.bf16 %v3404_v59, %v3404_v59  ;;  %v3557_v58 = vpack.c.bf16 %v3405_v21, %v3405_v21  ;;  %8522 = vmatpush3.bf16.msra.mxu0 %v8942_v19 }
 0x24c   :  { %v4004_v39 = vsel %vm3842_vm1, %v4003_v22, %v4002_v44  ;;  %v4007_v20 = vrot.slane %v3811_v0, 4  ;;  %v4349_v25 = vrot.slane %v4348_v1, 4  ;;  %v4353_v53 = vrot.slane %v10059_v4, 5 }
 0x24d   :  { %v4006_v61 = vsel %vm3845_vm2, %v4005_v38, %v4004_v39  ;;  %v3558_v26 = vpack.c.bf16 %v3406_v45, %v3406_v45  ;;  %v3559_v14 = vpack.c.bf16 %v3407_v56, %v3407_v56  ;;  %v3812_v46 = vunpack.c.l.b16 %v3556_v17 }
 0x24e   :  { %v3813_v7 = vunpack.c.l.b16 %v3557_v58  ;;  %v4008_v52 = vsel %vm3848_vm3, %v4007_v20, %v4006_v61  ;;  %v4354_v29 = vsel %vm9693_vm15, %v4349_v25, %v4353_v53  ;;  %v4356_v41 = vshrl.u32 %v10054_v2, 16 }
 0x24f   :  { %v3814_v30 = vunpack.c.l.b16 %v3558_v26  ;;  %v3815_v33 = vunpack.c.l.b16 %v3559_v14  ;;  %v4009_v4 = vrot.slane %v3812_v46, 3  ;;  %v4359_v47 = vshll.u32 %v10054_v2, 16 }
 0x250   :  { %v4011_v35 = vrot.slane %v3813_v7, 2  ;;  %v4358_v37 = vrot.slane %v4356_v41, 4  ;;  %v4365_v28 = vshll.u32 %v7868_v57, 16  ;;  %v727_v32 = vmul.f32 %v10102_v13, %v9853_v31  ;;  %v10113_v57 = vld [vmem:[%s10818_s3] ss:$0 sm:$0xff] }
 0x251   :  { %v4010_v42 = vsel %vm3851_vm4, %v4009_v4, %v4008_v52  ;;  %v4013_v62 = vrot.slane %v3814_v30, 1  ;;  %v4361_v12 = vrot.slane %v4359_v47, 5  ;;  %v725_v2 = vmul.f32 %v10102_v13, %v9870_v5 }
 0x252   :  { %v4012_v40 = vsel %vm3854_vm5, %v4011_v35, %v4010_v42  ;;  %v4367_v10 = vrot.slane %v4365_v28, 5  ;;  %v798_v11 = vadd.f32 %v10113_v57, %v727_v32  ;;  %v728_v31 = vmul.f32 %v10102_v13, %v9877_v63 }
 0x253   :  { %v4014_v27 = vsel %vm3857_vm6, %v4013_v62, %v4012_v40  ;;  %v4362_v5 = vor.u32 %v4361_v12, %v4358_v37  ;;  %v796_v44 = vadd.f32 %v10113_v57, %v725_v2  ;;  %v726_v50 = vmul.f32 %v10102_v13, %v9880_v34 }
 0x254   :  { %v4066_v23 = vpack.c.b16 %v3815_v33, %v4014_v27  ;;  %v862_v59 = vmax.f32 %v798_v11, 0.0  ;;  %v799_v21 = vadd.f32 %v10113_v57, %v728_v31  ;;  %v10127_v0 = vmul.f32 %v10102_v13, %v9884_v51 }
 0x255   :  { %v4363_v63 = vrot.slane %v4362_v5, 4  ;;  %v860_v22 = vmax.f32 %v796_v44, 0.0  ;;  %v797_v38 = vadd.f32 %v10113_v57, %v726_v50  ;;  %v7941_v1 = vcombine.low %v10118_v55, %v10118_v55 }
 0x256   :  { %v4127_v43 = vsel %vm9430_vm9, %v4066_v23, %v4126_v36  ;;  %v1854_v45 = vcombine.high %v862_v59, %v862_v59  ;;  %v1861_v34 = vrot.slane %v862_v59, %v9369_v48  ;;  %v863_v56 = vmax.f32 %v799_v21, 0.0 }
 0x257   :  { %4128 = vst [vmem:[#allocation2 + $0x78] sm:$0x1f] %v4127_v43  ;;  %v4368_v17 = vsel %vm9693_vm15, %v4363_v63, %v4367_v10  ;;  %v1820_v51 = vcombine.high %v860_v22, %v860_v22  ;;  %v1827_v58 = vrot.slane %v860_v22, %v9369_v48  ;;  %v861_v8 = vmax.f32 %v797_v38, 0.0 }
 0x258   :  { %v7892_v19 = vcombine.low %v4354_v29, %v4368_v17  ;;  %v1868_v39 = vrot.slane %v1854_v45, %v9369_v48  ;;  %v1869_v20 = vcombine.high %v1861_v34, %v1861_v34  ;;  %v7813_v25 = vrot.slane %v1861_v34, 9 }
 0x259   :  { %v1834_v53 = vrot.slane %v1820_v51, %v9369_v48  ;;  %v1835_v61 = vcombine.high %v1827_v58, %v1827_v58  ;;  %v7805_v26 = vrot.slane %v1827_v58, 9  ;;  %v1871_v14 = vcombine.high %v863_v56, %v863_v56 }
 0x25a   :  { %8508 = vmatmul.mubr.msk.bf16.gmra.mrb[68].mxu0 %vm280_vm0, %v7892_v19  ;;  %v1870_v46 = vcombine.high %v1868_v39, %v1868_v39  ;;  %v7814_v7 = vrot.slane %v1869_v20, 9  ;;  %v7815_v52 = vrot.slane %v1868_v39, 9  ;;  %v3264_v41 = vmax.f32 %v1861_v34, %v7813_v25 }
 0x25b   :  { %v1836_v30 = vcombine.high %v1834_v53, %v1834_v53  ;;  %v7806_v33 = vrot.slane %v1835_v61, 9  ;;  %v7807_v4 = vrot.slane %v1834_v53, 9  ;;  %v3256_v47 = vmax.f32 %v1827_v58, %v7805_v26 }
 0x25c   :  { %v7816_v29 = vrot.slane %v1870_v46, 9  ;;  %v3265_v35 = vmax.f32 %v1869_v20, %v7814_v7  ;;  %v3266_v37 = vmax.f32 %v1868_v39, %v7815_v52  ;;  %v1878_v28 = vrot.slane %v863_v56, %v9369_v48 }
 0x25d   :  { %v7808_v32 = vrot.slane %v1836_v30, 9  ;;  %v3257_v42 = vmax.f32 %v1835_v61, %v7806_v33  ;;  %v3258_v62 = vmax.f32 %v1834_v53, %v7807_v4  ;;  %v3408_v12 = vmax.f32 %v3256_v47, %v3264_v41  ;;  %v4825_v61 = vld [vmem:[#allocation2 + $0x58] sm:$0x1e] }
 0x25e   :  { %v3267_v2 = vmax.f32 %v1870_v46, %v7816_v29  ;;  %v1885_v40 = vrot.slane %v1871_v14, %v9369_v48  ;;  %v1886_v10 = vcombine.high %v1878_v28, %v1878_v28  ;;  %v7817_v11 = vrot.slane %v1878_v28, 9 }
 0x25f   :  { %v3259_v31 = vmax.f32 %v1836_v30, %v7808_v32  ;;  %v3409_v27 = vmax.f32 %v3257_v42, %v3265_v35  ;;  %v3410_v36 = vmax.f32 %v3258_v62, %v3266_v37  ;;  %v3560_v5 = vpack.c.bf16 %v3408_v12, %v3408_v12 }
 0x260   :  { %v1887_v44 = vcombine.high %v1885_v40, %v1885_v40  ;;  %v7818_v50 = vrot.slane %v1886_v10, 9  ;;  %v7819_v23 = vrot.slane %v1885_v40, 9  ;;  %v3268_v59 = vmax.f32 %v1878_v28, %v7817_v11 }
 0x261   :  { %v3411_v21 = vmax.f32 %v3259_v31, %v3267_v2  ;;  %v3561_v63 = vpack.c.bf16 %v3409_v27, %v3409_v27  ;;  %v3562_v22 = vpack.c.bf16 %v3410_v36, %v3410_v36  ;;  %v3816_v38 = vunpack.c.l.b16 %v3560_v5 }
 0x262   :  { %v7820_v43 = vrot.slane %v1887_v44, 9  ;;  %v3269_v45 = vmax.f32 %v1886_v10, %v7818_v50  ;;  %v3270_v34 = vmax.f32 %v1885_v40, %v7819_v23  ;;  %v1837_v56 = vcombine.high %v861_v8, %v861_v8 }
 0x263   :  { %v3563_v17 = vpack.c.bf16 %v3411_v21, %v3411_v21  ;;  %v3817_v51 = vunpack.c.l.b16 %v3561_v63  ;;  %v3818_v58 = vunpack.c.l.b16 %v3562_v22  ;;  %v4015_v19 = vrot.slane %v3816_v38, 7 }
 0x264   :  { %v3271_v39 = vmax.f32 %v1887_v44, %v7820_v43  ;;  %v1844_v20 = vrot.slane %v861_v8, %v9369_v48  ;;  %v1851_v25 = vrot.slane %v1837_v56, %v9369_v48  ;;  %v802_v53 = vadd.f32 %v10113_v57, %v10127_v0 }
 0x265   :  { %v3819_v26 = vunpack.c.l.b16 %v3563_v17  ;;  %v4016_v14 = vrot.slane %v3817_v51, 6  ;;  %v4018_v46 = vrot.slane %v3818_v58, 5  ;;  %v7942_v7 = vcombine.high %v10118_v55, %v10118_v55 }
 0x266   :  { %v1852_v52 = vcombine.high %v1844_v20, %v1844_v20  ;;  %v1853_v41 = vcombine.high %v1851_v25, %v1851_v25  ;;  %v7809_v30 = vrot.slane %v1844_v20, 9  ;;  %v7811_v33 = vrot.slane %v1851_v25, 9 }
 0x267   :  { %v4017_v4 = vsel %vm3842_vm1, %v4016_v14, %v4015_v19  ;;  %v4020_v47 = vrot.slane %v3819_v26, 4  ;;  %v866_v8 = vmax.f32 %v802_v53, 0.0  ;;  %v7943_v29 = vcombine.low %v4825_v61, %v4825_v61 }
 0x268   :  { %v4019_v35 = vsel %vm3845_vm2, %v4018_v46, %v4017_v4  ;;  %v7810_v37 = vrot.slane %v1852_v52, 9  ;;  %v7812_v0 = vrot.slane %v1853_v41, 9  ;;  %v3260_v28 = vmax.f32 %v1844_v20, %v7809_v30 }
 0x269   :  { %v3262_v32 = vmax.f32 %v1851_v25, %v7811_v33  ;;  %v4021_v42 = vsel %vm3848_vm3, %v4020_v47, %v4019_v35  ;;  %v1922_v62 = vcombine.high %v866_v8, %v866_v8  ;;  %v1929_v12 = vrot.slane %v866_v8, %v9369_v48  ;;  %v10170_v33 = vld [vmem:[#allocation2 + $0x58] sm:$0x1f] }
 0x26a   :  { %v3261_v2 = vmax.f32 %v1852_v52, %v7810_v37  ;;  %v3263_v40 = vmax.f32 %v1853_v41, %v7812_v0  ;;  %v3412_v10 = vmax.f32 %v3260_v28, %v3268_v59  ;;  %v7944_v11 = vcombine.high %v4825_v61, %v4825_v61  ;;  %v4129_v28 = vld [vmem:[#allocation2 + $0x80] sm:$0x1f] }
 0x26b   :  { %v3414_v31 = vmax.f32 %v3262_v32, %v3270_v34  ;;  %v1936_v27 = vrot.slane %v1922_v62, %v9369_v48  ;;  %v1937_v36 = vcombine.high %v1929_v12, %v1929_v12  ;;  %v7829_v5 = vrot.slane %v1929_v12, 9 }
 0x26c   :  { %v3413_v44 = vmax.f32 %v3261_v2, %v3269_v45  ;;  %v3415_v50 = vmax.f32 %v3263_v40, %v3271_v39  ;;  %v3564_v23 = vpack.c.bf16 %v3412_v10, %v3412_v10  ;;  %v7965_v21 = vrot.slane %v7941_v1, 9  ;;  %v4166_v1 = vld [vmem:[#allocation2 + $0x50] sm:$0x1f] }
 0x26d   :  { %v3566_v63 = vpack.c.bf16 %v3414_v31, %v3414_v31  ;;  %v1938_v22 = vcombine.high %v1936_v27, %v1936_v27  ;;  %v7830_v38 = vrot.slane %v1937_v36, 9  ;;  %v7831_v43 = vrot.slane %v1936_v27, 9 }
 0x26e   :  { %v3565_v56 = vpack.c.bf16 %v3413_v44, %v3413_v44  ;;  %v3567_v17 = vpack.c.bf16 %v3415_v50, %v3415_v50  ;;  %v3820_v59 = vunpack.c.l.b16 %v3564_v23  ;;  %v10157_v51 = vmax.f32 %v1929_v12, %v7829_v5 }
 0x26f   :  { %v3822_v34 = vunpack.c.l.b16 %v3566_v63  ;;  %v7832_v58 = vrot.slane %v1938_v22, 9  ;;  %v10159_v19 = vmax.f32 %v1937_v36, %v7830_v38  ;;  %v10161_v45 = vmax.f32 %v1936_v27, %v7831_v43 }
 0x270   :  { %v3821_v39 = vunpack.c.l.b16 %v3565_v56  ;;  %v3823_v20 = vunpack.c.l.b16 %v3567_v17  ;;  %v4022_v25 = vrot.slane %v3820_v59, 3  ;;  %v4949_v55 = vrot.slane %v7942_v7, 5 }
 0x271   :  { %v4026_v53 = vrot.slane %v3822_v34, 1  ;;  %v10163_v61 = vmax.f32 %v1938_v22, %v7832_v58  ;;  %v7966_v26 = vrot.slane %v7943_v29, 9  ;;  %v4953_v14 = vrot.slane %v7944_v11, 5 }
 0x272   :  { %v4023_v46 = vsel %vm3851_vm4, %v4022_v25, %v4021_v42  ;;  %v4024_v52 = vrot.slane %v3821_v39, 2  ;;  %v4950_v41 = vsel %vm9638_vm12, %v7965_v21, %v4949_v55  ;;  %v729_v30 = vmul.f32 %v10102_v13, %v9906_v24 }
 0x273   :  { %v4954_v7 = vsel %vm9638_vm12, %v7966_v26, %v4953_v14  ;;  %v732_v4 = vmul.f32 %v10102_v13, %v9908_v54  ;;  %v730_v47 = vmul.f32 %v10102_v13, %v9912_v49  ;;  %v7869_v8 = vcombine.low %v4166_v1, %v4166_v1 }
 0x274   :  { %v4025_v29 = vsel %vm3854_vm5, %v4024_v52, %v4023_v46  ;;  %v7981_v35 = vcombine.low %v4950_v41, %v4954_v7  ;;  %v800_v37 = vadd.f32 %v10113_v57, %v729_v30  ;;  %v7870_v0 = vcombine.high %v4166_v1, %v4166_v1 }
 0x275   :  { %v4027_v24 = vsel %vm3857_vm6, %v4026_v53, %v4025_v29  ;;  %v803_v32 = vadd.f32 %v10113_v57, %v732_v4  ;;  %v801_v42 = vadd.f32 %v10113_v57, %v730_v47  ;;  %v10185_v54 = vcombine.low %v10170_v33, %v10170_v33 }
 0x276   :  { %v4067_v62 = vpack.c.b16 %v3823_v20, %v4027_v24  ;;  %8551 = vmatprep.mubr.msk.bf16.mxu1 %vm280_vm0, %v7981_v35  ;;  %v864_v49 = vmax.f32 %v800_v37, 0.0  ;;  %v7872_v12 = vcombine.high %v10170_v33, %v10170_v33  ;;  %v4370_v2 = vshrl.u32 %v7869_v8, 16 }
 0x277   :  { %v867_v40 = vmax.f32 %v803_v32, 0.0  ;;  %v865_v10 = vmax.f32 %v801_v42, 0.0  ;;  %v4373_v11 = vshll.u32 %v7869_v8, 16  ;;  %v10190_v31 = vshll.u32 %v7870_v0, 16 }
 0x278   :  { %v4130_v27 = vsel %vm9430_vm9, %v4067_v62, %v4129_v28  ;;  %v1888_v36 = vcombine.high %v864_v49, %v864_v49  ;;  %v1895_v5 = vrot.slane %v864_v49, %v9369_v48  ;;  %v10195_v44 = vrot.slane %v4370_v2, 4 }
 0x279   :  { %4131 = vst [vmem:[#allocation2 + $0x80] sm:$0x1f] %v4130_v27  ;;  %v1939_v50 = vcombine.high %v867_v40, %v867_v40  ;;  %v1946_v23 = vrot.slane %v867_v40, %v9369_v48  ;;  %v1905_v21 = vcombine.high %v865_v10, %v865_v10  ;;  %v1912_v63 = vrot.slane %v865_v10, %v9369_v48 }
 0x27a   :  { %v1902_v22 = vrot.slane %v1888_v36, %v9369_v48  ;;  %v1903_v38 = vcombine.high %v1895_v5, %v1895_v5  ;;  %v7821_v43 = vrot.slane %v1895_v5, 9  ;;  %v4375_v56 = vrot.slane %v4373_v11, 5 }
 0x27b   :  { %v1953_v17 = vrot.slane %v1939_v50, %v9369_v48  ;;  %v1954_v59 = vcombine.high %v1946_v23, %v1946_v23  ;;  %v7833_v34 = vrot.slane %v1946_v23, 9  ;;  %v1919_v58 = vrot.slane %v1905_v21, %v9369_v48 }
 0x27c   :  { %v1904_v39 = vcombine.high %v1902_v22, %v1902_v22  ;;  %v7822_v20 = vrot.slane %v1903_v38, 9  ;;  %v7823_v25 = vrot.slane %v1902_v22, 9  ;;  %v3272_v55 = vmax.f32 %v1895_v5, %v7821_v43 }
 0x27d   :  { %v1955_v1 = vcombine.high %v1953_v17, %v1953_v17  ;;  %v7834_v53 = vrot.slane %v1954_v59, 9  ;;  %v7835_v26 = vrot.slane %v1953_v17, 9  ;;  %v3284_v14 = vmax.f32 %v1946_v23, %v7833_v34 }
 0x27e   :  { %v7824_v46 = vrot.slane %v1904_v39, 9  ;;  %v3273_v52 = vmax.f32 %v1903_v38, %v7822_v20  ;;  %v3274_v41 = vmax.f32 %v1902_v22, %v7823_v25  ;;  %v3416_v30 = vmax.f32 %v3272_v55, %v10157_v51 }
 0x27f   :  { %v7836_v7 = vrot.slane %v1955_v1, 9  ;;  %v3285_v4 = vmax.f32 %v1954_v59, %v7834_v53  ;;  %v3286_v47 = vmax.f32 %v1953_v17, %v7835_v26  ;;  %v1920_v8 = vcombine.high %v1912_v63, %v1912_v63 }
 0x280   :  { %v3275_v29 = vmax.f32 %v1904_v39, %v7824_v46  ;;  %v3417_v35 = vmax.f32 %v3273_v52, %v10159_v19  ;;  %v3418_v37 = vmax.f32 %v3274_v41, %v10161_v45  ;;  %v3568_v0 = vpack.c.bf16 %v3416_v30, %v3416_v30 }
 0x281   :  { %v3287_v24 = vmax.f32 %v1955_v1, %v7836_v7  ;;  %v1921_v28 = vcombine.high %v1919_v58, %v1919_v58  ;;  %v7825_v32 = vrot.slane %v1912_v63, 9  ;;  %v7826_v42 = vrot.slane %v1920_v8, 9 }
 0x282   :  { %v3419_v62 = vmax.f32 %v3275_v29, %v10163_v61  ;;  %v3569_v49 = vpack.c.bf16 %v3417_v35, %v3417_v35  ;;  %v3570_v2 = vpack.c.bf16 %v3418_v37, %v3418_v37  ;;  %v3824_v40 = vunpack.c.l.b16 %v3568_v0 }
 0x283   :  { %v7827_v51 = vrot.slane %v1919_v58, 9  ;;  %v7828_v10 = vrot.slane %v1921_v28, 9  ;;  %v3276_v11 = vmax.f32 %v1912_v63, %v7825_v32  ;;  %v3277_v27 = vmax.f32 %v1920_v8, %v7826_v42 }
 0x284   :  { %v3571_v36 = vpack.c.bf16 %v3419_v62, %v3419_v62  ;;  %v3825_v5 = vunpack.c.l.b16 %v3569_v49  ;;  %v3826_v50 = vunpack.c.l.b16 %v3570_v2  ;;  %v4028_v19 = vrot.slane %v3824_v40, 7 }
 0x285   :  { %v3278_v23 = vmax.f32 %v1919_v58, %v7827_v51  ;;  %v3279_v45 = vmax.f32 %v1921_v28, %v7828_v10  ;;  %v3420_v21 = vmax.f32 %v3276_v11, %v3284_v14  ;;  %v3421_v22 = vmax.f32 %v3277_v27, %v3285_v4  ;;  %v10223_v28 = vld [vmem:[#allocation2 + $0x60] sm:$0x1e] }
 0x286   :  { %v3827_v38 = vunpack.c.l.b16 %v3571_v36  ;;  %v4029_v43 = vrot.slane %v3825_v5, 6  ;;  %v4031_v17 = vrot.slane %v3826_v50, 5  ;;  %v4376_v61 = vor.u32 %v4375_v56, %v10195_v44 }
 0x287   :  { %v3422_v59 = vmax.f32 %v3278_v23, %v3286_v47  ;;  %v3423_v34 = vmax.f32 %v3279_v45, %v3287_v24  ;;  %v3572_v39 = vpack.c.bf16 %v3420_v21, %v3420_v21  ;;  %v3573_v20 = vpack.c.bf16 %v3421_v22, %v3421_v22 }
 0x288   :  { %v4030_v63 = vsel %vm3842_vm1, %v4029_v43, %v4028_v19  ;;  %v4033_v25 = vrot.slane %v3827_v38, 4  ;;  %v4377_v55 = vrot.slane %v4376_v61, 4  ;;  %v4381_v1 = vrot.slane %v10190_v31, 5 }
 0x289   :  { %v4032_v58 = vsel %vm3845_vm2, %v4031_v17, %v4030_v63  ;;  %v3574_v53 = vpack.c.bf16 %v3422_v59, %v3422_v59  ;;  %v3575_v26 = vpack.c.bf16 %v3423_v34, %v3423_v34  ;;  %v3828_v14 = vunpack.c.l.b16 %v3572_v39 }
 0x28a   :  { %v3829_v46 = vunpack.c.l.b16 %v3573_v20  ;;  %v4034_v52 = vsel %vm3848_vm3, %v4033_v25, %v4032_v58  ;;  %v4382_v44 = vsel %vm9693_vm15, %v4377_v55, %v4381_v1  ;;  %v4384_v56 = vshrl.u32 %v10185_v54, 16 }
 0x28b   :  { %v3830_v41 = vunpack.c.l.b16 %v3574_v53  ;;  %v3831_v30 = vunpack.c.l.b16 %v3575_v26  ;;  %v4035_v7 = vrot.slane %v3828_v14, 3  ;;  %v4387_v4 = vshll.u32 %v10185_v54, 16 }
 0x28c   :  { %v4037_v47 = vrot.slane %v3829_v46, 2  ;;  %v4386_v31 = vrot.slane %v4384_v56, 4  ;;  %v4393_v8 = vshll.u32 %v7872_v12, 16  ;;  %v735_v29 = vmul.f32 %v10102_v13, %v9978_v15  ;;  %v4132_v15 = vld [vmem:[#allocation2 + $0x88] sm:$0x1f] }
 0x28d   :  { %v4036_v35 = vsel %vm3851_vm4, %v4035_v7, %v4034_v52  ;;  %v4039_v37 = vrot.slane %v3830_v41, 1  ;;  %v4389_v0 = vrot.slane %v4387_v4, 5  ;;  %v733_v24 = vmul.f32 %v10102_v13, %v9995_v60 }
 0x28e   :  { %v4038_v54 = vsel %vm3854_vm5, %v4037_v47, %v4036_v35  ;;  %v4395_v32 = vrot.slane %v4393_v8, 5  ;;  %v806_v42 = vadd.f32 %v10113_v57, %v735_v29  ;;  %v736_v33 = vmul.f32 %v10102_v13, %v10002_v16 }
 0x28f   :  { %v4040_v12 = vsel %vm3857_vm6, %v4039_v37, %v4038_v54  ;;  %v4390_v62 = vor.u32 %v4389_v0, %v4386_v31  ;;  %v804_v49 = vadd.f32 %v10113_v57, %v733_v24  ;;  %v734_v2 = vmul.f32 %v10102_v13, %v10005_v6 }
 0x290   :  { %v4068_v60 = vpack.c.b16 %v3831_v30, %v4040_v12  ;;  %v870_v40 = vmax.f32 %v806_v42, 0.0  ;;  %v807_v51 = vadd.f32 %v10113_v57, %v736_v33  ;;  %v7945_v10 = vcombine.low %v10223_v28, %v10223_v28 }
 0x291   :  { %v4391_v11 = vrot.slane %v4390_v62, 4  ;;  %v868_v27 = vmax.f32 %v804_v49, 0.0  ;;  %v805_v16 = vadd.f32 %v10113_v57, %v734_v2  ;;  %v7946_v36 = vcombine.high %v10223_v28, %v10223_v28  ;;  %v4827_v62 = vld [vmem:[#allocation2 + $0x68] sm:$0x1e] }
 0x292   :  { %v4133_v5 = vsel %vm9430_vm9, %v4068_v60, %v4132_v15  ;;  %v1990_v50 = vcombine.high %v870_v40, %v870_v40  ;;  %v1997_v6 = vrot.slane %v870_v40, %v9369_v48  ;;  %v871_v13 = vmax.f32 %v807_v51, 0.0 }
 0x293   :  { %4134 = vst [vmem:[#allocation2 + $0x88] sm:$0x1f] %v4133_v5  ;;  %v4396_v19 = vsel %vm9693_vm15, %v4391_v11, %v4395_v32  ;;  %v1956_v23 = vcombine.high %v868_v27, %v868_v27  ;;  %v1963_v45 = vrot.slane %v868_v27, %v9369_v48  ;;  %v869_v21 = vmax.f32 %v805_v16, 0.0 }
 0x294   :  { %v7893_v22 = vcombine.low %v4382_v44, %v4396_v19  ;;  %v2004_v57 = vrot.slane %v1990_v50, %v9369_v48  ;;  %v2005_v38 = vcombine.high %v1997_v6, %v1997_v6  ;;  %v7845_v43 = vrot.slane %v1997_v6, 9 }
 0x295   :  { %v1970_v17 = vrot.slane %v1956_v23, %v9369_v48  ;;  %v1971_v61 = vcombine.high %v1963_v45, %v1963_v45  ;;  %v7837_v59 = vrot.slane %v1963_v45, 9  ;;  %v2007_v34 = vcombine.high %v871_v13, %v871_v13 }
 0x296   :  { %8511 = vmatprep.mubr.msk.bf16.mxu0 %vm280_vm0, %v7893_v22  ;;  %v2006_v39 = vcombine.high %v2004_v57, %v2004_v57  ;;  %v7846_v20 = vrot.slane %v2005_v38, 9  ;;  %v7847_v63 = vrot.slane %v2004_v57, 9  ;;  %v3296_v25 = vmax.f32 %v1997_v6, %v7845_v43 }
 0x297   :  { %v1972_v55 = vcombine.high %v1970_v17, %v1970_v17  ;;  %v7838_v1 = vrot.slane %v1971_v61, 9  ;;  %v7839_v58 = vrot.slane %v1970_v17, 9  ;;  %v3288_v53 = vmax.f32 %v1963_v45, %v7837_v59 }
 0x298   :  { %v7848_v26 = vrot.slane %v2006_v39, 9  ;;  %v3297_v14 = vmax.f32 %v2005_v38, %v7846_v20  ;;  %v3298_v46 = vmax.f32 %v2004_v57, %v7847_v63  ;;  %v2014_v52 = vrot.slane %v871_v13, %v9369_v48 }
 0x299   :  { %v7840_v44 = vrot.slane %v1972_v55, 9  ;;  %v3289_v56 = vmax.f32 %v1971_v61, %v7838_v1  ;;  %v3290_v41 = vmax.f32 %v1970_v17, %v7839_v58  ;;  %v3424_v30 = vmax.f32 %v3288_v53, %v3296_v25  ;;  %v4168_v25 = vld [vmem:[#allocation2 + $0x60] sm:$0x1f] }
 0x29a   :  { %v3299_v7 = vmax.f32 %v2006_v39, %v7848_v26  ;;  %v2021_v4 = vrot.slane %v2007_v34, %v9369_v48  ;;  %v2022_v47 = vcombine.high %v2014_v52, %v2014_v52  ;;  %v7849_v31 = vrot.slane %v2014_v52, 9 }
 0x29b   :  { %v3291_v8 = vmax.f32 %v1972_v55, %v7840_v44  ;;  %v3425_v29 = vmax.f32 %v3289_v56, %v3297_v14  ;;  %v3426_v35 = vmax.f32 %v3290_v41, %v3298_v46  ;;  %v3576_v37 = vpack.c.bf16 %v3424_v30, %v3424_v30  ;;  %v4169_v55 = vld [vmem:[#allocation2 + $0x68] sm:$0x1f] }
 0x29c   :  { %v2023_v0 = vcombine.high %v2021_v4, %v2021_v4  ;;  %v7850_v24 = vrot.slane %v2022_v47, 9  ;;  %v7851_v54 = vrot.slane %v2021_v4, 9  ;;  %v3300_v32 = vmax.f32 %v2014_v52, %v7849_v31 }
 0x29d   :  { %v3427_v42 = vmax.f32 %v3291_v8, %v3299_v7  ;;  %v3577_v33 = vpack.c.bf16 %v3425_v29, %v3425_v29  ;;  %v3578_v12 = vpack.c.bf16 %v3426_v35, %v3426_v35  ;;  %v3832_v15 = vunpack.c.l.b16 %v3576_v37 }
 0x29e   :  { %v7852_v49 = vrot.slane %v2023_v0, 9  ;;  %v3301_v2 = vmax.f32 %v2022_v47, %v7850_v24  ;;  %v3302_v60 = vmax.f32 %v2021_v4, %v7851_v54  ;;  %v1973_v40 = vcombine.high %v869_v21, %v869_v21 }
 0x29f   :  { %v3579_v51 = vpack.c.bf16 %v3427_v42, %v3427_v42  ;;  %v3833_v11 = vunpack.c.l.b16 %v3577_v33  ;;  %v3834_v27 = vunpack.c.l.b16 %v3578_v12  ;;  %v4041_v16 = vrot.slane %v3832_v15, 7 }
 0x2a0   :  { %v3303_v5 = vmax.f32 %v2023_v0, %v7852_v49  ;;  %v1980_v50 = vrot.slane %v869_v21, %v9369_v48  ;;  %v1987_v6 = vrot.slane %v1973_v40, %v9369_v48  ;;  %v7947_v13 = vcombine.low %v4827_v62, %v4827_v62 }
 0x2a1   :  { %v3835_v19 = vunpack.c.l.b16 %v3579_v51  ;;  %v4042_v23 = vrot.slane %v3833_v11, 6  ;;  %v4044_v45 = vrot.slane %v3834_v27, 5  ;;  %v7948_v22 = vcombine.high %v4827_v62, %v4827_v62 }
 0x2a2   :  { %v1988_v57 = vcombine.high %v1980_v50, %v1980_v50  ;;  %v1989_v38 = vcombine.high %v1987_v6, %v1987_v6  ;;  %v7841_v43 = vrot.slane %v1980_v50, 9  ;;  %v7843_v17 = vrot.slane %v1987_v6, 9 }
 0x2a3   :  { %v4043_v61 = vsel %vm3842_vm1, %v4042_v23, %v4041_v16  ;;  %v4046_v59 = vrot.slane %v3835_v19, 4  ;;  %v7967_v34 = vrot.slane %v7945_v10, 9  ;;  %v4957_v48 = vrot.slane %v7946_v36, 5 }
 0x2a4   :  { %v4045_v21 = vsel %vm3845_vm2, %v4044_v45, %v4043_v61  ;;  %v7842_v39 = vrot.slane %v1988_v57, 9  ;;  %v7844_v20 = vrot.slane %v1989_v38, 9  ;;  %v3292_v63 = vmax.f32 %v1980_v50, %v7841_v43 }
 0x2a5   :  { %v3294_v1 = vmax.f32 %v1987_v6, %v7843_v17  ;;  %v4047_v58 = vsel %vm3848_vm3, %v4046_v59, %v4045_v21  ;;  %v4958_v53 = vsel %vm9638_vm12, %v7967_v34, %v4957_v48  ;;  %v7968_v26 = vrot.slane %v7947_v13, 9  ;;  %v4170_v17 = vld [vmem:[#allocation2 + $0x70] sm:$0x1f] }
 0x2a6   :  { %v3293_v14 = vmax.f32 %v1988_v57, %v7842_v39  ;;  %v3295_v10 = vmax.f32 %v1989_v38, %v7844_v20  ;;  %v3428_v46 = vmax.f32 %v3292_v63, %v3300_v32  ;;  %v4961_v52 = vrot.slane %v7948_v22, 5  ;;  %v4135_v59 = vld [vmem:[#allocation2 + $0x90] sm:$0x1f]  ;;  %v4171_v39 = vld [vmem:[#allocation2 + $0x78] sm:$0x1f] }
 0x2a7   :  { %v3430_v28 = vmax.f32 %v3294_v1, %v3302_v60  ;;  %v7873_v36 = vcombine.low %v4168_v25, %v4168_v25  ;;  %v7874_v44 = vcombine.high %v4168_v25, %v4168_v25  ;;  %v7875_v56 = vcombine.low %v4169_v55, %v4169_v55  ;;  %v4829_v60 = vld [vmem:[#allocation2 + $0x78] sm:$0x1e] }
 0x2a8   :  { %v3429_v41 = vmax.f32 %v3293_v14, %v3301_v2  ;;  %v3431_v30 = vmax.f32 %v3295_v10, %v3303_v5  ;;  %v3580_v7 = vpack.c.bf16 %v3428_v46, %v3428_v46  ;;  %v4962_v4 = vsel %vm9638_vm12, %v7968_v26, %v4961_v52  ;;  %v4828_v2 = vld [vmem:[#allocation2 + $0x70] sm:$0x1e] }
 0x2a9   :  { %v3582_v47 = vpack.c.bf16 %v3430_v28, %v3430_v28  ;;  %v7982_v31 = vcombine.low %v4958_v53, %v4962_v4  ;;  %v7876_v8 = vcombine.high %v4169_v55, %v4169_v55  ;;  %v4398_v29 = vshrl.u32 %v7873_v36, 16  ;;  %v4830_v28 = vld [vmem:[#allocation2 + $0x80] sm:$0x1e] }
 0x2aa   :  { %v3581_v35 = vpack.c.bf16 %v3429_v41, %v3429_v41  ;;  %v3583_v37 = vpack.c.bf16 %v3431_v30, %v3431_v30  ;;  %v3836_v0 = vunpack.c.l.b16 %v3580_v7  ;;  %v4401_v24 = vshll.u32 %v7873_v36, 16 }
 0x2ab   :  { %v3838_v54 = vunpack.c.l.b16 %v3582_v47  ;;  %8552 = vmatmul.mubr.msk.bf16.gmra.mrb[8].mxu1 %vm280_vm0, %v7982_v31  ;;  %v4400_v32 = vrot.slane %v4398_v29, 4  ;;  %v4407_v42 = vshll.u32 %v7874_v44, 16  ;;  %v4412_v33 = vshrl.u32 %v7875_v56, 16  ;;  %v4831_v31 = vld [vmem:[#allocation2 + $0x88] sm:$0x1e] }
 0x2ac   :  { %v3837_v12 = vunpack.c.l.b16 %v3581_v35  ;;  %v3839_v15 = vunpack.c.l.b16 %v3583_v37  ;;  %v4048_v62 = vrot.slane %v3836_v0, 3  ;;  %v4403_v49 = vrot.slane %v4401_v24, 5  ;;  %v4172_v37 = vld [vmem:[#allocation2 + $0x80] sm:$0x1f] }
 0x2ad   :  { %v4052_v40 = vrot.slane %v3838_v54, 1  ;;  %v4409_v51 = vrot.slane %v4407_v42, 5  ;;  %v4414_v11 = vrot.slane %v4412_v33, 4  ;;  %v4415_v27 = vshll.u32 %v7875_v56, 16 }
 0x2ae   :  { %v4049_v16 = vsel %vm3851_vm4, %v4048_v62, %v4047_v58  ;;  %v4050_v5 = vrot.slane %v3837_v12, 2  ;;  %v4404_v50 = vor.u32 %v4403_v49, %v4400_v32  ;;  %v4421_v6 = vshll.u32 %v7876_v8, 16 }
 0x2af   :  { %v4417_v13 = vrot.slane %v4415_v27, 5  ;;  %v7949_v19 = vcombine.low %v4828_v2, %v4828_v2  ;;  %v7950_v23 = vcombine.high %v4828_v2, %v4828_v2  ;;  %v7951_v45 = vcombine.low %v4829_v60, %v4829_v60 }
 0x2b0   :  { %v4051_v22 = vsel %vm3854_vm5, %v4050_v5, %v4049_v16  ;;  %v4405_v57 = vrot.slane %v4404_v50, 4  ;;  %v4423_v38 = vrot.slane %v4421_v6, 5  ;;  %v7952_v43 = vcombine.high %v4829_v60, %v4829_v60 }
 0x2b1   :  { %v4053_v61 = vsel %vm3857_vm6, %v4052_v40, %v4051_v22  ;;  %v4418_v34 = vor.u32 %v4417_v13, %v4414_v11  ;;  %v7969_v48 = vrot.slane %v7949_v19, 9  ;;  %v4965_v21 = vrot.slane %v7950_v23, 5  ;;  %v5367_v22 = vld [vmem:[#allocation2 + $0x8] sm:$0x1f] }
 0x2b2   :  { %v4069_v20 = vpack.c.b16 %v3839_v15, %v4053_v61  ;;  %v4410_v63 = vsel %vm9693_vm15, %v4405_v57, %v4409_v51  ;;  %v7970_v25 = vrot.slane %v7951_v45, 9  ;;  %v4969_v55 = vrot.slane %v7952_v43, 5  ;;  %v4173_v15 = vld [vmem:[#allocation2 + $0x88] sm:$0x1f]  ;;  %v10289_v61 = vld [vmem:[#allocation2 + $0x10] sm:$0x1f] }
 0x2b3   :  { %v4419_v1 = vrot.slane %v4418_v34, 4  ;;  %v4966_v58 = vsel %vm9638_vm12, %v7969_v48, %v4965_v21  ;;  %v7877_v53 = vcombine.low %v4170_v17, %v4170_v17  ;;  %v7878_v26 = vcombine.high %v4170_v17, %v4170_v17  ;;  %v8932_v34 = vld [vmem:[#allocation2 + $0x8] ss:$8 sps:$4 sm:$0xff]  }
 0x2b4   :  { %v4136_v14 = vsel %vm9430_vm9, %v4069_v20, %v4135_v59  ;;  %v4970_v10 = vsel %vm9638_vm12, %v7970_v25, %v4969_v55  ;;  %v7879_v46 = vcombine.low %v4171_v39, %v4171_v39  ;;  %v7880_v52 = vcombine.high %v4171_v39, %v4171_v39 }
 0x2b5   :  { %4137 = vst [vmem:[#allocation2 + $0x90] sm:$0x1f] %v4136_v14  ;;  %v4424_v36 = vsel %vm9693_vm15, %v4419_v1, %v4423_v38  ;;  %v7983_v44 = vcombine.low %v4966_v58, %v4970_v10  ;;  %v4426_v56 = vshrl.u32 %v7877_v53, 16  ;;  %v4429_v41 = vshll.u32 %v7877_v53, 16 }
 0x2b6   :  { %v7894_v30 = vcombine.low %v4410_v63, %v4424_v36  ;;  %v4435_v7 = vshll.u32 %v7878_v26, 16  ;;  %v4440_v4 = vshrl.u32 %v7879_v46, 16  ;;  %v4443_v47 = vshll.u32 %v7879_v46, 16 }
 0x2b7   :  { %8555 = vmatprep.mubr.msk.bf16.mxu1 %vm280_vm0, %v7983_v44  ;;  %v4428_v18 = vrot.slane %v4426_v56, 4  ;;  %v4431_v8 = vrot.slane %v4429_v41, 5  ;;  %v4449_v29 = vshll.u32 %v7880_v52, 16  ;;  %v7953_v35 = vcombine.low %v4830_v28, %v4830_v28  ;;  %v8940_v41 = vld [vmem:[#allocation2 + $0x18] ss:$8 sps:$4 sm:$0xff]  }
 0x2b8   :  { %8512 = vmatmul.mubr.msk.bf16.gmra.mrb[72].mxu0 %vm280_vm0, %v7894_v30  ;;  %v4442_v0 = vrot.slane %v4440_v4, 4  ;;  %v4445_v24 = vrot.slane %v4443_v47, 5  ;;  %v7954_v54 = vcombine.high %v4830_v28, %v4830_v28  ;;  %v4437_v42 = vrot.slane %v4435_v7, 5  ;;  %v8949_v30 = vld [vmem:[%s10819_s4 + $0x48] sm:$0xff]   ;;  %v5369_v7 = vld [vmem:[#allocation2 + $0x18] sm:$0x1f] }
 0x2b9   :  { %v4432_v32 = vor.u32 %v4431_v8, %v4428_v18  ;;  %v7955_v33 = vcombine.low %v4831_v31, %v4831_v31  ;;  %v7956_v12 = vcombine.high %v4831_v31, %v4831_v31  ;;  %v7971_v49 = vrot.slane %v7953_v35, 9  ;;  %v8941_v31 = vld [vmem:[#allocation2 + $0x28] ss:$8 sps:$4 sm:$0xff]   ;;  %v5370_v8 = vld [vmem:[#allocation2 + $0x20] sm:$0x1f] }
 0x2ba   :  { %v4446_v62 = vor.u32 %v4445_v24, %v4442_v0  ;;  %v4973_v2 = vrot.slane %v7954_v54, 5  ;;  %v7881_v60 = vcombine.low %v4172_v37, %v4172_v37  ;;  %v4451_v51 = vrot.slane %v4449_v29, 5  ;;  %v8938_v0 = vld [vmem:[#allocation2] ss:$8 sps:$4 sm:$0xff]  }
 0x2bb   :  { %v4433_v40 = vrot.slane %v4432_v32, 4  ;;  %v7972_v11 = vrot.slane %v7955_v33, 9  ;;  %v4977_v27 = vrot.slane %v7956_v12, 5  ;;  %v7882_v50 = vcombine.high %v4172_v37, %v4172_v37  ;;  %v9112_v24 = vld [vmem:[%s10819_s4 + $0x40] sm:$0xff]   ;;  %v10308_v33 = vld [vmem:[#allocation2 + $0x28] sm:$0x1f] }
 0x2bc   :  { %v4447_v16 = vrot.slane %v4446_v62, 4  ;;  %v4974_v5 = vsel %vm9638_vm12, %v7971_v49, %v4973_v2  ;;  %v7883_v6 = vcombine.low %v4173_v15, %v4173_v15  ;;  %v7884_v19 = vcombine.high %v4173_v15, %v4173_v15  ;;  %v10314_v12 = vld [vmem:[%s10819_s4 + $0x50] sm:$0xff]  }
 0x2bd   :  { %v4978_v13 = vsel %vm9638_vm12, %v7972_v11, %v4977_v27  ;;  %v4454_v23 = vshrl.u32 %v7881_v60, 16  ;;  %v4457_v45 = vshll.u32 %v7881_v60, 16  ;;  %v4438_v57 = vsel %vm9693_vm15, %v4433_v40, %v4437_v42  ;;  %v10316_v62 = vld [vmem:[#allocation2 + $0x30] sm:$0x1f] }
 0x2be   :  { %v4452_v38 = vsel %vm9693_vm15, %v4447_v16, %v4451_v51  ;;  %v7984_v43 = vcombine.low %v4974_v5, %v4978_v13  ;;  %v4468_v17 = vshrl.u32 %v7883_v6, 16  ;;  %v4471_v39 = vshll.u32 %v7883_v6, 16  ;;  %v8943_v6 = vld [vmem:[#allocation2 + $0x10] ss:$8 sps:$4 sm:$0xff]  }
 0x2bf   :  { %v7895_v59 = vcombine.low %v4438_v57, %v4452_v38  ;;  %v4456_v48 = vrot.slane %v4454_v23, 4  ;;  %v4459_v21 = vrot.slane %v4457_v45, 5  ;;  %v4463_v20 = vshll.u32 %v7882_v50, 16  ;;  %v8945_v13 = vld [vmem:[#allocation2 + $0x38] ss:$8 sps:$4 sm:$0xff]  }
 0x2c0   :  { %8556 = vmatmul.mubr.msk.bf16.gmra.mrb[12].mxu1 %vm280_vm0, %v7984_v43  ;;  %v4470_v63 = vrot.slane %v4468_v17, 4  ;;  %v8017_v25 = vcombine.low %v5367_v22, %v5367_v22  ;;  %v4473_v1 = vrot.slane %v4471_v39, 5  ;;  %v4477_v58 = vshll.u32 %v7884_v19, 16  ;;  %v8946_v19 = vld [vmem:[#allocation2 + $0x58] ss:$8 sps:$4 sm:$0xff]  }
 0x2c1   :  { %8515 = vmatprep.mubr.msk.bf16.mxu0 %vm280_vm0, %v7895_v59  ;;  %8563 = vmatprep.mubr.msk.bf16.mxu1 %vm280_vm0, %v8932_v34  ;;  %v4460_v55 = vor.u32 %v4459_v21, %v4456_v48  ;;  %v8019_v53 = vcombine.low %v10289_v61, %v10289_v61  ;;  %v4465_v10 = vrot.slane %v4463_v20, 5  ;;  %v8018_v18 = vcombine.high %v5367_v22, %v5367_v22  ;;  %v10326_v17 = vld [vmem:[#allocation2 + $0x38] sm:$0x1f]  ;;  %v10331_v21 = vld [vmem:[#allocation2 + $0x40] sm:$0x1f] }
 0x2c2   :  { %v4474_v14 = vor.u32 %v4473_v1, %v4470_v63  ;;  %v5464_v46 = vshrl.u32 %v8017_v25, 16  ;;  %v5467_v52 = vshll.u32 %v8017_v25, 16  ;;  %v4479_v36 = vrot.slane %v4477_v58, 5  ;;  %v8944_v39 = vld [vmem:[#allocation2 + $0x20] ss:$8 sps:$4 sm:$0xff]  }
 0x2c3   :  { %v4461_v26 = vrot.slane %v4460_v55, 4  ;;  %v5478_v44 = vshrl.u32 %v8019_v53, 16  ;;  %v5481_v56 = vshll.u32 %v8019_v53, 16  ;;  %v8021_v42 = vcombine.low %v5369_v7, %v5369_v7 }
 0x2c4   :  { %v4475_v28 = vrot.slane %v4474_v14, 4  ;;  %v5466_v35 = vrot.slane %v5464_v46, 4  ;;  %v5469_v37 = vrot.slane %v5467_v52, 5  ;;  %v8023_v15 = vcombine.low %v5370_v8, %v5370_v8 }
 0x2c5   :  { %v4466_v4 = vsel %vm9693_vm15, %v4461_v26, %v4465_v10  ;;  %v5480_v54 = vrot.slane %v5478_v44, 4  ;;  %v5483_v32 = vrot.slane %v5481_v56, 5  ;;  %v8020_v49 = vcombine.high %v10289_v61, %v10289_v61 }
 0x2c6   :  { %v4480_v47 = vsel %vm9693_vm15, %v4475_v28, %v4479_v36  ;;  %v5473_v2 = vshll.u32 %v8018_v18, 16  ;;  %v5470_v60 = vor.u32 %v5469_v37, %v5466_v35  ;;  %v8022_v40 = vcombine.high %v5369_v7, %v5369_v7  ;;  %v10349_v35 = vld [vmem:[#allocation2 + $0x60] sm:$0x1f] }
 0x2c7   :  { %v7896_v29 = vcombine.low %v4466_v4, %v4480_v47  ;;  %v8024_v51 = vcombine.high %v5370_v8, %v5370_v8  ;;  %v8025_v11 = vcombine.low %v10308_v33, %v10308_v33  ;;  %v5484_v27 = vor.u32 %v5483_v32, %v5480_v54  ;;  %v8951_v37 = vld [vmem:[#allocation2 + $0x78] ss:$8 sps:$4 sm:$0xff]  }
 0x2c8   :  { %8564 = vmatmul.mubr.msk.bf16.vlgmr.msra.gmra.mrb[0].mxu1 %vm280_vm0, %v8940_v41  ;;  %v5492_v16 = vshrl.u32 %v8021_v42, 16  ;;  %v5495_v5 = vshll.u32 %v8021_v42, 16  ;;  %v8027_v50 = vcombine.low %v10316_v62, %v10316_v62  ;;  %v5506_v23 = vshrl.u32 %v8023_v15, 16  ;;  %v8950_v41 = vld [vmem:[#allocation2 + $0x68] ss:$8 sps:$4 sm:$0xff]  }
 0x2c9   :  { %8580 = vmatpush3.bf16.msra.mxu1 %v9112_v24  ;;  %8567 = vmatprep.mubr.msk.bf16.mxu1 %vm280_vm0, %v8941_v31  ;;  %v5509_v45 = vshll.u32 %v8023_v15, 16  ;;  %v5475_v22 = vrot.slane %v5473_v2, 5  ;;  %v5487_v57 = vshll.u32 %v8020_v49, 16  ;;  %v5471_v61 = vrot.slane %v5470_v60, 4  ;;  %v8947_v42 = vld [vmem:[#allocation2 + $0x30] ss:$8 sps:$4 sm:$0xff]  }
 0x2ca   :  { %8516 = vmatmul.mubr.msk.bf16.gmra.mrb[76].mxu0 %vm280_vm0, %v7896_v29  ;;  %8581 = vmatprep.subr.bf16.mxu1 %v8949_v30  ;;  %v5534_v38 = vshrl.u32 %v8027_v50, 16  ;;  %v5537_v43 = vshll.u32 %v8027_v50, 16  ;;  %v10329_v59 = vshll.u32 %v8022_v40, 16  ;;  %v5520_v34 = vshrl.u32 %v8025_v11, 16  ;;  %v5375_v29 = vld [vmem:[#allocation2 + $0x58] sm:$0x1f] }
 0x2cb   :  { %8523 = vmatprep.mubr.msk.bf16.mxu0 %vm280_vm0, %v8938_v0  ;;  %v5523_v48 = vshll.u32 %v8025_v11, 16  ;;  %v5485_v20 = vrot.slane %v5484_v27, 4  ;;  %v5494_v63 = vrot.slane %v5492_v16, 4  ;;  %v5497_v25 = vrot.slane %v5495_v5, 5  ;;  %v8948_v2 = vld [vmem:[#allocation2 + $0x50] ss:$8 sps:$4 sm:$0xff]  }
 0x2cc   :  { %v10334_v55 = vshll.u32 %v8024_v51, 16  ;;  %v5508_v1 = vrot.slane %v5506_v23, 4  ;;  %v5511_v58 = vrot.slane %v5509_v45, 5  ;;  %v8026_v53 = vcombine.high %v10308_v33, %v10308_v33 }
 0x2cd   :  { %8582 = vmatpush3.bf16.msra.mxu1 %v8949_v30  ;;  %v8029_v26 = vcombine.low %v10326_v17, %v10326_v17  ;;  %v8028_v14 = vcombine.high %v10316_v62, %v10316_v62  ;;  %v5536_v10 = vrot.slane %v5534_v38, 4  ;;  %v5539_v46 = vrot.slane %v5537_v43, 5  ;;  %v10364_v43 = vld [vmem:[#allocation2 + $0x70] sm:$0x1f] }
 0x2ce   :  { %8599 = vmatprep.subr.bf16.mxu1 %v10314_v12  ;;  %v8031_v52 = vcombine.low %v10331_v21, %v10331_v21  ;;  %v5522_v28 = vrot.slane %v5520_v34, 4  ;;  %v5525_v36 = vrot.slane %v5523_v48, 5  ;;  %v5489_v30 = vrot.slane %v5487_v57, 5 }
 0x2cf   :  { %v5548_v44 = vshrl.u32 %v8029_v26, 16  ;;  %v5551_v56 = vshll.u32 %v8029_v26, 16  ;;  %v5476_v47 = vsel %vm9693_vm15, %v5471_v61, %v5475_v22  ;;  %v5498_v31 = vor.u32 %v5497_v25, %v5494_v63  ;;  %v10370_v25 = vld [vmem:[#allocation2 + $0x68] sm:$0x1f] }
 0x2d0   :  { %8568 = vmatmul.mubr.msk.bf16.gmra.mrb[4].mxu1 %vm280_vm0, %v8945_v13  ;;  %v5562_v7 = vshrl.u32 %v8031_v52, 16  ;;  %v5565_v4 = vshll.u32 %v8031_v52, 16  ;;  %v5503_v18 = vrot.slane %v10329_v59, 5  ;;  %v5512_v8 = vor.u32 %v5511_v58, %v5508_v1 }
 0x2d1   :  { %8571 = vmatprep.mubr.msk.bf16.mxu1 %vm280_vm0, %v8946_v19  ;;  %v5490_v0 = vsel %vm9693_vm15, %v5485_v20, %v5489_v30  ;;  %v5517_v24 = vrot.slane %v10334_v55, 5  ;;  %v5529_v54 = vshll.u32 %v8026_v53, 16  ;;  %v5540_v32 = vor.u32 %v5539_v46, %v5536_v10  ;;  %v8952_v55 = vld [vmem:[#allocation2 + $0x60] ss:$8 sps:$4 sm:$0xff]  }
 0x2d2   :  { %8524 = vmatmul.mubr.msk.bf16.vlgmr.msra.gmra.mrb[64].mxu0 %vm280_vm0, %v8943_v6  ;;  %v5526_v33 = vor.u32 %v5525_v36, %v5522_v28  ;;  %v5543_v15 = vshll.u32 %v8028_v14, 16  ;;  %v5550_v62 = vrot.slane %v5548_v44, 4  ;;  %v5553_v49 = vrot.slane %v5551_v56, 5  ;;  %v8953_v14 = vld [vmem:[#allocation2 + $0x70] ss:$8 sps:$4 sm:$0xff]  }
 0x2d3   :  { %8527 = vmatprep.mubr.msk.bf16.mxu0 %vm280_vm0, %v8944_v39  ;;  %v5564_v60 = vrot.slane %v5562_v7, 4  ;;  %v5567_v40 = vrot.slane %v5565_v4, 5  ;;  %v8033_v51 = vcombine.low %v5375_v29, %v5375_v29  ;;  %v8035_v11 = vcombine.low %v10349_v35, %v10349_v35  ;;  %v10383_v36 = vld [vmem:[#allocation2 + $0x78] sm:$0x1f]  ;;  %v10388_v7 = vld [vmem:[#allocation2 + $0x80] sm:$0x1f] }
 0x2d4   :  { %v5499_v27 = vrot.slane %v5498_v31, 4  ;;  %v5513_v16 = vrot.slane %v5512_v8, 4  ;;  %v8030_v5 = vcombine.high %v10326_v17, %v10326_v17  ;;  %v8032_v50 = vcombine.high %v10331_v21, %v10331_v21  ;;  %v8954_v17 = vld [vmem:[#allocation2 + $0x88] ss:$8 sps:$4 sm:$0xff]  }
 0x2d5   :  { %v8053_v6 = vcombine.low %v5476_v47, %v5490_v0  ;;  %v5541_v13 = vrot.slane %v5540_v32, 4  ;;  %v5590_v19 = vshrl.u32 %v8035_v11, 16  ;;  %v5593_v23 = vshll.u32 %v8035_v11, 16  ;;  %v10404_v11 = vld [vmem:[#allocation2 + $0x88] sm:$0x1f] }
 0x2d6   :  { %v5527_v45 = vrot.slane %v5526_v33, 4  ;;  %v5531_v22 = vrot.slane %v5529_v54, 5  ;;  %v5554_v57 = vor.u32 %v5553_v49, %v5550_v62  ;;  %v8034_v38 = vcombine.high %v5375_v29, %v5375_v29 }
 0x2d7   :  { %v5545_v61 = vrot.slane %v5543_v15, 5  ;;  %v5568_v59 = vor.u32 %v5567_v40, %v5564_v60  ;;  %v5576_v34 = vshrl.u32 %v8033_v51, 16  ;;  %v5579_v48 = vshll.u32 %v8033_v51, 16  ;;  %v8977_v15 = vld [vmem:[%s10819_s4 + $0x58] sm:$0xff]  }
 0x2d8   :  { %8572 = vmatmul.mubr.msk.bf16.gmra.mrb[8].mxu1 %vm280_vm0, %v8950_v41  ;;  %v5504_v21 = vsel %vm9693_vm15, %v5499_v27, %v5503_v18  ;;  %v5518_v39 = vsel %vm9693_vm15, %v5513_v16, %v5517_v24  ;;  %v5557_v20 = vshll.u32 %v8030_v5, 16  ;;  %v5571_v63 = vshll.u32 %v8032_v50, 16 }
 0x2d9   :  { %8575 = vmatprep.mubr.msk.bf16.mxu1 %vm280_vm0, %v8951_v37  ;;  %v5546_v1 = vsel %vm9693_vm15, %v5541_v13, %v5545_v61  ;;  %v5592_v58 = vrot.slane %v5590_v19, 4  ;;  %v5595_v53 = vrot.slane %v5593_v23, 5  ;;  %v8039_v26 = vcombine.low %v10364_v43, %v10364_v43  ;;  %v8959_v13 = vld [vmem:[#allocation2 + $0x80] ss:$8 sps:$4 sm:$0xff]  }
 0x2da   :  { %8528 = vmatmul.mubr.msk.bf16.gmra.mrb[68].mxu0 %vm280_vm0, %v8947_v42  ;;  %v5532_v10 = vsel %vm9693_vm15, %v5527_v45, %v5531_v22  ;;  %v5555_v46 = vrot.slane %v5554_v57, 4  ;;  %v8036_v52 = vcombine.high %v10349_v35, %v10349_v35  ;;  %v10381_v28 = vshll.u32 %v8034_v38, 16 }
 0x2db   :  { %8531 = vmatprep.mubr.msk.bf16.mxu0 %vm280_vm0, %v8948_v2  ;;  %v5569_v44 = vrot.slane %v5568_v59, 4  ;;  %v5578_v56 = vrot.slane %v5576_v34, 4  ;;  %v5581_v41 = vrot.slane %v5579_v48, 5  ;;  %v8037_v30 = vcombine.low %v10370_v25, %v10370_v25 }
 0x2dc   :  { %v8054_v4 = vcombine.low %v5504_v21, %v5518_v39  ;;  %v8055_v47 = vcombine.low %v5532_v10, %v5546_v1  ;;  %v5559_v31 = vrot.slane %v5557_v20, 5  ;;  %v5573_v18 = vrot.slane %v5571_v63, 5 }
 0x2dd   :  { %v5596_v8 = vor.u32 %v5595_v53, %v5592_v58  ;;  %v5618_v29 = vshrl.u32 %v8039_v26, 16  ;;  %v5621_v35 = vshll.u32 %v8039_v26, 16  ;;  %v8041_v37 = vcombine.low %v10383_v36, %v10383_v36 }
 0x2de   :  { %v5560_v0 = vsel %vm9693_vm15, %v5555_v46, %v5559_v31  ;;  %v5587_v24 = vrot.slane %v10381_v28, 5  ;;  %v5599_v54 = vshll.u32 %v8036_v52, 16  ;;  %v8043_v32 = vcombine.low %v10388_v7, %v10388_v7 }
 0x2df   :  { %v5574_v42 = vsel %vm9693_vm15, %v5569_v44, %v5573_v18  ;;  %v5582_v33 = vor.u32 %v5581_v41, %v5578_v56  ;;  %v5604_v62 = vshrl.u32 %v8037_v30, 16  ;;  %v5607_v49 = vshll.u32 %v8037_v30, 16 }
 0x2e0   :  { %8576 = vmatmul.mubr.msk.bf16.gmra.mrb[12].mxu1 %vm280_vm0, %v8954_v17  ;;  %v5632_v2 = vshrl.u32 %v8041_v37, 16  ;;  %v5635_v60 = vshll.u32 %v8041_v37, 16  ;;  %v5646_v40 = vshrl.u32 %v8043_v32, 16  ;;  %v5649_v51 = vshll.u32 %v8043_v32, 16 }
 0x2e1   :  { %8583 = vmatprep.mubr.msk.bf16.mxu1 %vm280_vm0, %v8053_v6  ;;  %v5597_v27 = vrot.slane %v5596_v8, 4  ;;  %v8040_v16 = vcombine.high %v10364_v43, %v10364_v43  ;;  %v5620_v5 = vrot.slane %v5618_v29, 4  ;;  %v5623_v50 = vrot.slane %v5621_v35, 5  ;;  %v5382_v6 = vld [vmem:[#allocation2 + $0x90] sm:$0x1f] }
 0x2e2   :  { %8532 = vmatmul.mubr.msk.bf16.gmra.mrb[72].mxu0 %vm280_vm0, %v8952_v55  ;;  %v5601_v19 = vrot.slane %v5599_v54, 5  ;;  %v8038_v23 = vcombine.high %v10370_v25, %v10370_v25  ;;  %v5648_v45 = vrot.slane %v5646_v40, 4  ;;  %v5651_v22 = vrot.slane %v5649_v51, 5  ;;  %v5866_v29 = vld [vmem:[#allocation2 + $0x10] sm:$0x1e] }
 0x2e3   :  { %8535 = vmatprep.mubr.msk.bf16.mxu0 %vm280_vm0, %v8953_v14  ;;  %v5583_v57 = vrot.slane %v5582_v33, 4  ;;  %v5606_v38 = vrot.slane %v5604_v62, 4  ;;  %v5609_v61 = vrot.slane %v5607_v49, 5  ;;  %v8045_v43 = vcombine.low %v10404_v11, %v10404_v11  ;;  %v5865_v33 = vld [vmem:[#allocation2 + $0x8] sm:$0x1e] }
 0x2e4   :  { %v8044_v59 = vcombine.high %v10388_v7, %v10388_v7  ;;  %v5634_v34 = vrot.slane %v5632_v2, 4  ;;  %v5637_v48 = vrot.slane %v5635_v60, 5  ;;  %v8047_v17 = vcombine.low %v5382_v6, %v5382_v6 }
 0x2e5   :  { %v8056_v21 = vcombine.low %v5560_v0, %v5574_v42  ;;  %v5602_v39 = vsel %vm9693_vm15, %v5597_v27, %v5601_v19  ;;  %v5624_v20 = vor.u32 %v5623_v50, %v5620_v5  ;;  %v5627_v63 = vshll.u32 %v8040_v16, 16 }
 0x2e6   :  { %v8042_v25 = vcombine.high %v10383_v36, %v10383_v36  ;;  %v5652_v55 = vor.u32 %v5651_v22, %v5648_v45  ;;  %v5674_v1 = vshrl.u32 %v8047_v17, 16  ;;  %v5677_v58 = vshll.u32 %v8047_v17, 16  ;;  %v5868_v45 = vld [vmem:[#allocation2 + $0x20] sm:$0x1e] }
 0x2e7   :  { %v5588_v53 = vsel %vm9693_vm15, %v5583_v57, %v5587_v24  ;;  %v5610_v26 = vor.u32 %v5609_v61, %v5606_v38  ;;  %v5660_v14 = vshrl.u32 %v8045_v43, 16  ;;  %v5663_v10 = vshll.u32 %v8045_v43, 16  ;;  %v5870_v57 = vld [vmem:[#allocation2 + $0x30] sm:$0x1e]  ;;  %v5867_v43 = vld [vmem:[#allocation2 + $0x18] sm:$0x1e] }
 0x2e8   :  { %8584 = vmatmul.mubr.msk.bf16.vlgmr.msra.gmra.mrb[0].mxu1 %vm280_vm0, %v8054_v4  ;;  %v8057_v46 = vcombine.low %v5588_v53, %v5602_v39  ;;  %v5613_v52 = vshll.u32 %v8038_v23, 16  ;;  %v5638_v28 = vor.u32 %v5637_v48, %v5634_v34  ;;  %v5655_v44 = vshll.u32 %v8044_v59, 16 }
 0x2e9   :  { %8600 = vmatpush3.bf16.msra.mxu1 %v10314_v12  ;;  %8587 = vmatprep.mubr.msk.bf16.mxu1 %vm280_vm0, %v8055_v47  ;;  %v10421_v12 = vld [vmem:[%s10819_s4 + $0x60] sm:$0xff]   ;;  %v5625_v56 = vrot.slane %v5624_v20, 4  ;;  %v8048_v41 = vcombine.high %v5382_v6, %v5382_v6  ;;  %v5676_v30 = vrot.slane %v5674_v1, 4  ;;  %v5679_v36 = vrot.slane %v5677_v58, 5 }
 0x2ea   :  { %8536 = vmatmul.mubr.msk.bf16.gmra.mrb[76].mxu0 %vm280_vm0, %v8959_v13  ;;  %8601 = vmatprep.subr.bf16.mxu1 %v8977_v15  ;;  %v5641_v7 = vshll.u32 %v8042_v25, 16  ;;  %v5653_v4 = vrot.slane %v5652_v55, 4  ;;  %v5611_v47 = vrot.slane %v5610_v26, 4  ;;  %v5629_v31 = vrot.slane %v5627_v63, 5 }
 0x2eb   :  { %v5662_v18 = vrot.slane %v5660_v14, 4  ;;  %v5665_v8 = vrot.slane %v5663_v10, 5  ;;  %v5615_v35 = vrot.slane %v5613_v52, 5  ;;  %v5639_v37 = vrot.slane %v5638_v28, 4 }
 0x2ec   :  { %v5657_v0 = vrot.slane %v5655_v44, 5  ;;  %v5630_v24 = vsel %vm9693_vm15, %v5625_v56, %v5629_v31  ;;  %v8046_v54 = vcombine.high %v10404_v11, %v10404_v11  ;;  %v5680_v32 = vor.u32 %v5679_v36, %v5676_v30  ;;  %v5872_v56 = vld [vmem:[#allocation2 + $0x40] sm:$0x1e] }
 0x2ed   :  { %8602 = vmatpush3.bf16.msra.mxu1 %v8977_v15  ;;  %v5683_v42 = vshll.u32 %v8048_v41, 16  ;;  %v5643_v15 = vrot.slane %v5641_v7, 5  ;;  %v8073_v49 = vcombine.low %v5866_v29, %v5866_v29  ;;  %v8074_v2 = vcombine.high %v5866_v29, %v5866_v29  ;;  %v5874_v36 = vld [vmem:[#allocation2 + $0x60] sm:$0x1e]  ;;  %v5873_v29 = vld [vmem:[#allocation2 + $0x58] sm:$0x1e] }
 0x2ee   :  { %8619 = vmatprep.subr.bf16.mxu1 %v10421_v12  ;;  %v5658_v62 = vsel %vm9693_vm15, %v5653_v4, %v5657_v0  ;;  %v5616_v60 = vsel %vm9693_vm15, %v5611_v47, %v5615_v35  ;;  %v5666_v40 = vor.u32 %v5665_v8, %v5662_v18  ;;  %v8071_v16 = vcombine.low %v5865_v33, %v5865_v33  ;;  %v5871_v47 = vld [vmem:[#allocation2 + $0x38] sm:$0x1e] }
 0x2ef   :  { %v8058_v51 = vcombine.low %v5616_v60, %v5630_v24  ;;  %v5644_v27 = vsel %vm9693_vm15, %v5639_v37, %v5643_v15  ;;  %v8072_v5 = vcombine.high %v5865_v33, %v5865_v33  ;;  %v5669_v50 = vshll.u32 %v8046_v54, 16 }
 0x2f0   :  { %8588 = vmatmul.mubr.msk.bf16.gmra.mrb[4].mxu1 %vm280_vm0, %v8056_v21  ;;  %v8059_v11 = vcombine.low %v5644_v27, %v5658_v62  ;;  %v5681_v6 = vrot.slane %v5680_v32, 4  ;;  %v5685_v13 = vrot.slane %v5683_v42, 5  ;;  %v8104_v19 = vrot.slane %v8073_v49, 9  ;;  %v5869_v21 = vld [vmem:[#allocation2 + $0x28] sm:$0x1e] }
 0x2f1   :  { %8591 = vmatprep.mubr.msk.bf16.mxu1 %vm280_vm0, %v8057_v46  ;;  %v5967_v23 = vrot.slane %v8074_v2, 5  ;;  %v5667_v22 = vrot.slane %v5666_v40, 4  ;;  %v8103_v38 = vrot.slane %v8071_v16, 9  ;;  %v5963_v61 = vrot.slane %v8072_v5, 5  ;;  %v9011_v49 = vld [vmem:[%s10819_s4 + $0x68] sm:$0xff]  }
 0x2f2   :  { %v5671_v59 = vrot.slane %v5669_v50, 5  ;;  %v5686_v34 = vsel %vm9693_vm15, %v5681_v6, %v5685_v13  ;;  %v8077_v48 = vcombine.low %v5868_v45, %v5868_v45  ;;  %v8078_v17 = vcombine.high %v5868_v45, %v5868_v45  ;;  %v5876_v16 = vld [vmem:[#allocation2 + $0x70] sm:$0x1e]  ;;  %v5878_v50 = vld [vmem:[#allocation2 + $0x80] sm:$0x1e] }
 0x2f3   :  { %v5968_v39 = vsel %vm9638_vm12, %v8104_v19, %v5967_v23  ;;  %v8081_v20 = vcombine.low %v5870_v57, %v5870_v57  ;;  %v8082_v63 = vcombine.high %v5870_v57, %v5870_v57  ;;  %v8075_v55 = vcombine.low %v5867_v43, %v5867_v43  ;;  %v5875_v19 = vld [vmem:[#allocation2 + $0x68] sm:$0x1e]  ;;  %v10471_v23 = vld [vmem:[%s10819_s4 + $0x70] sm:$0xff]  }
 0x2f4   :  { %v5672_v25 = vsel %vm9693_vm15, %v5667_v22, %v5671_v59  ;;  %v8076_v1 = vcombine.high %v5867_v43, %v5867_v43  ;;  %v5964_v53 = vsel %vm9638_vm12, %v8103_v38, %v5963_v61  ;;  %v8079_v26 = vcombine.low %v5869_v21, %v5869_v21 }
 0x2f5   :  { %v8060_v58 = vcombine.low %v5672_v25, %v5686_v34  ;;  %v8080_v14 = vcombine.high %v5869_v21, %v5869_v21  ;;  %v8123_v10 = vcombine.low %v5964_v53, %v5968_v39  ;;  %v8106_v46 = vrot.slane %v8077_v48, 9  ;;  %v5880_v53 = vld [vmem:[#allocation2 + $0x90] sm:$0x1e] }
 0x2f6   :  { %v5975_v52 = vrot.slane %v8078_v17, 5  ;;  %v8108_v28 = vrot.slane %v8081_v20, 9  ;;  %v5983_v44 = vrot.slane %v8082_v63, 5  ;;  %v8105_v41 = vrot.slane %v8075_v55, 9 }
 0x2f7   :  { %v5971_v30 = vrot.slane %v8076_v1, 5  ;;  %v8107_v7 = vrot.slane %v8079_v26, 9  ;;  %v5979_v4 = vrot.slane %v8080_v14, 5  ;;  %v8085_v18 = vcombine.low %v5872_v56, %v5872_v56 }
 0x2f8   :  { %8592 = vmatmul.mubr.msk.bf16.gmra.mrb[8].mxu1 %vm280_vm0, %v8058_v51  ;;  %v5976_v31 = vsel %vm9638_vm12, %v8106_v46, %v5975_v52  ;;  %v8086_v8 = vcombine.high %v5872_v56, %v5872_v56  ;;  %v5984_v35 = vsel %vm9638_vm12, %v8108_v28, %v5983_v44  ;;  %v8089_v37 = vcombine.low %v5874_v36, %v5874_v36  ;;  %v5879_v52 = vld [vmem:[#allocation2 + $0x88] sm:$0x1e] }
 0x2f9   :  { %8595 = vmatprep.mubr.msk.bf16.mxu1 %vm280_vm0, %v8059_v11  ;;  %v8090_v0 = vcombine.high %v5874_v36, %v5874_v36  ;;  %v5972_v24 = vsel %vm9638_vm12, %v8105_v41, %v5971_v30  ;;  %v8083_v54 = vcombine.low %v5871_v47, %v5871_v47  ;;  %v8084_v32 = vcombine.high %v5871_v47, %v5871_v47 }
 0x2fa   :  { %v8124_v42 = vcombine.low %v5972_v24, %v5976_v31  ;;  %v5980_v33 = vsel %vm9638_vm12, %v8107_v7, %v5979_v4  ;;  %v8087_v15 = vcombine.low %v5873_v29, %v5873_v29  ;;  %v8088_v62 = vcombine.high %v5873_v29, %v5873_v29  ;;  %v6415_v24 = vld [vmem:[#allocation2 + $0x18] sm:$0x1f] }
 0x2fb   :  { %v8125_v2 = vcombine.low %v5980_v33, %v5984_v35  ;;  %v8110_v60 = vrot.slane %v8085_v18, 9  ;;  %v5991_v40 = vrot.slane %v8086_v8, 5  ;;  %v8112_v51 = vrot.slane %v8089_v37, 9 }
 0x2fc   :  { %v5999_v27 = vrot.slane %v8090_v0, 5  ;;  %v8109_v5 = vrot.slane %v8083_v54, 9  ;;  %v5987_v11 = vrot.slane %v8084_v32, 5  ;;  %v8111_v6 = vrot.slane %v8087_v15, 9  ;;  %v9024_v32 = vld [vmem:[#allocation2 + $0x10] ss:$8 sps:$4 sm:$0xff]  }
 0x2fd   :  { %v5995_v13 = vrot.slane %v8088_v62, 5  ;;  %v5992_v45 = vsel %vm9638_vm12, %v8110_v60, %v5991_v40  ;;  %v8093_v22 = vcombine.low %v5876_v16, %v5876_v16  ;;  %v8094_v57 = vcombine.high %v5876_v16, %v5876_v16  ;;  %v6416_v15 = vld [vmem:[#allocation2 + $0x20] sm:$0x1f]  ;;  %v10500_v60 = vld [vmem:[#allocation2 + $0x28] sm:$0x1f] }
 0x2fe   :  { %v6000_v38 = vsel %vm9638_vm12, %v8112_v51, %v5999_v27  ;;  %v8097_v61 = vcombine.low %v5878_v50, %v5878_v50  ;;  %v8098_v43 = vcombine.high %v5878_v50, %v5878_v50  ;;  %v5988_v59 = vsel %vm9638_vm12, %v8109_v5, %v5987_v11  ;;  %v9026_v51 = vld [vmem:[#allocation2 + $0x20] ss:$8 sps:$4 sm:$0xff]   ;;  %v9030_v27 = vld [vmem:[%s10819_s4 + $0x78] sm:$0xff]   ;;  %v10505_v16 = vld [vmem:[#allocation2 + $0x30] sm:$0x1f] }
 0x2ff   :  { %v8091_v34 = vcombine.low %v5875_v19, %v5875_v19  ;;  %v8092_v48 = vcombine.high %v5875_v19, %v5875_v19  ;;  %v8126_v17 = vcombine.low %v5988_v59, %v5992_v45  ;;  %v5996_v21 = vsel %vm9638_vm12, %v8111_v6, %v5995_v13  ;;  %v9027_v5 = vld [vmem:[#allocation2 + $0x30] ss:$8 sps:$4 sm:$0xff]  }
 0x300   :  { %8596 = vmatmul.mubr.msk.bf16.gmra.mrb[12].mxu1 %vm280_vm0, %v8060_v58  ;;  %v8127_v63 = vcombine.low %v5996_v21, %v6000_v38  ;;  %v8114_v25 = vrot.slane %v8093_v22, 9  ;;  %v6007_v55 = vrot.slane %v8094_v57, 5  ;;  %v8116_v1 = vrot.slane %v8097_v61, 9  ;;  %v10507_v13 = vld [vmem:[#allocation2 + $0x38] sm:$0x1f]  ;;  %v10519_v61 = vld [vmem:[%s10819_s4 + $0x80] sm:$0xff]  }
 0x301   :  { %8603 = vmatprep.mubr.msk.bf16.mxu1 %vm280_vm0, %v8123_v10  ;;  %v6015_v58 = vrot.slane %v8098_v43, 5  ;;  %v8113_v26 = vrot.slane %v8091_v34, 9  ;;  %v6003_v14 = vrot.slane %v8092_v48, 5  ;;  %v8101_v44 = vcombine.low %v5880_v53, %v5880_v53 }
 0x302   :  { %v6008_v28 = vsel %vm9638_vm12, %v8114_v25, %v6007_v55  ;;  %v8102_v56 = vcombine.high %v5880_v53, %v5880_v53  ;;  %v8099_v36 = vcombine.low %v5879_v52, %v5879_v52  ;;  %v8100_v7 = vcombine.high %v5879_v52, %v5879_v52  ;;  %v9028_v53 = vld [vmem:[#allocation2 + $0x40] ss:$8 sps:$4 sm:$0xff]  }
 0x303   :  { %v6016_v41 = vsel %vm9638_vm12, %v8116_v1, %v6015_v58  ;;  %v6004_v30 = vsel %vm9638_vm12, %v8113_v26, %v6003_v14  ;;  %v8118_v18 = vrot.slane %v8101_v44, 9  ;;  %v8165_v33 = vcombine.low %v6415_v24, %v6415_v24  ;;  %v9029_v52 = vld [vmem:[#allocation2 + $0x60] ss:$8 sps:$4 sm:$0xff]  }
 0x304   :  { %v8128_v4 = vcombine.low %v6004_v30, %v6008_v28  ;;  %v6023_v8 = vrot.slane %v8102_v56, 5  ;;  %v8117_v29 = vrot.slane %v8099_v36, 9  ;;  %v6019_v35 = vrot.slane %v8100_v7, 5 }
 0x305   :  { %v8167_v40 = vcombine.low %v6416_v15, %v6416_v15  ;;  %v8166_v11 = vcombine.high %v6415_v24, %v6415_v24  ;;  %v8169_v22 = vcombine.low %v10500_v60, %v10500_v60  ;;  %v8171_v38 = vcombine.low %v10505_v16, %v10505_v16 }
 0x306   :  { %v6024_v37 = vsel %vm9638_vm12, %v8118_v18, %v6023_v8  ;;  %v6020_v0 = vsel %vm9638_vm12, %v8117_v29, %v6019_v35  ;;  %v8173_v43 = vcombine.low %v10507_v13, %v10507_v13  ;;  %vm9140_vm1 = vmmov 0  }
 0x307   :  { %v8130_v54 = vcombine.low %v6020_v0, %v6024_v37  ;;  %v6539_v57 = vshrl.u32 %v8167_v40, 16  ;;  %v6567_v1 = vshrl.u32 %v8171_v38, 16  ;;  %v6570_v58 = vshll.u32 %v8171_v38, 16 }
 0x308   :  { %8604 = vmatmul.mubr.msk.bf16.vlgmr.msra.gmra.mrb[0].mxu1 %vm280_vm0, %v8124_v42  ;;  %v6414_v42 = vld [vmem:[#allocation2 + $0x10] sm:$0x1f]  ;;  %v6581_v26 = vshrl.u32 %v8173_v43, 16  ;;  %v6584_v14 = vshll.u32 %v8173_v43, 16  ;;  %vm7312_vm2 = vcmask 523264   ;;  %vm7376_vm3 = vcmask 1041409  }
 0x309   :  { %8620 = vmatpush3.bf16.msra.mxu1 %v10421_v12  ;;  %8607 = vmatprep.mubr.msk.bf16.mxu1 %vm280_vm0, %v8125_v2  ;;  %v5877_v12 = vld [vmem:[#allocation2 + $0x78] sm:$0x1e]  ;;  %v8163_v62 = vcombine.low %v6414_v42, %v6414_v42  ;;  %v6528_v2 = vshll.u32 %v8165_v33, 16  ;;  %v8164_v59 = vcombine.high %v6414_v42, %v6414_v42  ;;  %v6541_v25 = vrot.slane %v6539_v57, 4 }
 0x30a   :  { %8621 = vmatprep.subr.bf16.mxu1 %v9011_v49  ;;  %v8095_v39 = vcombine.low %v5877_v12, %v5877_v12  ;;  %v8096_v20 = vcombine.high %v5877_v12, %v5877_v12  ;;  %v6542_v12 = vshll.u32 %v8167_v40, 16  ;;  %v6572_v18 = vrot.slane %v6570_v58, 5 }
 0x30b   :  { %v6511_v50 = vshrl.u32 %v8163_v62, 16  ;;  %v6514_v6 = vshll.u32 %v8163_v62, 16  ;;  %v6530_v45 = vrot.slane %v6528_v2, 5  ;;  %v6520_v44 = vshll.u32 %v8164_v59, 16 }
 0x30c   :  { %v8115_v10 = vrot.slane %v8095_v39, 9  ;;  %v6011_v46 = vrot.slane %v8096_v20, 5  ;;  %v8168_v39 = vcombine.high %v6416_v15, %v6416_v15  ;;  %v6553_v20 = vshrl.u32 %v8169_v22, 16 }
 0x30d   :  { %8622 = vmatpush3.bf16.msra.mxu1 %v9011_v49  ;;  %v6525_v49 = vshrl.u32 %v8165_v33, 16  ;;  %v6513_v34 = vrot.slane %v6511_v50, 4  ;;  %v6516_v48 = vrot.slane %v6514_v6, 5  ;;  %v6544_v55 = vrot.slane %v6542_v12, 5  ;;  %v10538_v33 = vld [vmem:[#allocation2 + $0x60] sm:$0x1f] }
 0x30e   :  { %8639 = vmatprep.subr.bf16.mxu1 %v10471_v23  ;;  %v6012_v47 = vsel %vm9638_vm12, %v8115_v10, %v6011_v46  ;;  %v10526_v10 = vld [vmem:[#allocation2 + $0x48] sm:$0x1f]  ;;  %v6548_v36 = vshll.u32 %v8168_v39, 16  ;;  %v6555_v7 = vrot.slane %v6553_v20, 4  ;;  %v6583_v29 = vrot.slane %v6581_v26, 4 }
 0x30f   :  { %v8129_v31 = vcombine.low %v6012_v47, %v6016_v41  ;;  %v6527_v19 = vrot.slane %v6525_v49, 4  ;;  %v6517_v28 = vor.u32 %v6516_v48, %v6513_v34  ;;  %v8170_v41 = vcombine.high %v10500_v60, %v10500_v60  ;;  %v10546_v60 = vld [vmem:[#allocation2 + $0x68] sm:$0x1f]  ;;  %v10561_v20 = vld [vmem:[#allocation2 + $0x78] sm:$0x1f] }
 0x310   :  { %8608 = vmatmul.mubr.msk.bf16.gmra.mrb[4].mxu1 %vm280_vm0, %v8126_v17  ;;  %v10523_v17 = vld [vmem:[#allocation2 + $0x40] sm:$0x1f]  ;;  %v6545_v47 = vor.u32 %v6544_v55, %v6541_v25  ;;  %v8177_v8 = vcombine.low %v10526_v10, %v10526_v10  ;;  %v6586_v35 = vrot.slane %v6584_v14, 5  ;;  %v8172_v42 = vcombine.high %v10505_v16, %v10505_v16 }
 0x311   :  { %8611 = vmatprep.mubr.msk.bf16.mxu1 %vm280_vm0, %v8127_v63  ;;  %v6531_v21 = vor.u32 %v6530_v45, %v6527_v19  ;;  %v6556_v63 = vshll.u32 %v8169_v22, 16  ;;  %v8175_v46 = vcombine.low %v10523_v17, %v10523_v17  ;;  %v6518_v24 = vrot.slane %v6517_v28, 4  ;;  %v9032_v45 = vld [vmem:[#allocation2 + $0x80] ss:$8 sps:$4 sm:$0xff]  }
 0x312   :  { %v6550_v62 = vrot.slane %v6548_v36, 5  ;;  %v8174_v2 = vcombine.high %v10507_v13, %v10507_v13  ;;  %v6546_v40 = vrot.slane %v6545_v47, 4  ;;  %v6587_v50 = vor.u32 %v6586_v35, %v6583_v29  ;;  %v10577_v36 = vld [vmem:[#allocation2 + $0x88] sm:$0x1f] }
 0x313   :  { %v6532_v30 = vrot.slane %v6531_v21, 4  ;;  %v6595_v37 = vshrl.u32 %v8175_v46, 16  ;;  %v6598_v0 = vshll.u32 %v8175_v46, 16  ;;  %v8179_v19 = vcombine.low %v10538_v33, %v10538_v33 }
 0x314   :  { %v6576_v12 = vshll.u32 %v8172_v42, 16  ;;  %v8181_v13 = vcombine.low %v10546_v60, %v10546_v60  ;;  %v6590_v59 = vshll.u32 %v8174_v2, 16  ;;  %v8176_v34 = vcombine.high %v10523_v17, %v10523_v17 }
 0x315   :  { %v6597_v16 = vrot.slane %v6595_v37, 4  ;;  %v6600_v6 = vrot.slane %v6598_v0, 5  ;;  %v6588_v25 = vrot.slane %v6587_v50, 4  ;;  %v8185_v28 = vcombine.low %v10561_v20, %v10561_v20 }
 0x316   :  { %v6578_v58 = vrot.slane %v6576_v12, 5  ;;  %v6637_v17 = vshrl.u32 %v8181_v13, 16  ;;  %v6640_v26 = vshll.u32 %v8181_v13, 16  ;;  %v6592_v46 = vrot.slane %v6590_v59, 5 }
 0x317   :  { %v6601_v55 = vor.u32 %v6600_v6, %v6597_v16  ;;  %v8189_v42 = vcombine.low %v10577_v36, %v10577_v36  ;;  %v10596_v16 = vld [vmem:[#allocation2 + $0x90] sm:$0x1f]  ;;  %v10598_v6 = vld [vmem:[#allocation2 + $0x98] sm:$0x1f] }
 0x318   :  { %8612 = vmatmul.mubr.msk.bf16.gmra.mrb[8].mxu1 %vm280_vm0, %v8128_v4  ;;  %v6558_v4 = vrot.slane %v6556_v63, 5  ;;  %v10565_v63 = vsel %vm9693_vm15, %v6546_v40, %v6550_v62  ;;  %v6639_v35 = vrot.slane %v6637_v17, 4  ;;  %v6642_v37 = vrot.slane %v6640_v26, 5 }
 0x319   :  { %8615 = vmatprep.mubr.msk.bf16.mxu1 %vm280_vm0, %v8129_v31  ;;  %v6569_v31 = vrot.slane %v6567_v1, 4  ;;  %v6623_v1 = vshrl.u32 %v8179_v19, 16  ;;  %v6602_v47 = vrot.slane %v6601_v55, 4 }
 0x31a   :  { %v6559_v49 = vor.u32 %v6558_v4, %v6555_v7  ;;  %v9033_v7 = vld [vmem:[#allocation2 + $0x90] ss:$8 sps:$4 sm:$0xff]   ;;  %v6593_v4 = vsel %vm9693_vm15, %v6588_v25, %v6592_v46  ;;  %v8186_v25 = vcombine.high %v10561_v20, %v10561_v20 }
 0x31c   :  { %v6560_v43 = vrot.slane %v6559_v49, 4 }
 0x320   :  { %8616 = vmatmul.mubr.msk.bf16.gmra.mrb[12].mxu1 %vm280_vm0, %v8130_v54  ;;  %v6522_v54 = vrot.slane %v6520_v44, 5 }
 0x321   :  { %8623 = vmatprep.mubr.msk.bf16.mxu1 %vm280_vm0, %v9024_v32  ;;  %v6562_v32 = vshll.u32 %v8170_v41, 16 }
 0x322   :  { %v6523_v22 = vsel %vm9693_vm15, %v6518_v24, %v6522_v54  ;;  %v6665_v54 = vshrl.u32 %v8185_v28, 16 }
 0x323   :  { %v6564_v57 = vrot.slane %v6562_v32, 5  ;;  %v6668_v32 = vshll.u32 %v8185_v28, 16 }
 0x325   :  { %v6565_v14 = vsel %vm9693_vm15, %v6560_v43, %v6564_v57  ;;  %v6696_v57 = vshll.u32 %v8189_v42, 16 }
 0x326   :  { %v8200_v2 = vcombine.low %v10565_v63, %v6565_v14  ;;  %v8190_v14 = vcombine.high %v10577_v36, %v10577_v36 }
 0x327   :  { %v6698_v17 = vrot.slane %v6696_v57, 5 }
 0x328   :  { %8624 = vmatmul.mubr.msk.bf16.vlgmr.msra.gmra.mrb[0].mxu1 %vm280_vm0, %v9026_v51  ;;  %v6573_v51 = vor.u32 %v6572_v18, %v6569_v31  ;;  %v8182_v31 = vcombine.high %v10546_v60, %v10546_v60  ;;  %v6625_v18 = vrot.slane %v6623_v1, 4 }
 0x329   :  { %8640 = vmatpush3.bf16.msra.mxu1 %v10471_v23  ;;  %8627 = vmatprep.mubr.msk.bf16.mxu1 %vm280_vm0, %v9027_v5  ;;  %v6534_v23 = vshll.u32 %v8166_v11, 16  ;;  %v6612_v5 = vshll.u32 %v8177_v8, 16  ;;  %v9031_v11 = vld [vmem:[#allocation2 + $0x70] ss:$8 sps:$4 sm:$0xff]  }
 0x32a   :  { %8641 = vmatprep.subr.bf16.mxu1 %v9030_v27  ;;  %v6574_v48 = vrot.slane %v6573_v51, 4  ;;  %v6646_v51 = vshll.u32 %v8182_v31, 16 }
 0x32b   :  { %v6536_v56 = vrot.slane %v6534_v23, 5  ;;  %v8178_v23 = vcombine.high %v10526_v10, %v10526_v10  ;;  %v6614_v39 = vrot.slane %v6612_v5, 5  ;;  %v6604_v10 = vshll.u32 %v8176_v34, 16  ;;  %v9055_v34 = vld [vmem:[%s10819_s4 + $0x88] sm:$0xff]  }
 0x32c   :  { %v6579_v44 = vsel %vm9693_vm15, %v6574_v48, %v6578_v58  ;;  %v6643_v5 = vor.u32 %v6642_v37, %v6639_v35  ;;  %v6648_v59 = vrot.slane %v6646_v51, 5  ;;  %v8194_v35 = vcombine.high %v10598_v6, %v10598_v6 }
 0x32d   :  { %8642 = vmatpush3.bf16.msra.mxu1 %v9030_v27  ;;  %v10542_v15 = vsel %vm9693_vm15, %v6532_v30, %v6536_v56  ;;  %v6609_v27 = vshrl.u32 %v8177_v8, 16  ;;  %v6618_v41 = vshll.u32 %v8178_v23, 16  ;;  %v8180_v30 = vcombine.high %v10538_v33, %v10538_v33  ;;  %v10583_v8 = vld [vmem:[#allocation2 + $0x80] sm:$0x1f] }
 0x32e   :  { %8659 = vmatprep.subr.bf16.mxu1 %v10519_v61  ;;  %v8199_v38 = vcombine.low %v6523_v22, %v10542_v15  ;;  %v6606_v24 = vrot.slane %v6604_v10, 5  ;;  %v8187_v49 = vcombine.low %v10583_v8, %v10583_v8  ;;  %v8201_v60 = vcombine.low %v6579_v44, %v6593_v4 }
 0x32f   :  { %v6611_v21 = vrot.slane %v6609_v27, 4  ;;  %v6620_v15 = vrot.slane %v6618_v41, 5  ;;  %v6632_v62 = vshll.u32 %v8180_v30, 16  ;;  %v6693_v22 = vshrl.u32 %v8189_v42, 16 }
 0x330   :  { %8628 = vmatmul.mubr.msk.bf16.gmra.mrb[4].mxu1 %vm280_vm0, %v9028_v53  ;;  %v6626_v53 = vshll.u32 %v8179_v19, 16  ;;  %v6607_v40 = vsel %vm9693_vm15, %v6602_v47, %v6606_v24  ;;  %v6667_v19 = vrot.slane %v6665_v54, 4  ;;  %v6682_v43 = vshll.u32 %v8187_v49, 16 }
 0x331   :  { %8631 = vmatprep.mubr.msk.bf16.mxu1 %vm280_vm0, %v9029_v52  ;;  %v10569_v52 = vld [vmem:[#allocation2 + $0x70] sm:$0x1f]  ;;  %v6615_v56 = vor.u32 %v6614_v39, %v6611_v21  ;;  %v6634_v13 = vrot.slane %v6632_v62, 5  ;;  %v8191_v23 = vcombine.low %v10596_v16, %v10596_v16  ;;  %v8193_v21 = vcombine.low %v10598_v6, %v10598_v6 }
 0x332   :  { %v6628_v29 = vrot.slane %v6626_v53, 5  ;;  %v8183_v0 = vcombine.low %v10569_v52, %v10569_v52  ;;  %v8184_v48 = vcombine.high %v10569_v52, %v10569_v52  ;;  %v6644_v63 = vrot.slane %v6643_v5, 4 }
 0x333   :  { %v6616_v33 = vrot.slane %v6615_v56, 4  ;;  %v6695_v53 = vrot.slane %v6693_v22, 4  ;;  %v6684_v10 = vrot.slane %v6682_v43, 5  ;;  %v6707_v52 = vshrl.u32 %v8191_v23, 16 }
 0x334   :  { %v6629_v27 = vor.u32 %v6628_v29, %v6625_v18  ;;  %v6654_v50 = vshll.u32 %v8183_v0, 16  ;;  %v6710_v20 = vshll.u32 %v8191_v23, 16  ;;  %v6721_v28 = vshrl.u32 %v8193_v21, 16 }
 0x335   :  { %v6621_v12 = vsel %vm9693_vm15, %v6616_v33, %v6620_v15  ;;  %v6724_v44 = vshll.u32 %v8193_v21, 16  ;;  %v6660_v41 = vshll.u32 %v8184_v48, 16  ;;  %v6674_v30 = vshll.u32 %v8186_v25, 16  ;;  %v6915_v21 = vld [vmem:[#allocation2 + $0x28] sm:$0x1e] }
 0x336   :  { %v6630_v39 = vrot.slane %v6629_v27, 4  ;;  %v6656_v1 = vrot.slane %v6654_v50, 5  ;;  %v8202_v26 = vcombine.low %v6607_v40, %v6621_v12  ;;  %v6699_v47 = vor.u32 %v6698_v17, %v6695_v53  ;;  %v6913_v40 = vld [vmem:[#allocation2 + $0x18] sm:$0x1e]  ;;  %v6912_v50 = vld [vmem:[#allocation2 + $0x10] sm:$0x1e] }
 0x337   :  { %v6702_v18 = vshll.u32 %v8190_v14, 16  ;;  %v8192_v29 = vcombine.high %v10596_v16, %v10596_v16  ;;  %v6709_v37 = vrot.slane %v6707_v52, 4  ;;  %v6723_v24 = vrot.slane %v6721_v28, 4  ;;  %v6914_v25 = vld [vmem:[#allocation2 + $0x20] sm:$0x1e] }
 0x338   :  { %8632 = vmatmul.mubr.msk.bf16.gmra.mrb[8].mxu1 %vm280_vm0, %v9031_v11  ;;  %v6651_v11 = vshrl.u32 %v8183_v0, 16  ;;  %v6635_v56 = vsel %vm9693_vm15, %v6630_v39, %v6634_v13  ;;  %v6712_v0 = vrot.slane %v6710_v20, 5  ;;  %v6726_v54 = vrot.slane %v6724_v44, 5 }
 0x339   :  { %8635 = vmatprep.mubr.msk.bf16.mxu1 %vm280_vm0, %v9032_v45  ;;  %v6670_v45 = vrot.slane %v6668_v32, 5  ;;  %v6676_v32 = vrot.slane %v6674_v30, 5  ;;  %v6700_v15 = vrot.slane %v6699_v47, 4  ;;  %v6662_v62 = vrot.slane %v6660_v41, 5 }
 0x33a   :  { %v6653_v55 = vrot.slane %v6651_v11, 4  ;;  %v6713_v51 = vor.u32 %v6712_v0, %v6709_v37  ;;  %v6716_v27 = vshll.u32 %v8192_v29, 16  ;;  %v6727_v5 = vor.u32 %v6726_v54, %v6723_v24  ;;  %v6921_v37 = vld [vmem:[#allocation2 + $0x68] sm:$0x1e] }
 0x33b   :  { %v6671_v58 = vor.u32 %v6670_v45, %v6667_v19  ;;  %v6730_v11 = vshll.u32 %v8194_v35, 16  ;;  %v8219_v45 = vcombine.low %v6913_v40, %v6913_v40  ;;  %v8220_v22 = vcombine.high %v6913_v40, %v6913_v40  ;;  %v6919_v35 = vld [vmem:[#allocation2 + $0x48] sm:$0x1e] }
 0x33c   :  { %v6657_v4 = vor.u32 %v6656_v1, %v6653_v55  ;;  %v8217_v13 = vcombine.low %v6912_v50, %v6912_v50  ;;  %v6714_v43 = vrot.slane %v6713_v51, 4  ;;  %v8224_v14 = vcombine.high %v6915_v21, %v6915_v21 }
 0x33d   :  { %v6672_v36 = vrot.slane %v6671_v58, 4  ;;  %v6732_v48 = vrot.slane %v6730_v11, 5  ;;  %v8250_v39 = vrot.slane %v8219_v45, 9  ;;  %v6917_v58 = vld [vmem:[#allocation2 + $0x38] sm:$0x1e]  ;;  %v8222_v20 = vcombine.high %v6914_v25, %v6914_v25 }
 0x33e   :  { %v6658_v33 = vrot.slane %v6657_v4, 4  ;;  %v8249_v55 = vrot.slane %v8217_v13, 9  ;;  %v8227_v28 = vcombine.low %v6917_v58, %v6917_v58  ;;  %v8228_v44 = vcombine.high %v6917_v58, %v6917_v58 }
 0x340   :  { %8636 = vmatmul.mubr.msk.bf16.gmra.mrb[12].mxu1 %vm280_vm0, %v9033_v7  ;;  %v6649_v7 = vsel %vm9693_vm15, %v6644_v63, %v6648_v59  ;;  %v6663_v6 = vsel %vm9693_vm15, %v6658_v33, %v6662_v62  ;;  %v6718_v59 = vrot.slane %v6716_v27, 5  ;;  %v7014_v63 = vrot.slane %v8220_v22, 5 }
 0x341   :  { %8643 = vmatprep.mubr.msk.bf16.mxu1 %vm280_vm0, %v8199_v38  ;;  %v6679_v38 = vshrl.u32 %v8187_v49, 16  ;;  %v6677_v49 = vsel %vm9693_vm15, %v6672_v36, %v6676_v32  ;;  %v6918_v36 = vld [vmem:[#allocation2 + $0x40] sm:$0x1e]  ;;  %v7030_v29 = vrot.slane %v8228_v44, 5  ;;  %v8232_v33 = vcombine.high %v6919_v35, %v6919_v35  ;;  %v6927_v44 = vld [vmem:[#allocation2 + $0x98] sm:$0x1e] }
 0x342   :  { %v8204_v57 = vcombine.low %v6663_v6, %v6677_v49  ;;  %v6719_v53 = vsel %vm9693_vm15, %v6714_v43, %v6718_v59  ;;  %v7015_v52 = vsel %vm9638_vm12, %v8250_v39, %v7014_v63  ;;  %v8230_v32 = vcombine.high %v6918_v36, %v6918_v36  ;;  %v6922_v43 = vld [vmem:[#allocation2 + $0x70] sm:$0x1e] }
 0x343   :  { %v6681_v46 = vrot.slane %v6679_v38, 4  ;;  %v8218_v38 = vcombine.high %v6912_v50, %v6912_v50 }
 0x345   :  { %v6685_v31 = vor.u32 %v6684_v10, %v6681_v46  ;;  %v7010_v1 = vrot.slane %v8218_v38, 5  ;;  %v8221_v46 = vcombine.low %v6914_v25, %v6914_v25  ;;  %v6916_v10 = vld [vmem:[#allocation2 + $0x30] sm:$0x1e] }
 0x346   :  { %v8226_v4 = vcombine.high %v6916_v10, %v6916_v10 }
 0x347   :  { %v7011_v41 = vsel %vm9638_vm12, %v8249_v55, %v7010_v1  ;;  %v8251_v47 = vrot.slane %v8221_v46, 9  ;;  %v8237_v55 = vcombine.low %v6922_v43, %v6922_v43  ;;  %v8238_v1 = vcombine.high %v6922_v43, %v6922_v43 }
 0x348   :  { %8644 = vmatmul.mubr.msk.bf16.vlgmr.msra.gmra.mrb[0].mxu1 %vm280_vm0, %v8200_v2  ;;  %v6686_v2 = vrot.slane %v6685_v31, 4  ;;  %v8269_v3 = vcombine.low %v7011_v41, %v7015_v52  ;;  %v7018_v31 = vrot.slane %v8222_v20, 5  ;;  %v7026_v54 = vrot.slane %v8226_v4, 5  ;;  %v6926_v52 = vld [vmem:[#allocation2 + $0x90] sm:$0x1e] }
 0x349   :  { %8660 = vmatpush3.bf16.msra.mxu1 %v10519_v61  ;;  %8647 = vmatprep.mubr.msk.bf16.mxu1 %vm280_vm0, %v8201_v60  ;;  %v8188_v61 = vcombine.high %v10583_v8, %v10583_v8  ;;  %v8203_v8 = vcombine.low %v6635_v56, %v6649_v7  ;;  %v6704_v60 = vrot.slane %v6702_v18, 5  ;;  %v8225_v7 = vcombine.low %v6916_v10, %v6916_v10 }
 0x34a   :  { %8661 = vmatprep.subr.bf16.mxu1 %v9055_v34  ;;  %v8254_v18 = vrot.slane %v8227_v28, 9  ;;  %v7019_v62 = vsel %vm9638_vm12, %v8251_v47, %v7018_v31  ;;  %v7050_v41 = vrot.slane %v8238_v1, 5  ;;  %v8248_v47 = vcombine.high %v6927_v44, %v6927_v44 }
 0x34b   :  { %v6688_v42 = vshll.u32 %v8188_v61, 16  ;;  %v6705_v19 = vsel %vm9693_vm15, %v6700_v15, %v6704_v60  ;;  %v7022_v61 = vrot.slane %v8224_v14, 5  ;;  %v8253_v24 = vrot.slane %v8225_v7, 9  ;;  %v6920_v15 = vld [vmem:[#allocation2 + $0x60] sm:$0x1e] }
 0x34c   :  { %v7031_v49 = vsel %vm9638_vm12, %v8254_v18, %v7030_v29  ;;  %v8236_v60 = vcombine.high %v6921_v37, %v6921_v37  ;;  %v8234_v11 = vcombine.high %v6920_v15, %v6920_v15  ;;  %v8245_v7 = vcombine.low %v6926_v52, %v6926_v52 }
 0x34d   :  { %8662 = vmatpush3.bf16.msra.mxu1 %v9055_v34  ;;  %v6690_v16 = vrot.slane %v6688_v42, 5  ;;  %v6728_v34 = vrot.slane %v6727_v5, 4  ;;  %v8231_v42 = vcombine.low %v6919_v35, %v6919_v35  ;;  %v7027_v51 = vsel %vm9638_vm12, %v8253_v24, %v7026_v54 }
 0x34e   :  { %v8233_v5 = vcombine.low %v6920_v15, %v6920_v15  ;;  %v8271_v50 = vcombine.low %v7027_v51, %v7031_v49  ;;  %v7046_v22 = vrot.slane %v8236_v60, 5  ;;  %v7042_v38 = vrot.slane %v8234_v11, 5 }
 0x34f   :  { %v6691_v12 = vsel %vm9693_vm15, %v6686_v2, %v6690_v16  ;;  %v6733_v17 = vsel %vm9693_vm15, %v6728_v34, %v6732_v48  ;;  %v8235_v2 = vcombine.low %v6921_v37, %v6921_v37  ;;  %v7034_v16 = vrot.slane %v8230_v32, 5 }
 0x350   :  { %8648 = vmatmul.mubr.msk.bf16.gmra.mrb[4].mxu1 %vm280_vm0, %v8202_v26  ;;  %v8205_v23 = vcombine.low %v6691_v12, %v6705_v19  ;;  %v8223_v26 = vcombine.low %v6915_v21, %v6915_v21  ;;  %v8206_v56 = vcombine.low %v6719_v53, %v6733_v17  ;;  %v8256_v6 = vrot.slane %v8231_v42, 9  ;;  %v6925_v12 = vld [vmem:[#allocation2 + $0x88] sm:$0x1e]  ;;  %v6924_v21 = vld [vmem:[#allocation2 + $0x80] sm:$0x1e] }
 0x351   :  { %8651 = vmatprep.mubr.msk.bf16.mxu1 %vm280_vm0, %v8203_v8  ;;  %v8229_v8 = vcombine.low %v6918_v36, %v6918_v36  ;;  %v7038_v19 = vrot.slane %v8232_v33, 5  ;;  %v8258_v45 = vrot.slane %v8235_v2, 9  ;;  %v8257_v13 = vrot.slane %v8233_v5, 9 }
 0x352   :  { %v8252_v30 = vrot.slane %v8223_v26, 9  ;;  %v8243_v63 = vcombine.low %v6925_v12, %v6925_v12  ;;  %v8244_v25 = vcombine.high %v6925_v12, %v6925_v12  ;;  %v8241_v17 = vcombine.low %v6924_v21, %v6924_v21  ;;  %v9101_v12 = vld [vmem:[%s10822_s7 + $0x8] sm:$0xff]  }
 0x353   :  { %v8255_v27 = vrot.slane %v8229_v8, 9  ;;  %v7039_v34 = vsel %vm9638_vm12, %v8256_v6, %v7038_v19  ;;  %v7047_v39 = vsel %vm9638_vm12, %v8258_v45, %v7046_v22  ;;  %v7043_v53 = vsel %vm9638_vm12, %v8257_v13, %v7042_v38  ;;  %v9100_v22 = vld [vmem:[%s10822_s7] sm:$0xff]   ;;  %v9102_v13 = vld [vmem:[%s10822_s7 + $0x10] sm:$0xff]   ;;  %v9103_v38 = vld [vmem:[%s10822_s7 + $0x18] sm:$0xff]  }
 0x354   :  { %v7023_v0 = vsel %vm9638_vm12, %v8252_v30, %v7022_v61  ;;  %v8242_v26 = vcombine.high %v6924_v21, %v6924_v21  ;;  %v8273_v14 = vcombine.low %v7043_v53, %v7047_v39  ;;  %v8262_v20 = vrot.slane %v8243_v63, 9 }
 0x355   :  { %v8270_v40 = vcombine.low %v7019_v62, %v7023_v0  ;;  %v7035_v59 = vsel %vm9638_vm12, %v8255_v27, %v7034_v16  ;;  %v7062_v28 = vrot.slane %v8244_v25, 5  ;;  %v8261_v30 = vrot.slane %v8241_v17, 9 }
 0x356   :  { %v8272_v58 = vcombine.low %v7035_v59, %v7039_v34  ;;  %v7058_v61 = vrot.slane %v8242_v26, 5  ;;  %v8247_v36 = vcombine.low %v6927_v44, %v6927_v44  ;;  %v8263_v37 = vrot.slane %v8245_v7, 9  ;;  %v10723_v59 = vld [vmem:[%s10820_s5] ss:$0 sm:$0xff] }
 0x357   :  { %v7063_v31 = vsel %vm9638_vm12, %v8262_v20, %v7062_v28  ;;  %v7070_v8 = vrot.slane %v8248_v47, 5 }
 0x358   :  { %8652 = vmatmul.mubr.msk.bf16.gmra.mrb[8].mxu1 %vm280_vm0, %v8204_v57  ;;  %v6923_v57 = vld [vmem:[#allocation2 + $0x78] sm:$0x1e]  ;;  %v7059_v35 = vsel %vm9638_vm12, %v8261_v30, %v7058_v61  ;;  %v8264_v54 = vrot.slane %v8247_v36, 9 }
 0x359   :  { %8655 = vmatprep.mubr.msk.bf16.mxu1 %vm280_vm0, %v8205_v23  ;;  %v8239_v48 = vcombine.low %v6923_v57, %v6923_v57  ;;  %v8240_v23 = vcombine.high %v6923_v57, %v6923_v57  ;;  %v8275_v0 = vcombine.low %v7059_v35, %v7063_v31  ;;  %v9139_v57 = vmov 0.0  }
 0x35a   :  { %v7071_v42 = vsel %vm9638_vm12, %v8264_v54, %v7070_v8  ;;  %8679 = vmatprep.subr.bf16.mxu0 %v9139_v57  ;;  %8687 = vmatprep.mubr.msk.bf16.mxu0 %vm9140_vm1, %v9139_v57 }
 0x35b   :  { %v8260_v46 = vrot.slane %v8239_v48, 9  ;;  %v7054_v10 = vrot.slane %v8240_v23, 5  ;;  %8680 = vmatpush3.bf16.msra.mxu0 %v9100_v22  ;;  %v10728_v23 = vld [vmem:[%s10821_s6] ss:$0 sm:$0xff] }
 0x35c   :  { %8681 = vmatprep.subr.bf16.mxu0 %v9139_v57 }
 0x35d   :  { %v7055_v4 = vsel %vm9638_vm12, %v8260_v46, %v7054_v10 }
 0x35f   :  { %8682 = vmatpush3.bf16.msra.mxu0 %v9101_v12 }
 0x360   :  { %8656 = vmatmul.mubr.msk.bf16.gmra.mrb[12].mxu1 %vm280_vm0, %v8206_v56  ;;  %v8259_v56 = vrot.slane %v8237_v55, 9  ;;  %8683 = vmatprep.subr.bf16.mxu0 %v9139_v57 }
 0x361   :  { %8663 = vmatprep.mubr.msk.bf16.mxu1 %vm280_vm0, %v8269_v3  ;;  %v8246_v3 = vcombine.high %v6926_v52, %v6926_v52 }
 0x362   :  { %v7051_v18 = vsel %vm9638_vm12, %v8259_v56, %v7050_v41 }
 0x363   :  { %v8274_v29 = vcombine.low %v7051_v18, %v7055_v4  ;;  %v7066_v24 = vrot.slane %v8246_v3, 5  ;;  %8684 = vmatpush3.bf16.msra.mxu0 %v9102_v13 }
 0x364   :  { %8685 = vmatprep.subr.bf16.mxu0 %v9139_v57 }
 0x365   :  { %v7067_v32 = vsel %vm9638_vm12, %v8263_v37, %v7066_v24 }
 0x366   :  { %v8276_v33 = vcombine.low %v7067_v32, %v7071_v42 }
 0x367   :  { %8686 = vmatpush3.bf16.msra.mxu0 %v9103_v38 }
 0x368   :  { %8664 = vmatmul.mubr.msk.bf16.vlgmr.msra.gmra.mrb[0].mxu1 %vm280_vm0, %v8270_v40  ;;  %8691 = vmatprep.subr.bf16.mxu0 %v9139_v57 }
 0x369   :  { %8667 = vmatprep.mubr.msk.bf16.mxu1 %vm280_vm0, %v8271_v50 }
 0x370   :  { %8668 = vmatmul.mubr.msk.bf16.gmra.mrb[4].mxu1 %vm280_vm0, %v8272_v58 }
 0x371   :  { %8671 = vmatprep.mubr.msk.bf16.mxu1 %vm280_vm0, %v8273_v14 }
 0x378   :  { %8672 = vmatmul.mubr.msk.bf16.gmra.mrb[8].mxu1 %vm280_vm0, %v8274_v29 }
 0x379   :  { %8675 = vmatprep.mubr.msk.bf16.mxu1 %vm280_vm0, %v8275_v0 }
 0x380   :  { %8676 = vmatmul.mubr.msk.bf16.gmra.mrb[12].mxu1 %vm280_vm0, %v8276_v33 }
 0x3a5   :  { %v8525_v15 = vpop.f32.mrb[64].mxu0 }
 0x3a6   :  { %v4753_v62 = vpop.f32.mrb[65].mxu0 }
 0x3a7   :  { %v8526_v49 = vpop.f32.mrb[66].mxu0 }
 0x3a8   :  { %v4756_v2 = vpop.f32.mrb[67].mxu0 }
 0x3ad   :  { %v8529_v60 = vpop.f32.mrb[68].mxu0 }
 0x3ae   :  { %v4769_v40 = vpop.f32.mrb[69].mxu0 }
 0x3af   :  { %v8530_v51 = vpop.f32.mrb[70].mxu0 }
 0x3b0   :  { %v4772_v27 = vpop.f32.mrb[71].mxu0 }
 0x3b5   :  { %v10685_v5 = vpop.f32.mrb[72].mxu0 }
 0x3b6   :  { %v10687_v11 = vpop.f32.mrb[73].mxu0 }
 0x3b7   :  { %v10689_v50 = vpop.f32.mrb[74].mxu0 }
 0x3b8   :  { %v10691_v16 = vpop.f32.mrb[75].mxu0 }
 0x3bd   :  { %v10693_v9 = vpop.f32.mrb[76].mxu0 }
 0x3be   :  { %v10695_v6 = vpop.f32.mrb[77].mxu0 }
 0x3bf   :  { %v10697_v19 = vpop.f32.mrb[78].mxu0 }
 0x3c0   :  { %v10699_v45 = vpop.f32.mrb[79].mxu0 }
 0x43b   :  { %v8665_v43 = vpop.f32.mrb[0].mxu1 }
 0x43c   :  { %v8699_v34 = vadd.f32 %v8665_v43, %v8525_v15  ;;  %v7171_v48 = vpop.f32.mrb[1].mxu1 }
 0x43d   :  { %v8700_v21 = vadd.f32 %v7171_v48, %v4753_v62  ;;  %v8666_v39 = vpop.f32.mrb[2].mxu1 }
 0x43e   :  { %v7259_v63 = vmul.f32 %v8699_v34, %v10723_v59  ;;  %v8701_v25 = vadd.f32 %v8666_v39, %v8526_v49  ;;  %v7174_v55 = vpop.f32.mrb[3].mxu1 }
 0x43f   :  { %v7257_v1 = vmul.f32 %v8700_v21, %v10723_v59  ;;  %v8702_v58 = vadd.f32 %v7174_v55, %v4756_v2 }
 0x440   :  { %v7282_v53 = vadd.f32 %v10728_v23, %v7259_v63  ;;  %v7260_v17 = vmul.f32 %v8701_v25, %v10723_v59 }
 0x441   :  { %v7280_v26 = vadd.f32 %v10728_v23, %v7257_v1  ;;  %v7258_v14 = vmul.f32 %v8702_v58, %v10723_v59 }
 0x442   :  { %v7298_v46 = vmax.f32 %v7282_v53, 0.0  ;;  %v7283_v10 = vadd.f32 %v10728_v23, %v7260_v17 }
 0x443   :  { %v7296_v52 = vmax.f32 %v7280_v26, 0.0  ;;  %v7281_v20 = vadd.f32 %v10728_v23, %v7258_v14  ;;  %v8669_v28 = vpop.f32.mrb[4].mxu1 }
 0x444   :  { %v7315_v44 = vsel %vm7312_vm2, %v7298_v46, -inf  ;;  %v7299_v56 = vmax.f32 %v7283_v10, 0.0  ;;  %v8703_v41 = vadd.f32 %v8669_v28, %v8529_v60  ;;  %v7187_v30 = vpop.f32.mrb[5].mxu1 }
 0x445   :  { %v7313_v61 = vsel %vm7312_vm2, %v7296_v52, -inf  ;;  %v7297_v7 = vmax.f32 %v7281_v20, 0.0  ;;  %v8704_v4 = vadd.f32 %v7187_v30, %v4769_v40  ;;  %v8670_v3 = vpop.f32.mrb[6].mxu1 }
 0x446   :  { %v7316_v36 = vmax.f32 %v7313_v61, %v7315_v44  ;;  %v7317_v47 = vsel %vm7312_vm2, %v7299_v56, -inf  ;;  %v7263_v31 = vmul.f32 %v8703_v41, %v10723_v59  ;;  %v8705_v18 = vadd.f32 %v8670_v3, %v8530_v51  ;;  %v7190_v29 = vpop.f32.mrb[7].mxu1 }
 0x447   :  { %v7314_v35 = vsel %vm7312_vm2, %v7297_v7, -inf  ;;  %v7261_v37 = vmul.f32 %v8704_v4, %v10723_v59  ;;  %v8706_v0 = vadd.f32 %v7190_v29, %v4772_v27 }
 0x448   :  { %v7318_v24 = vmax.f32 %v7314_v35, %v7317_v47  ;;  %v7286_v54 = vadd.f32 %v10728_v23, %v7263_v31  ;;  %v7264_v8 = vmul.f32 %v8705_v18, %v10723_v59 }
 0x449   :  { %v7284_v32 = vadd.f32 %v10728_v23, %v7261_v37  ;;  %v7262_v42 = vmul.f32 %v8706_v0, %v10723_v59 }
 0x44a   :  { %v7287_v33 = vadd.f32 %v10728_v23, %v7264_v8  ;;  %v7302_v15 = vmax.f32 %v7286_v54, 0.0 }
 0x44b   :  { %v7300_v62 = vmax.f32 %v7284_v32, 0.0  ;;  %v7285_v49 = vadd.f32 %v10728_v23, %v7262_v42  ;;  %v8673_v2 = vpop.f32.mrb[8].mxu1 }
 0x44c   :  { %v8707_v60 = vadd.f32 %v8673_v2, %v10685_v5  ;;  %v7203_v40 = vpop.f32.mrb[9].mxu1  ;;  %v7303_v27 = vmax.f32 %v7287_v33, 0.0  ;;  %v7323_v21 = vsel %vm7312_vm2, %v7302_v15, -inf }
 0x44d   :  { %v7319_v51 = vsel %vm7312_vm2, %v7300_v62, -inf  ;;  %v7301_v22 = vmax.f32 %v7285_v49, 0.0  ;;  %v8708_v12 = vadd.f32 %v7203_v40, %v10687_v11  ;;  %v8674_v13 = vpop.f32.mrb[10].mxu1 }
 0x44e   :  { %v7320_v38 = vmax.f32 %v7316_v36, %v7319_v51  ;;  %v7267_v43 = vmul.f32 %v8707_v60, %v10723_v59  ;;  %v8709_v34 = vadd.f32 %v8674_v13, %v10689_v50  ;;  %v7206_v48 = vpop.f32.mrb[11].mxu1  ;;  %v7325_v58 = vsel %vm7312_vm2, %v7303_v27, -inf }
 0x44f   :  { %v7321_v39 = vsel %vm7312_vm2, %v7301_v22, -inf  ;;  %v7265_v5 = vmul.f32 %v8708_v12, %v10723_v59  ;;  %v8710_v63 = vadd.f32 %v7206_v48, %v10691_v16 }
 0x450   :  { %v7324_v25 = vmax.f32 %v7320_v38, %v7323_v21  ;;  %v7322_v55 = vmax.f32 %v7318_v24, %v7321_v39  ;;  %v7290_v1 = vadd.f32 %v10728_v23, %v7267_v43  ;;  %v7268_v11 = vmul.f32 %v8709_v34, %v10723_v59 }
 0x451   :  { %v7288_v53 = vadd.f32 %v10728_v23, %v7265_v5  ;;  %v7266_v50 = vmul.f32 %v8710_v63, %v10723_v59 }
 0x452   :  { %v7326_v17 = vmax.f32 %v7322_v55, %v7325_v58  ;;  %v7306_v26 = vmax.f32 %v7290_v1, 0.0  ;;  %v7291_v14 = vadd.f32 %v10728_v23, %v7268_v11  ;;  %v9104_v58 = vld [vmem:[%s10824_s9] sm:$0xff]  }
 0x453   :  { %v7304_v46 = vmax.f32 %v7288_v53, 0.0  ;;  %v7289_v10 = vadd.f32 %v10728_v23, %v7266_v50  ;;  %v8677_v16 = vpop.f32.mrb[12].mxu1  ;;  %v9105_v50 = vld [vmem:[%s10824_s9 + $0x8] sm:$0xff]   ;;  %s7521_s9 = sshll.u32 %s9141_s27, 4  ;;  %s7522_s9 = int_to_ptr.vmem [resolvable:$true] %s7521_s9 }
 0x454   :  { %v7327_v52 = vmax.f32 %v7324_v25, %v7326_v17  ;;  %v7336_v20 = vsel %vm7312_vm2, %v7306_v26, -inf  ;;  %v7307_v28 = vmax.f32 %v7291_v14, 0.0  ;;  %v8711_v44 = vadd.f32 %v8677_v16, %v10693_v9  ;;  %v7219_v56 = vpop.f32.mrb[13].mxu1  ;;  %v8289_v17 = vld [vmem:[%s10823_s8] ss:$0 sm:$0xff]  ;;  %s9113_s8 = scalar_lea.vmem %s7522_s9, 32  ;;  %p9118_p1 = scmp.lt.s32.totalorder %s7522_s9, %s7522_s9 }
 0x455   :  { %v7334_v41 = vsel %vm7312_vm2, %v7304_v46, -inf  ;;  %v7305_v30 = vmax.f32 %v7289_v10, 0.0  ;;  %v8712_v61 = vadd.f32 %v7219_v56, %v10695_v6  ;;  %v8678_v7 = vpop.f32.mrb[14].mxu1  ;;  %p9114_p0 = scmp.ne.s32.totalorder %s7522_s9, %s9113_s8  ;;  %p9119_p2 = scmp.lt.s32.totalorder %s9113_s8, %s9113_s8 }
 0x456   :  { %v7337_v4 = vmax.f32 %v7334_v41, %v7336_v20  ;;  %v7338_v3 = vsel %vm7312_vm2, %v7307_v28, -inf  ;;  %v7271_v36 = vmul.f32 %v8711_v44, %v10723_v59  ;;  %v7222_v47 = vpop.f32.mrb[15].mxu1  ;;  %v8713_v29 = vadd.f32 %v8678_v7, %v10697_v19 }
 0x457   :  { %v7335_v31 = vsel %vm7312_vm2, %v7305_v30, -inf  ;;  %v7269_v18 = vmul.f32 %v8712_v61, %v10723_v59  ;;  %v8714_v9 = vadd.f32 %v7222_v47, %v10699_v45  ;;  %v7328_v35 = vrot.slane %v7327_v52, 4  ;;  %p9120_p3 = por %p9119_p2, %p9118_p1 }
 0x458   :  { %v7339_v37 = vmax.f32 %v7335_v31, %v7338_v3  ;;  %v7294_v0 = vadd.f32 %v10728_v23, %v7271_v36  ;;  %v7272_v24 = vmul.f32 %v8713_v29, %v10723_v59 }
 0x459   :  { %v7292_v6 = vadd.f32 %v10728_v23, %v7269_v18  ;;  %v7270_v54 = vmul.f32 %v8714_v9, %v10723_v59  ;;  %v7329_v15 = vmax.f32 %v7327_v52, %v7328_v35  ;;  %p9121_p4 = pnand %p9120_p3, %p9114_p0 }
 0x45a   :  { %v7310_v8 = vmax.f32 %v7294_v0, 0.0  ;;  %v7295_v42 = vadd.f32 %v10728_v23, %v7272_v24 }
 0x45b   :  { %v7308_v32 = vmax.f32 %v7292_v6, 0.0  ;;  %v7293_v33 = vadd.f32 %v10728_v23, %v7270_v54  ;;  %v7330_v40 = vrot.slane %v7329_v15, 2 }
 0x45c   :  { %v7311_v45 = vmax.f32 %v7295_v42, 0.0  ;;  %v7344_v2 = vsel %vm7312_vm2, %v7310_v8, -inf }
 0x45d   :  { %v7340_v19 = vsel %vm7312_vm2, %v7308_v32, -inf  ;;  %v7309_v62 = vmax.f32 %v7293_v33, 0.0  ;;  %v7331_v12 = vmax.f32 %v7329_v15, %v7330_v40 }
 0x45e   :  { %v7341_v49 = vmax.f32 %v7337_v4, %v7340_v19  ;;  %v7346_v59 = vsel %vm7312_vm2, %v7311_v45, -inf }
 0x45f   :  { %v7342_v60 = vsel %vm7312_vm2, %v7309_v62, -inf  ;;  %v7332_v23 = vrot.slane %v7331_v12, 1 }
 0x460   :  { %v7345_v51 = vmax.f32 %v7341_v49, %v7344_v2  ;;  %v7343_v27 = vmax.f32 %v7339_v37, %v7342_v60 }
 0x461   :  { %v7333_v48 = vmax.f32 %v7331_v12, %v7332_v23 }
 0x462   :  { %v7347_v22 = vmax.f32 %v7343_v27, %v7346_v59 }
 0x463   :  { %v7355_v5 = vpack.c.bf16 %v7333_v48, %v7333_v48 }
 0x464   :  { %v7348_v13 = vmax.f32 %v7345_v51, %v7347_v22 }
 0x465   :  { %v7374_v55 = vunpack.c.l.b16 %v7355_v5 }
 0x466   :  { %v7349_v38 = vrot.slane %v7348_v13, 4 }
 0x468   :  { %v7350_v43 = vmax.f32 %v7348_v13, %v7349_v38 }
 0x46a   :  { %v7351_v34 = vrot.slane %v7350_v43, 2 }
 0x46c   :  { %v7352_v21 = vmax.f32 %v7350_v43, %v7351_v34 }
 0x46e   :  { %v7353_v39 = vrot.slane %v7352_v21, 1 }
 0x470   :  { %v7354_v63 = vmax.f32 %v7352_v21, %v7353_v39 }
 0x472   :  { %v7356_v25 = vpack.c.bf16 %v7354_v63, %v7354_v63 }
 0x474   :  { %v7375_v1 = vunpack.c.l.b16 %v7356_v25 }
 0x476   :  { %v7377_v11 = vsel %vm7376_vm3, %v7375_v1, %v7374_v55 }
 0x477   :  { %v7378_v53 = vpack.c.b16 %v7377_v11, %v7377_v11 }
 0x479   :  { %8688 = vmatmul.mubr.msk.bf16.vlgmr.msra.gmra.mrb[80].mxu0 %vm7312_vm2, %v7378_v53 }
 0x47a   :  { %8692 = vmatpush3.bf16.msra.mxu0 %v9104_v58  ;;  %8695 = vmatprep.mubr.msk.bf16.mxu0 %vm9140_vm1, %v9139_v57 }
 0x47b   :  { %8693 = vmatprep.subr.bf16.mxu0 %v9139_v57  ;;  %v8295_v57 = vld [vmem:[%s10825_s10] ss:$0 sm:$0xff] }
 0x47e   :  { %8694 = vmatpush3.bf16.msra.mxu0 %v9105_v50 }
 0x54c   :  { %v7440_v26 = vpop.f32.mrb[80].mxu0 }
 0x54d   :  { %v7441_v14 = vadd.f32 %v8289_v17, %v7440_v26  ;;  %v8689_v46 = vpop.f32.mrb[81].mxu0 }
 0x54e   :  { %v7443_v10 = vpop.f32.mrb[82].mxu0 }
 0x54f   :  { %v7446_v16 = vmax.f32 %v7441_v14, 0.0  ;;  %v8690_v52 = vpop.f32.mrb[83].mxu0 }
 0x551   :  { %v7447_v20 = vpack.c.bf16 %v7446_v16, %v7446_v16 }
 0x553   :  { %8696 = vmatmul.mubr.msk.bf16.vlgmr.msra.gmra.mrb[84].mxu0 %vm280_vm0, %v7447_v20 }
 0x626   :  { %v7508_v28 = vpop.f32.mrb[84].mxu0 }
 0x627   :  { %v7509_v44 = vadd.f32 %v8295_v57, %v7508_v28  ;;  %v8697_v56 = vpop.f32.mrb[85].mxu0 }
 0x628   :  { %v7511_v41 = vpop.f32.mrb[86].mxu0 }
 0x629   :  { %7514 = vst [vmem:[#allocation3] sm:$0x3] %v7509_v44  ;;  %v8698_v30 = vpop.f32.mrb[87].mxu0 }
 0x62a   :  { %9124 = shalt.err (!%p9121_p4)
}
 0x62b   :  { %s9125_s10 = scalar_lea.hbm %s10826_s11, 32 }
 0x62c   :  { %p9126_p5 = scmp.ne.s32.totalorder %s10826_s11, %s9125_s10  ;;  %p9129_p6 = scmp.lt.u32.totalorder %s9125_s10, %s10826_s11 }
 0x62e   :  { %p9131_p7 = pnand %p9129_p6, %p9126_p5 }
 0x630   :  { %9134 = shalt.err (!%p9131_p7)
}
 0x631   :  { %7524 = dma.vmem_to_hbm [thread:$0]  %s7522_s9, 32, %s10826_s11, [#allocation4]  }
 0x632   :  { %9135 = dma.done.wait [#allocation4], 32  }
 0x633   :  { %9136 = vsyncadd [#allocation4], 4294967264 }
 0x634   :  { %7528 = vsyncpa [#allocation4], 1 }

</bundles_post_ra>
